<compile_context>
chip_gen: v7x
topology: tpu7x:2x2x1
jax: 0.10.0
libtpu: 0.0.40
codegen_flags: <defaults>
</compile_context>

<pallas_src>
import jax
import jax.numpy as jnp
import numpy as np
from jax.experimental import pallas as pl
from jax.experimental.pallas import tpu as pltpu

NC_PAD = 128          # padded lane-dense output width (>= max num_classes)
H1, H2 = 512, 256
NUM_HEADS = 3


def _dequant_bf16(q_int8):
    """int8 -> f32 -> bf16 (int8 is exactly representable in bf16).

    Two-step cast keeps to conversions Mosaic lowers on every TPU generation.
    """
    return q_int8.astype(jnp.float32).astype(jnp.bfloat16)


def _fcn_kernel(x_ref, w1_ref, s1_ref, t1_ref, w2_ref, s2_ref, t2_ref,
                w3_ref, s3_ref, b3_ref, o_ref):
    """Single grid step: all 3 heads, fc1+BN+relu -> fc2+BN+relu -> fc3(+bias).

    Per-column dequant scales (which already include the folded BatchNorm
    scale) are applied to the f32 matmul result, then the additive BN shift /
    bias and ReLU (all f32 on the VPU).  Matmuls are bf16 on the MXU with f32
    accumulation.  Dropout is identity in eval mode.
    """
    x = x_ref[...]                                        # (B, F) bf16

    for h in range(NUM_HEADS):                            # statically unrolled
        w1 = _dequant_bf16(w1_ref[h])                     # (F, H1)
        h1 = jnp.dot(x, w1, preferred_element_type=jnp.float32)
        h1 = jnp.maximum(h1 * s1_ref[h] + t1_ref[h], 0.0)

        w2 = _dequant_bf16(w2_ref[h])                     # (H1, H2)
        h2 = jnp.dot(h1.astype(jnp.bfloat16), w2,
                     preferred_element_type=jnp.float32)
        h2 = jnp.maximum(h2 * s2_ref[h] + t2_ref[h], 0.0)

        w3 = _dequant_bf16(w3_ref[h])                     # (H2, NC_PAD)
        out = jnp.dot(h2.astype(jnp.bfloat16), w3,
                      preferred_element_type=jnp.float32)
        o_ref[h] = (out * s3_ref[h] + b3_ref[h]).astype(o_ref.dtype)


def _fold_bn(bias, gamma, beta, running_mean, running_var, eps=1e-5):
    """Fold Linear bias + BatchNorm1d (eval) into (scale, shift)."""
    scale = gamma / jnp.sqrt(running_var + eps)
    shift = (bias - running_mean) * scale + beta
    return scale, shift


def _quantize_cols(w):
    """Symmetric per-output-column int8 quantization: w ~= q * scale."""
    absmax = jnp.max(jnp.abs(w), axis=0)
    scale = jnp.maximum(absmax, 1e-8) / 127.0
    q = jnp.clip(jnp.round(w / scale[None, :]), -127.0, 127.0).astype(jnp.int8)
    return q, scale[None, :].astype(jnp.float32)          # (K,N) int8, (1,N) f32


def init_params(key, input_features, num_classes1, num_classes2, num_classes3):
    """Deterministic synthetic parameters, BN-folded, int8-packed per head."""
    ncs = (num_classes1, num_classes2, num_classes3)
    keys = jax.random.split(key, 3 * 6)
    ki = 0

    w1q_l, s1_l, t1_l = [], [], []
    w2q_l, s2_l, t2_l = [], [], []
    w3q_l, s3_l, b3_l = [], [], []
    for nc in ncs:
        # Weights stored transposed vs nn.Linear: (in, out).
        w1 = jax.random.normal(keys[ki], (input_features, H1), jnp.float32) * 0.02; ki += 1
        b1 = jax.random.normal(keys[ki], (H1,), jnp.float32) * 0.01; ki += 1
        w2 = jax.random.normal(keys[ki], (H1, H2), jnp.float32) * 0.02; ki += 1
        b2 = jax.random.normal(keys[ki], (H2,), jnp.float32) * 0.01; ki += 1
        w3 = jax.random.normal(keys[ki], (H2, nc), jnp.float32) * 0.02; ki += 1
        b3 = jax.random.normal(keys[ki], (nc,), jnp.float32) * 0.01; ki += 1

        # BatchNorm1d params at fresh init (eval): gamma=1, beta=0, mean=0, var=1.
        g1, be1 = jnp.ones((H1,), jnp.float32), jnp.zeros((H1,), jnp.float32)
        m1, v1 = jnp.zeros((H1,), jnp.float32), jnp.ones((H1,), jnp.float32)
        g2, be2 = jnp.ones((H2,), jnp.float32), jnp.zeros((H2,), jnp.float32)
        m2, v2 = jnp.zeros((H2,), jnp.float32), jnp.ones((H2,), jnp.float32)
        sc1, sh1 = _fold_bn(b1, g1, be1, m1, v1)
        sc2, sh2 = _fold_bn(b2, g2, be2, m2, v2)

        # Fold BN scale into weight columns, then quantize per column to int8.
        q1, qs1 = _quantize_cols(w1 * sc1[None, :])
        w1q_l.append(q1); s1_l.append(qs1); t1_l.append(sh1[None, :])

        q2, qs2 = _quantize_cols(w2 * sc2[None, :])
        w2q_l.append(q2); s2_l.append(qs2); t2_l.append(sh2[None, :])

        # Pad fc3 / bias to a common lane-dense width of NC_PAD.
        w3p = jnp.zeros((H2, NC_PAD), jnp.float32).at[:, :nc].set(w3)
        b3p = jnp.zeros((NC_PAD,), jnp.float32).at[:nc].set(b3)
        q3, qs3 = _quantize_cols(w3p)
        w3q_l.append(q3); s3_l.append(qs3); b3_l.append(b3p[None, :])

    packed = (
        jnp.stack(w1q_l),     # (3, F, 512)      int8
        jnp.stack(s1_l),      # (3, 1, 512)      f32  dequant scale (BN folded)
        jnp.stack(t1_l),      # (3, 1, 512)      f32  BN shift
        jnp.stack(w2q_l),     # (3, 512, 256)    int8
        jnp.stack(s2_l),      # (3, 1, 256)      f32
        jnp.stack(t2_l),      # (3, 1, 256)      f32
        jnp.stack(w3q_l),     # (3, 256, 128)    int8
        jnp.stack(s3_l),      # (3, 1, 128)      f32
        jnp.stack(b3_l),      # (3, 1, 128)      f32
    )
    return packed


def fully_connected_network_forward(x_nchw, packed, ncs):
    """Forward pass. x_nchw: (B, C, H, W). Returns (out1, out2, out3)."""
    # sum_model: identity (see TODO above); nn.Flatten; DMA x as bf16.
    B = x_nchw.shape[0]
    x2d = x_nchw.reshape(B, -1).astype(jnp.bfloat16)
    F = x2d.shape[1]
    w1q, s1, t1, w2q, s2, t2, w3q, s3, b3 = packed

    flops = 2 * B * NUM_HEADS * (F * H1 + H1 * H2 + H2 * NC_PAD)
    bytes_accessed = (
        int(w1q.size + w2q.size + w3q.size)                     # int8 weights
        + int(x2d.size) * 2                                     # bf16 activations in
        + int(s1.size + t1.size + s2.size + t2.size + s3.size + b3.size) * 4
        + NUM_HEADS * B * NC_PAD * 4                            # f32 logits out
    )

    out = pl.pallas_call(
        _fcn_kernel,
        out_shape=jax.ShapeDtypeStruct((NUM_HEADS, B, NC_PAD), jnp.float32),
        grid_spec=pltpu.PrefetchScalarGridSpec(
            num_scalar_prefetch=0,
            grid=(1,),   # single step: kernel is weight-DMA-bound, per-step overhead dominates
            in_specs=[
                pl.BlockSpec((B, F), lambda i: (0, 0)),                      # x (bf16)
                pl.BlockSpec((NUM_HEADS, F, H1), lambda i: (0, 0, 0)),       # w1 (int8)
                pl.BlockSpec((NUM_HEADS, 1, H1), lambda i: (0, 0, 0)),       # scale1
                pl.BlockSpec((NUM_HEADS, 1, H1), lambda i: (0, 0, 0)),       # shift1
                pl.BlockSpec((NUM_HEADS, H1, H2), lambda i: (0, 0, 0)),      # w2 (int8)
                pl.BlockSpec((NUM_HEADS, 1, H2), lambda i: (0, 0, 0)),       # scale2
                pl.BlockSpec((NUM_HEADS, 1, H2), lambda i: (0, 0, 0)),       # shift2
                pl.BlockSpec((NUM_HEADS, H2, NC_PAD), lambda i: (0, 0, 0)),  # w3 (int8, padded)
                pl.BlockSpec((NUM_HEADS, 1, NC_PAD), lambda i: (0, 0, 0)),   # scale3
                pl.BlockSpec((NUM_HEADS, 1, NC_PAD), lambda i: (0, 0, 0)),   # b3 (padded)
            ],
            out_specs=pl.BlockSpec((NUM_HEADS, B, NC_PAD), lambda i: (0, 0, 0)),
        ),
        compiler_params=pltpu.CompilerParams(
            dimension_semantics=("arbitrary",),
            # dequant temporaries + double-buffered inputs exceed v5e's 16 MiB
            # scoped default; 48 MiB is safely below v7x's 64 MiB physical VMEM.
            vmem_limit_bytes=48 * 1024 * 1024,
        ),
        cost_estimate=pl.CostEstimate(
            flops=flops, transcendentals=0, bytes_accessed=bytes_accessed),
    )(x2d, w1q, s1, t1, w2q, s2, t2, w3q, s3, b3)

    # Slice away the lane padding per head.
    return tuple(out[h, :, :nc] for h, nc in enumerate(ncs))


def _reference_forward(x_nchw, packed, ncs):
    """Pure-JAX f32 reference using the same (dequantized) weights."""
    B = x_nchw.shape[0]
    x = x_nchw.reshape(B, -1).astype(jnp.float32)
    w1q, s1, t1, w2q, s2, t2, w3q, s3, b3 = packed
    outs = []
    for h, nc in enumerate(ncs):
        h1 = jnp.maximum(x @ (w1q[h].astype(jnp.float32) * s1[h]) + t1[h], 0.0)
        h2 = jnp.maximum(h1 @ (w2q[h].astype(jnp.float32) * s2[h]) + t2[h], 0.0)
        o = h2 @ (w3q[h].astype(jnp.float32) * s3[h]) + b3[h]
        outs.append(o[:, :nc])
    return tuple(outs)


if __name__ == "__main__":
    key = jax.random.PRNGKey(0)
    k_x, k_p = jax.random.split(key)

    # Small shapes: batch=2, channels=4, spatial=16 -> input_features = 1024
    B, C, H, W = 2, 4, 16, 16
    input_features = C * H * W
    num_classes1, num_classes2, num_classes3 = 10, 7, 5
    ncs = (num_classes1, num_classes2, num_classes3)

    x = jax.random.normal(k_x, (B, C, H, W), jnp.float32)
    packed = init_params(k_p, input_features, *ncs)

    outs = fully_connected_network_forward(x, packed, ncs)
    jax.block_until_ready(outs)

    assert outs[0].shape == (B, num_classes1)
    assert outs[1].shape == (B, num_classes2)
    assert outs[2].shape == (B, num_classes3)

    # Sanity check vs an f32 reference with identical (dequantized) weights;
    # remaining difference is only bf16 activation rounding in the MXU dots.
    refs = _reference_forward(x, packed, ncs)
    for o, r in zip(outs, refs):
        np.testing.assert_allclose(np.asarray(o), np.asarray(r), atol=3e-2)

    print("KERNEL_OK")
</pallas_src>

<mosaic_0001>
module attributes {stable_mosaic.version = 11 : i64} {
  func.func @_fcn_kernel(%arg0: i32, %arg1: memref<2x1024xbf16, #tpu.memory_space<vmem>>, %arg2: memref<3x1024x512xi8, #tpu.memory_space<vmem>>, %arg3: memref<3x1x512xf32, #tpu.memory_space<vmem>>, %arg4: memref<3x1x512xf32, #tpu.memory_space<vmem>>, %arg5: memref<3x512x256xi8, #tpu.memory_space<vmem>>, %arg6: memref<3x1x256xf32, #tpu.memory_space<vmem>>, %arg7: memref<3x1x256xf32, #tpu.memory_space<vmem>>, %arg8: memref<3x256x128xi8, #tpu.memory_space<vmem>>, %arg9: memref<3x1x128xf32, #tpu.memory_space<vmem>>, %arg10: memref<3x1x128xf32, #tpu.memory_space<vmem>>, %arg11: memref<3x2x128xf32, #tpu.memory_space<vmem>>) attributes {dimension_semantics = [#tpu.dimension_semantics<arbitrary>], iteration_bounds = array<i64: 1>, scalar_prefetch = 0 : i64, scratch_operands = 0 : i64, tpu.core_type = #tpu.core_type<tc>, window_params = [{pipeline_mode = #tpu.pipeline_mode<synchronous>, transform_indices = @transform_0, window_bounds = array<i64: 2, 1024>}, {pipeline_mode = #tpu.pipeline_mode<synchronous>, transform_indices = @transform_1, window_bounds = array<i64: 3, 1024, 512>}, {pipeline_mode = #tpu.pipeline_mode<synchronous>, transform_indices = @transform_2, window_bounds = array<i64: 3, 1, 512>}, {pipeline_mode = #tpu.pipeline_mode<synchronous>, transform_indices = @transform_3, window_bounds = array<i64: 3, 1, 512>}, {pipeline_mode = #tpu.pipeline_mode<synchronous>, transform_indices = @transform_4, window_bounds = array<i64: 3, 512, 256>}, {pipeline_mode = #tpu.pipeline_mode<synchronous>, transform_indices = @transform_5, window_bounds = array<i64: 3, 1, 256>}, {pipeline_mode = #tpu.pipeline_mode<synchronous>, transform_indices = @transform_6, window_bounds = array<i64: 3, 1, 256>}, {pipeline_mode = #tpu.pipeline_mode<synchronous>, transform_indices = @transform_7, window_bounds = array<i64: 3, 256, 128>}, {pipeline_mode = #tpu.pipeline_mode<synchronous>, transform_indices = @transform_8, window_bounds = array<i64: 3, 1, 128>}, {pipeline_mode = #tpu.pipeline_mode<synchronous>, transform_indices = @transform_9, window_bounds = array<i64: 3, 1, 128>}, {pipeline_mode = #tpu.pipeline_mode<synchronous>, transform_indices = @transform_10, window_bounds = array<i64: 3, 2, 128>}]} {
    %c0 = arith.constant 0 : index
    %c0_0 = arith.constant 0 : index
    %0 = vector.load %arg1[%c0, %c0_0] : memref<2x1024xbf16, #tpu.memory_space<vmem>>, vector<2x1024xbf16>
    %c0_1 = arith.constant 0 : index
    %c0_2 = arith.constant 0 : index
    %c0_3 = arith.constant 0 : index
    %1 = vector.load %arg2[%c0_1, %c0_2, %c0_3] : memref<3x1024x512xi8, #tpu.memory_space<vmem>>, vector<1x1024x512xi8>
    %2 = vector.shape_cast %1 : vector<1x1024x512xi8> to vector<1024x512xi8>
    %3 = arith.sitofp %2 : vector<1024x512xi8> to vector<1024x512xf32>
    %4 = arith.truncf %3 : vector<1024x512xf32> to vector<1024x512xbf16>
    %cst = arith.constant dense<0.000000e+00> : vector<2x512xf32>
    %5 = tpu.matmul %0, %4, %cst {dimension_numbers = #tpu.dot_dimension_numbers<[1], [0], [0], [1], [0, 0, 1, 1], [], []>} : vector<2x1024xbf16>, vector<1024x512xbf16>, vector<2x512xf32> -> vector<2x512xf32>
    %c0_4 = arith.constant 0 : index
    %c0_5 = arith.constant 0 : index
    %c0_6 = arith.constant 0 : index
    %6 = vector.load %arg3[%c0_4, %c0_5, %c0_6] : memref<3x1x512xf32, #tpu.memory_space<vmem>>, vector<1x1x512xf32>
    %7 = vector.shape_cast %6 : vector<1x1x512xf32> to vector<1x512xf32>
    %8 = vector.broadcast %7 : vector<1x512xf32> to vector<2x512xf32>
    %9 = arith.mulf %5, %8 : vector<2x512xf32>
    %c0_7 = arith.constant 0 : index
    %c0_8 = arith.constant 0 : index
    %c0_9 = arith.constant 0 : index
    %10 = vector.load %arg4[%c0_7, %c0_8, %c0_9] : memref<3x1x512xf32, #tpu.memory_space<vmem>>, vector<1x1x512xf32>
    %11 = vector.shape_cast %10 : vector<1x1x512xf32> to vector<1x512xf32>
    %12 = vector.broadcast %11 : vector<1x512xf32> to vector<2x512xf32>
    %13 = arith.addf %9, %12 : vector<2x512xf32>
    %cst_10 = arith.constant 0.000000e+00 : f32
    %14 = vector.broadcast %cst_10 : f32 to vector<2x512xf32>
    %15 = arith.maximumf %13, %14 : vector<2x512xf32>
    %c0_11 = arith.constant 0 : index
    %c0_12 = arith.constant 0 : index
    %c0_13 = arith.constant 0 : index
    %16 = vector.load %arg5[%c0_11, %c0_12, %c0_13] : memref<3x512x256xi8, #tpu.memory_space<vmem>>, vector<1x512x256xi8>
    %17 = vector.shape_cast %16 : vector<1x512x256xi8> to vector<512x256xi8>
    %18 = arith.sitofp %17 : vector<512x256xi8> to vector<512x256xf32>
    %19 = arith.truncf %18 : vector<512x256xf32> to vector<512x256xbf16>
    %20 = arith.truncf %15 : vector<2x512xf32> to vector<2x512xbf16>
    %cst_14 = arith.constant dense<0.000000e+00> : vector<2x256xf32>
    %21 = tpu.matmul %20, %19, %cst_14 {dimension_numbers = #tpu.dot_dimension_numbers<[1], [0], [0], [1], [0, 0, 1, 1], [], []>} : vector<2x512xbf16>, vector<512x256xbf16>, vector<2x256xf32> -> vector<2x256xf32>
    %c0_15 = arith.constant 0 : index
    %c0_16 = arith.constant 0 : index
    %c0_17 = arith.constant 0 : index
    %22 = vector.load %arg6[%c0_15, %c0_16, %c0_17] : memref<3x1x256xf32, #tpu.memory_space<vmem>>, vector<1x1x256xf32>
    %23 = vector.shape_cast %22 : vector<1x1x256xf32> to vector<1x256xf32>
    %24 = vector.broadcast %23 : vector<1x256xf32> to vector<2x256xf32>
    %25 = arith.mulf %21, %24 : vector<2x256xf32>
    %c0_18 = arith.constant 0 : index
    %c0_19 = arith.constant 0 : index
    %c0_20 = arith.constant 0 : index
    %26 = vector.load %arg7[%c0_18, %c0_19, %c0_20] : memref<3x1x256xf32, #tpu.memory_space<vmem>>, vector<1x1x256xf32>
    %27 = vector.shape_cast %26 : vector<1x1x256xf32> to vector<1x256xf32>
    %28 = vector.broadcast %27 : vector<1x256xf32> to vector<2x256xf32>
    %29 = arith.addf %25, %28 : vector<2x256xf32>
    %cst_21 = arith.constant 0.000000e+00 : f32
    %30 = vector.broadcast %cst_21 : f32 to vector<2x256xf32>
    %31 = arith.maximumf %29, %30 : vector<2x256xf32>
    %c0_22 = arith.constant 0 : index
    %c0_23 = arith.constant 0 : index
    %c0_24 = arith.constant 0 : index
    %32 = vector.load %arg8[%c0_22, %c0_23, %c0_24] : memref<3x256x128xi8, #tpu.memory_space<vmem>>, vector<1x256x128xi8>
    %33 = vector.shape_cast %32 : vector<1x256x128xi8> to vector<256x128xi8>
    %34 = arith.sitofp %33 : vector<256x128xi8> to vector<256x128xf32>
    %35 = arith.truncf %34 : vector<256x128xf32> to vector<256x128xbf16>
    %36 = arith.truncf %31 : vector<2x256xf32> to vector<2x256xbf16>
    %cst_25 = arith.constant dense<0.000000e+00> : vector<2x128xf32>
    %37 = tpu.matmul %36, %35, %cst_25 {dimension_numbers = #tpu.dot_dimension_numbers<[1], [0], [0], [1], [0, 0, 1, 1], [], []>} : vector<2x256xbf16>, vector<256x128xbf16>, vector<2x128xf32> -> vector<2x128xf32>
    %c0_26 = arith.constant 0 : index
    %c0_27 = arith.constant 0 : index
    %c0_28 = arith.constant 0 : index
    %38 = vector.load %arg9[%c0_26, %c0_27, %c0_28] : memref<3x1x128xf32, #tpu.memory_space<vmem>>, vector<1x1x128xf32>
    %39 = vector.shape_cast %38 : vector<1x1x128xf32> to vector<1x128xf32>
    %40 = vector.broadcast %39 : vector<1x128xf32> to vector<2x128xf32>
    %41 = arith.mulf %37, %40 : vector<2x128xf32>
    %c0_29 = arith.constant 0 : index
    %c0_30 = arith.constant 0 : index
    %c0_31 = arith.constant 0 : index
    %42 = vector.load %arg10[%c0_29, %c0_30, %c0_31] : memref<3x1x128xf32, #tpu.memory_space<vmem>>, vector<1x1x128xf32>
    %43 = vector.shape_cast %42 : vector<1x1x128xf32> to vector<1x128xf32>
    %44 = vector.broadcast %43 : vector<1x128xf32> to vector<2x128xf32>
    %45 = arith.addf %41, %44 : vector<2x128xf32>
    %c0_32 = arith.constant 0 : index
    %c0_33 = arith.constant 0 : index
    %c0_34 = arith.constant 0 : index
    %46 = vector.load %arg11[%c0_32, %c0_33, %c0_34] : memref<3x2x128xf32, #tpu.memory_space<vmem>>, vector<1x2x128xf32>
    %47 = vector.shape_cast %46 : vector<1x2x128xf32> to vector<2x128xf32>
    %48 = vector.shape_cast %45 : vector<2x128xf32> to vector<1x2x128xf32>
    tpu.vector_store %arg11[%c0_32, %c0_33, %c0_34], %48 {strides = array<i32>} : memref<3x2x128xf32, #tpu.memory_space<vmem>>, vector<1x2x128xf32>,
    %c1 = arith.constant 1 : index
    %c0_35 = arith.constant 0 : index
    %c0_36 = arith.constant 0 : index
    %49 = vector.load %arg2[%c1, %c0_35, %c0_36] : memref<3x1024x512xi8, #tpu.memory_space<vmem>>, vector<1x1024x512xi8>
    %50 = vector.shape_cast %49 : vector<1x1024x512xi8> to vector<1024x512xi8>
    %51 = arith.sitofp %50 : vector<1024x512xi8> to vector<1024x512xf32>
    %52 = arith.truncf %51 : vector<1024x512xf32> to vector<1024x512xbf16>
    %cst_37 = arith.constant dense<0.000000e+00> : vector<2x512xf32>
    %53 = tpu.matmul %0, %52, %cst_37 {dimension_numbers = #tpu.dot_dimension_numbers<[1], [0], [0], [1], [0, 0, 1, 1], [], []>} : vector<2x1024xbf16>, vector<1024x512xbf16>, vector<2x512xf32> -> vector<2x512xf32>
    %c1_38 = arith.constant 1 : index
    %c0_39 = arith.constant 0 : index
    %c0_40 = arith.constant 0 : index
    %54 = vector.load %arg3[%c1_38, %c0_39, %c0_40] : memref<3x1x512xf32, #tpu.memory_space<vmem>>, vector<1x1x512xf32>
    %55 = vector.shape_cast %54 : vector<1x1x512xf32> to vector<1x512xf32>
    %56 = vector.broadcast %55 : vector<1x512xf32> to vector<2x512xf32>
    %57 = arith.mulf %53, %56 : vector<2x512xf32>
    %c1_41 = arith.constant 1 : index
    %c0_42 = arith.constant 0 : index
    %c0_43 = arith.constant 0 : index
    %58 = vector.load %arg4[%c1_41, %c0_42, %c0_43] : memref<3x1x512xf32, #tpu.memory_space<vmem>>, vector<1x1x512xf32>
    %59 = vector.shape_cast %58 : vector<1x1x512xf32> to vector<1x512xf32>
    %60 = vector.broadcast %59 : vector<1x512xf32> to vector<2x512xf32>
    %61 = arith.addf %57, %60 : vector<2x512xf32>
    %cst_44 = arith.constant 0.000000e+00 : f32
    %62 = vector.broadcast %cst_44 : f32 to vector<2x512xf32>
    %63 = arith.maximumf %61, %62 : vector<2x512xf32>
    %c1_45 = arith.constant 1 : index
    %c0_46 = arith.constant 0 : index
    %c0_47 = arith.constant 0 : index
    %64 = vector.load %arg5[%c1_45, %c0_46, %c0_47] : memref<3x512x256xi8, #tpu.memory_space<vmem>>, vector<1x512x256xi8>
    %65 = vector.shape_cast %64 : vector<1x512x256xi8> to vector<512x256xi8>
    %66 = arith.sitofp %65 : vector<512x256xi8> to vector<512x256xf32>
    %67 = arith.truncf %66 : vector<512x256xf32> to vector<512x256xbf16>
    %68 = arith.truncf %63 : vector<2x512xf32> to vector<2x512xbf16>
    %cst_48 = arith.constant dense<0.000000e+00> : vector<2x256xf32>
    %69 = tpu.matmul %68, %67, %cst_48 {dimension_numbers = #tpu.dot_dimension_numbers<[1], [0], [0], [1], [0, 0, 1, 1], [], []>} : vector<2x512xbf16>, vector<512x256xbf16>, vector<2x256xf32> -> vector<2x256xf32>
    %c1_49 = arith.constant 1 : index
    %c0_50 = arith.constant 0 : index
    %c0_51 = arith.constant 0 : index
    %70 = vector.load %arg6[%c1_49, %c0_50, %c0_51] : memref<3x1x256xf32, #tpu.memory_space<vmem>>, vector<1x1x256xf32>
    %71 = vector.shape_cast %70 : vector<1x1x256xf32> to vector<1x256xf32>
    %72 = vector.broadcast %71 : vector<1x256xf32> to vector<2x256xf32>
    %73 = arith.mulf %69, %72 : vector<2x256xf32>
    %c1_52 = arith.constant 1 : index
    %c0_53 = arith.constant 0 : index
    %c0_54 = arith.constant 0 : index
    %74 = vector.load %arg7[%c1_52, %c0_53, %c0_54] : memref<3x1x256xf32, #tpu.memory_space<vmem>>, vector<1x1x256xf32>
    %75 = vector.shape_cast %74 : vector<1x1x256xf32> to vector<1x256xf32>
    %76 = vector.broadcast %75 : vector<1x256xf32> to vector<2x256xf32>
    %77 = arith.addf %73, %76 : vector<2x256xf32>
    %cst_55 = arith.constant 0.000000e+00 : f32
    %78 = vector.broadcast %cst_55 : f32 to vector<2x256xf32>
    %79 = arith.maximumf %77, %78 : vector<2x256xf32>
    %c1_56 = arith.constant 1 : index
    %c0_57 = arith.constant 0 : index
    %c0_58 = arith.constant 0 : index
    %80 = vector.load %arg8[%c1_56, %c0_57, %c0_58] : memref<3x256x128xi8, #tpu.memory_space<vmem>>, vector<1x256x128xi8>
    %81 = vector.shape_cast %80 : vector<1x256x128xi8> to vector<256x128xi8>
    %82 = arith.sitofp %81 : vector<256x128xi8> to vector<256x128xf32>
    %83 = arith.truncf %82 : vector<256x128xf32> to vector<256x128xbf16>
    %84 = arith.truncf %79 : vector<2x256xf32> to vector<2x256xbf16>
    %cst_59 = arith.constant dense<0.000000e+00> : vector<2x128xf32>
    %85 = tpu.matmul %84, %83, %cst_59 {dimension_numbers = #tpu.dot_dimension_numbers<[1], [0], [0], [1], [0, 0, 1, 1], [], []>} : vector<2x256xbf16>, vector<256x128xbf16>, vector<2x128xf32> -> vector<2x128xf32>
    %c1_60 = arith.constant 1 : index
    %c0_61 = arith.constant 0 : index
    %c0_62 = arith.constant 0 : index
    %86 = vector.load %arg9[%c1_60, %c0_61, %c0_62] : memref<3x1x128xf32, #tpu.memory_space<vmem>>, vector<1x1x128xf32>
    %87 = vector.shape_cast %86 : vector<1x1x128xf32> to vector<1x128xf32>
    %88 = vector.broadcast %87 : vector<1x128xf32> to vector<2x128xf32>
    %89 = arith.mulf %85, %88 : vector<2x128xf32>
    %c1_63 = arith.constant 1 : index
    %c0_64 = arith.constant 0 : index
    %c0_65 = arith.constant 0 : index
    %90 = vector.load %arg10[%c1_63, %c0_64, %c0_65] : memref<3x1x128xf32, #tpu.memory_space<vmem>>, vector<1x1x128xf32>
    %91 = vector.shape_cast %90 : vector<1x1x128xf32> to vector<1x128xf32>
    %92 = vector.broadcast %91 : vector<1x128xf32> to vector<2x128xf32>
    %93 = arith.addf %89, %92 : vector<2x128xf32>
    %c1_66 = arith.constant 1 : index
    %c0_67 = arith.constant 0 : index
    %c0_68 = arith.constant 0 : index
    %94 = vector.load %arg11[%c1_66, %c0_67, %c0_68] : memref<3x2x128xf32, #tpu.memory_space<vmem>>, vector<1x2x128xf32>
    %95 = vector.shape_cast %94 : vector<1x2x128xf32> to vector<2x128xf32>
    %96 = vector.shape_cast %93 : vector<2x128xf32> to vector<1x2x128xf32>
    tpu.vector_store %arg11[%c1_66, %c0_67, %c0_68], %96 {strides = array<i32>} : memref<3x2x128xf32, #tpu.memory_space<vmem>>, vector<1x2x128xf32>,
    %c2 = arith.constant 2 : index
    %c0_69 = arith.constant 0 : index
    %c0_70 = arith.constant 0 : index
    %97 = vector.load %arg2[%c2, %c0_69, %c0_70] : memref<3x1024x512xi8, #tpu.memory_space<vmem>>, vector<1x1024x512xi8>
    %98 = vector.shape_cast %97 : vector<1x1024x512xi8> to vector<1024x512xi8>
    %99 = arith.sitofp %98 : vector<1024x512xi8> to vector<1024x512xf32>
    %100 = arith.truncf %99 : vector<1024x512xf32> to vector<1024x512xbf16>
    %cst_71 = arith.constant dense<0.000000e+00> : vector<2x512xf32>
    %101 = tpu.matmul %0, %100, %cst_71 {dimension_numbers = #tpu.dot_dimension_numbers<[1], [0], [0], [1], [0, 0, 1, 1], [], []>} : vector<2x1024xbf16>, vector<1024x512xbf16>, vector<2x512xf32> -> vector<2x512xf32>
    %c2_72 = arith.constant 2 : index
    %c0_73 = arith.constant 0 : index
    %c0_74 = arith.constant 0 : index
    %102 = vector.load %arg3[%c2_72, %c0_73, %c0_74] : memref<3x1x512xf32, #tpu.memory_space<vmem>>, vector<1x1x512xf32>
    %103 = vector.shape_cast %102 : vector<1x1x512xf32> to vector<1x512xf32>
    %104 = vector.broadcast %103 : vector<1x512xf32> to vector<2x512xf32>
    %105 = arith.mulf %101, %104 : vector<2x512xf32>
    %c2_75 = arith.constant 2 : index
    %c0_76 = arith.constant 0 : index
    %c0_77 = arith.constant 0 : index
    %106 = vector.load %arg4[%c2_75, %c0_76, %c0_77] : memref<3x1x512xf32, #tpu.memory_space<vmem>>, vector<1x1x512xf32>
    %107 = vector.shape_cast %106 : vector<1x1x512xf32> to vector<1x512xf32>
    %108 = vector.broadcast %107 : vector<1x512xf32> to vector<2x512xf32>
    %109 = arith.addf %105, %108 : vector<2x512xf32>
    %cst_78 = arith.constant 0.000000e+00 : f32
    %110 = vector.broadcast %cst_78 : f32 to vector<2x512xf32>
    %111 = arith.maximumf %109, %110 : vector<2x512xf32>
    %c2_79 = arith.constant 2 : index
    %c0_80 = arith.constant 0 : index
    %c0_81 = arith.constant 0 : index
    %112 = vector.load %arg5[%c2_79, %c0_80, %c0_81] : memref<3x512x256xi8, #tpu.memory_space<vmem>>, vector<1x512x256xi8>
    %113 = vector.shape_cast %112 : vector<1x512x256xi8> to vector<512x256xi8>
    %114 = arith.sitofp %113 : vector<512x256xi8> to vector<512x256xf32>
    %115 = arith.truncf %114 : vector<512x256xf32> to vector<512x256xbf16>
    %116 = arith.truncf %111 : vector<2x512xf32> to vector<2x512xbf16>
    %cst_82 = arith.constant dense<0.000000e+00> : vector<2x256xf32>
    %117 = tpu.matmul %116, %115, %cst_82 {dimension_numbers = #tpu.dot_dimension_numbers<[1], [0], [0], [1], [0, 0, 1, 1], [], []>} : vector<2x512xbf16>, vector<512x256xbf16>, vector<2x256xf32> -> vector<2x256xf32>
    %c2_83 = arith.constant 2 : index
    %c0_84 = arith.constant 0 : index
    %c0_85 = arith.constant 0 : index
    %118 = vector.load %arg6[%c2_83, %c0_84, %c0_85] : memref<3x1x256xf32, #tpu.memory_space<vmem>>, vector<1x1x256xf32>
    %119 = vector.shape_cast %118 : vector<1x1x256xf32> to vector<1x256xf32>
    %120 = vector.broadcast %119 : vector<1x256xf32> to vector<2x256xf32>
    %121 = arith.mulf %117, %120 : vector<2x256xf32>
    %c2_86 = arith.constant 2 : index
    %c0_87 = arith.constant 0 : index
    %c0_88 = arith.constant 0 : index
    %122 = vector.load %arg7[%c2_86, %c0_87, %c0_88] : memref<3x1x256xf32, #tpu.memory_space<vmem>>, vector<1x1x256xf32>
    %123 = vector.shape_cast %122 : vector<1x1x256xf32> to vector<1x256xf32>
    %124 = vector.broadcast %123 : vector<1x256xf32> to vector<2x256xf32>
    %125 = arith.addf %121, %124 : vector<2x256xf32>
    %cst_89 = arith.constant 0.000000e+00 : f32
    %126 = vector.broadcast %cst_89 : f32 to vector<2x256xf32>
    %127 = arith.maximumf %125, %126 : vector<2x256xf32>
    %c2_90 = arith.constant 2 : index
    %c0_91 = arith.constant 0 : index
    %c0_92 = arith.constant 0 : index
    %128 = vector.load %arg8[%c2_90, %c0_91, %c0_92] : memref<3x256x128xi8, #tpu.memory_space<vmem>>, vector<1x256x128xi8>
    %129 = vector.shape_cast %128 : vector<1x256x128xi8> to vector<256x128xi8>
    %130 = arith.sitofp %129 : vector<256x128xi8> to vector<256x128xf32>
    %131 = arith.truncf %130 : vector<256x128xf32> to vector<256x128xbf16>
    %132 = arith.truncf %127 : vector<2x256xf32> to vector<2x256xbf16>
    %cst_93 = arith.constant dense<0.000000e+00> : vector<2x128xf32>
    %133 = tpu.matmul %132, %131, %cst_93 {dimension_numbers = #tpu.dot_dimension_numbers<[1], [0], [0], [1], [0, 0, 1, 1], [], []>} : vector<2x256xbf16>, vector<256x128xbf16>, vector<2x128xf32> -> vector<2x128xf32>
    %c2_94 = arith.constant 2 : index
    %c0_95 = arith.constant 0 : index
    %c0_96 = arith.constant 0 : index
    %134 = vector.load %arg9[%c2_94, %c0_95, %c0_96] : memref<3x1x128xf32, #tpu.memory_space<vmem>>, vector<1x1x128xf32>
    %135 = vector.shape_cast %134 : vector<1x1x128xf32> to vector<1x128xf32>
    %136 = vector.broadcast %135 : vector<1x128xf32> to vector<2x128xf32>
    %137 = arith.mulf %133, %136 : vector<2x128xf32>
    %c2_97 = arith.constant 2 : index
    %c0_98 = arith.constant 0 : index
    %c0_99 = arith.constant 0 : index
    %138 = vector.load %arg10[%c2_97, %c0_98, %c0_99] : memref<3x1x128xf32, #tpu.memory_space<vmem>>, vector<1x1x128xf32>
    %139 = vector.shape_cast %138 : vector<1x1x128xf32> to vector<1x128xf32>
    %140 = vector.broadcast %139 : vector<1x128xf32> to vector<2x128xf32>
    %141 = arith.addf %137, %140 : vector<2x128xf32>
    %c2_100 = arith.constant 2 : index
    %c0_101 = arith.constant 0 : index
    %c0_102 = arith.constant 0 : index
    %142 = vector.load %arg11[%c2_100, %c0_101, %c0_102] : memref<3x2x128xf32, #tpu.memory_space<vmem>>, vector<1x2x128xf32>
    %143 = vector.shape_cast %142 : vector<1x2x128xf32> to vector<2x128xf32>
    %144 = vector.shape_cast %141 : vector<2x128xf32> to vector<1x2x128xf32>
    tpu.vector_store %arg11[%c2_100, %c0_101, %c0_102], %144 {strides = array<i32>} : memref<3x2x128xf32, #tpu.memory_space<vmem>>, vector<1x2x128xf32>,
    return
  }
  func.func @transform_0(%arg0: i32) -> (i32, i32) {
    %c0_i32 = arith.constant 0 : i32
    %c0_i32_0 = arith.constant 0 : i32
    %c0_i32_1 = arith.constant 0 : i32
    return %c0_i32, %c0_i32_0 : i32, i32
  }
  func.func @transform_1(%arg0: i32) -> (i32, i32, i32) {
    %c0_i32 = arith.constant 0 : i32
    %c0_i32_0 = arith.constant 0 : i32
    %c0_i32_1 = arith.constant 0 : i32
    %c0_i32_2 = arith.constant 0 : i32
    return %c0_i32, %c0_i32_0, %c0_i32_1 : i32, i32, i32
  }
  func.func @transform_2(%arg0: i32) -> (i32, i32, i32) {
    %c0_i32 = arith.constant 0 : i32
    %c0_i32_0 = arith.constant 0 : i32
    %c0_i32_1 = arith.constant 0 : i32
    %c0_i32_2 = arith.constant 0 : i32
    return %c0_i32, %c0_i32_0, %c0_i32_1 : i32, i32, i32
  }
  func.func @transform_3(%arg0: i32) -> (i32, i32, i32) {
    %c0_i32 = arith.constant 0 : i32
    %c0_i32_0 = arith.constant 0 : i32
    %c0_i32_1 = arith.constant 0 : i32
    %c0_i32_2 = arith.constant 0 : i32
    return %c0_i32, %c0_i32_0, %c0_i32_1 : i32, i32, i32
  }
  func.func @transform_4(%arg0: i32) -> (i32, i32, i32) {
    %c0_i32 = arith.constant 0 : i32
    %c0_i32_0 = arith.constant 0 : i32
    %c0_i32_1 = arith.constant 0 : i32
    %c0_i32_2 = arith.constant 0 : i32
    return %c0_i32, %c0_i32_0, %c0_i32_1 : i32, i32, i32
  }
  func.func @transform_5(%arg0: i32) -> (i32, i32, i32) {
    %c0_i32 = arith.constant 0 : i32
    %c0_i32_0 = arith.constant 0 : i32
    %c0_i32_1 = arith.constant 0 : i32
    %c0_i32_2 = arith.constant 0 : i32
    return %c0_i32, %c0_i32_0, %c0_i32_1 : i32, i32, i32
  }
  func.func @transform_6(%arg0: i32) -> (i32, i32, i32) {
    %c0_i32 = arith.constant 0 : i32
    %c0_i32_0 = arith.constant 0 : i32
    %c0_i32_1 = arith.constant 0 : i32
    %c0_i32_2 = arith.constant 0 : i32
    return %c0_i32, %c0_i32_0, %c0_i32_1 : i32, i32, i32
  }
  func.func @transform_7(%arg0: i32) -> (i32, i32, i32) {
    %c0_i32 = arith.constant 0 : i32
    %c0_i32_0 = arith.constant 0 : i32
    %c0_i32_1 = arith.constant 0 : i32
    %c0_i32_2 = arith.constant 0 : i32
    return %c0_i32, %c0_i32_0, %c0_i32_1 : i32, i32, i32
  }
  func.func @transform_8(%arg0: i32) -> (i32, i32, i32) {
    %c0_i32 = arith.constant 0 : i32
    %c0_i32_0 = arith.constant 0 : i32
    %c0_i32_1 = arith.constant 0 : i32
    %c0_i32_2 = arith.constant 0 : i32
    return %c0_i32, %c0_i32_0, %c0_i32_1 : i32, i32, i32
  }
  func.func @transform_9(%arg0: i32) -> (i32, i32, i32) {
    %c0_i32 = arith.constant 0 : i32
    %c0_i32_0 = arith.constant 0 : i32
    %c0_i32_1 = arith.constant 0 : i32
    %c0_i32_2 = arith.constant 0 : i32
    return %c0_i32, %c0_i32_0, %c0_i32_1 : i32, i32, i32
  }
  func.func @transform_10(%arg0: i32) -> (i32, i32, i32) {
    %c0_i32 = arith.constant 0 : i32
    %c0_i32_0 = arith.constant 0 : i32
    %c0_i32_1 = arith.constant 0 : i32
    %c0_i32_2 = arith.constant 0 : i32
    return %c0_i32, %c0_i32_0, %c0_i32_1 : i32, i32, i32
  }
}

</mosaic_0001>

<bundles_post_ra>
// kernel: tpu_custom_call.1
= control target key start
LH: loop header
LB: loop body
LE: loop exit
PB: predicated region body
PF: predicated region fallthrough
CT: control target
= control target key end

     0   :  { %15 = vsyncpa [#allocation3], 0  ;;  %s4364_s0 = inlined_call_operand.hbm [shape: bf16[2,1024], index: 0, kind: input, shape index: {}]   ;;  %s4365_s1 = inlined_call_operand.hbm [shape: s8[3,1024,512], index: 1, kind: input, shape index: {}]   ;;  %s4366_s2 = inlined_call_operand.hbm [shape: f32[3,1,512], index: 2, kind: input, shape index: {}]   ;;  %s4367_s3 = inlined_call_operand.hbm [shape: f32[3,1,512], index: 3, kind: input, shape index: {}]   ;;  %s4368_s4 = inlined_call_operand.hbm [shape: s8[3,512,256], index: 4, kind: input, shape index: {}]   ;;  %s4369_s5 = inlined_call_operand.hbm [shape: f32[3,1,256], index: 5, kind: input, shape index: {}]   ;;  %s4370_s6 = inlined_call_operand.hbm [shape: f32[3,1,256], index: 6, kind: input, shape index: {}]   ;;  %s4371_s7 = inlined_call_operand.hbm [shape: s8[3,256,128], index: 7, kind: input, shape index: {}]   ;;  %s4372_s8 = inlined_call_operand.hbm [shape: f32[3,1,128], index: 8, kind: input, shape index: {}]   ;;  %s4373_s9 = inlined_call_operand.hbm [shape: f32[3,1,128], index: 9, kind: input, shape index: {}]   ;;  %s4374_s10 = inlined_call_operand.hbm [shape: f32[3,2,128], index: 10, kind: output, shape index: {}]  }
   0x1   :  { %16 = vsyncpa [#allocation6], 0 }
   0x2   :  { %17 = vsyncpa [#allocation9], 0 }
   0x3   :  { %18 = vsyncpa [#allocation12], 0 }
   0x4   :  { %19 = vsyncpa [#allocation15], 0 }
   0x5   :  { %20 = vsyncpa [#allocation18], 0 }
   0x6   :  { %21 = vsyncpa [#allocation4], 0  ;;  %s3894_s13 = smov [#allocation5]   ;;  %s3638_s17 = scalar_lea.hbm %s4365_s1, 49152 }
   0x7   :  { %s37_s14 = sshll.u32 %s3894_s13, 4  ;;  %p3639_p0 = scmp.ne.s32.totalorder %s4365_s1, %s3638_s17  ;;  %s38_s14 = int_to_ptr.vmem [resolvable:$true] %s37_s14 }
   0x8   :  { %p3642_p1 = scmp.lt.u32.totalorder %s3638_s17, %s4365_s1 }
   0xa   :  { %p3644_p2 = pnand %p3642_p1, %p3639_p0 }
   0xc   :  { %3647 = shalt.err (!%p3644_p2)
}
   0xd   :  { %s3648_s22 = scalar_lea.vmem %s38_s14, 49152  ;;  %p3653_p4 = scmp.lt.s32.totalorder %s38_s14, %s38_s14 }
   0xe   :  { %p3649_p3 = scmp.ne.s32.totalorder %s38_s14, %s3648_s22  ;;  %p3654_p5 = scmp.lt.s32.totalorder %s3648_s22, %s3648_s22 }
  0x10   :  { %p3655_p6 = por %p3654_p5, %p3653_p4 }
  0x12   :  { %p3656_p7 = pnand %p3655_p6, %p3649_p3 }
  0x14   :  { %3659 = shalt.err (!%p3656_p7)
}
  0x15   :  { %s3895_s23 = smov 512   ;;  %s3896_s24 = smov 32  }
  0x16   :  { %43 = dma.hbm_to_vmem [thread:$0]  %s4365_s1, 49152, %s38_s14, [#allocation6], %s3895_s23, %s3895_s23, %s3896_s24  }
  0x17   :  { %s3897_s27 = smov [#allocation8]   ;;  %s3898_s29 = smov [#allocation11]  }
  0x18   :  { %s61_s28 = sshll.u32 %s3897_s27, 4  ;;  %s85_s30 = sshll.u32 %s3898_s29, 4  ;;  %s62_s28 = int_to_ptr.vmem [resolvable:$true] %s61_s28  ;;  %s86_s30 = int_to_ptr.vmem [resolvable:$true] %s85_s30 }
  0x19   :  { %s3660_s13 = scalar_lea.hbm %s4367_s3, 192 }
  0x1a   :  { %p3661_p8 = scmp.ne.s32.totalorder %s4367_s3, %s3660_s13  ;;  %p3664_p9 = scmp.lt.u32.totalorder %s3660_s13, %s4367_s3 }
  0x1c   :  { %p3666_p10 = pnand %p3664_p9, %p3661_p8 }
  0x1e   :  { %3669 = shalt.err (!%p3666_p10)
}
  0x1f   :  { %s3670_s1 = scalar_lea.vmem %s62_s28, 192  ;;  %p3675_p12 = scmp.lt.s32.totalorder %s62_s28, %s62_s28 }
  0x20   :  { %p3671_p11 = scmp.ne.s32.totalorder %s62_s28, %s3670_s1  ;;  %p3676_p13 = scmp.lt.s32.totalorder %s3670_s1, %s3670_s1 }
  0x22   :  { %p3677_p0 = por %p3676_p13, %p3675_p12 }
  0x24   :  { %p3678_p1 = pnand %p3677_p0, %p3671_p11 }
  0x26   :  { %3681 = shalt.err (!%p3678_p1)
}
  0x27   :  { %s3899_s14 = smov 64   ;;  %s3900_s19 = smov 4  }
  0x28   :  { %67 = dma.hbm_to_vmem [thread:$0]  %s4367_s3, 192, %s62_s28, [#allocation9], %s3899_s14, %s3899_s14, %s3900_s19  }
  0x29   :  { %s3682_s25 = scalar_lea.hbm %s4369_s5, 96 }
  0x2a   :  { %p3683_p2 = scmp.ne.s32.totalorder %s4369_s5, %s3682_s25  ;;  %p3686_p3 = scmp.lt.u32.totalorder %s3682_s25, %s4369_s5 }
  0x2c   :  { %p3688_p4 = pnand %p3686_p3, %p3683_p2 }
  0x2e   :  { %3691 = shalt.err (!%p3688_p4)
}
  0x2f   :  { %s3692_s12 = scalar_lea.vmem %s86_s30, 96  ;;  %p3697_p6 = scmp.lt.s32.totalorder %s86_s30, %s86_s30 }
  0x30   :  { %p3693_p5 = scmp.ne.s32.totalorder %s86_s30, %s3692_s12  ;;  %p3698_p7 = scmp.lt.s32.totalorder %s3692_s12, %s3692_s12 }
  0x32   :  { %p3699_p8 = por %p3698_p7, %p3697_p6 }
  0x34   :  { %p3700_p9 = pnand %p3699_p8, %p3693_p5 }
  0x36   :  { %3703 = shalt.err (!%p3700_p9)
}
  0x37   :  { %s3901_s3 = smov 2   ;;  %s3902_s15 = smov [#allocation14]  }
  0x38   :  { %91 = dma.hbm_to_vmem [thread:$0]  %s4369_s5, 96, %s86_s30, [#allocation12], %s3896_s24, %s3896_s24, %s3901_s3  }
  0x39   :  { %s109_s16 = sshll.u32 %s3902_s15, 4  ;;  %s3704_s1 = scalar_lea.hbm %s4371_s7, 3072  ;;  %s110_s16 = int_to_ptr.vmem [resolvable:$true] %s109_s16 }
  0x3a   :  { %p3705_p10 = scmp.ne.s32.totalorder %s4371_s7, %s3704_s1  ;;  %p3708_p11 = scmp.lt.u32.totalorder %s3704_s1, %s4371_s7 }
  0x3c   :  { %p3710_p12 = pnand %p3708_p11, %p3705_p10 }
  0x3e   :  { %3713 = shalt.err (!%p3710_p12)
}
  0x3f   :  { %s3714_s25 = scalar_lea.vmem %s110_s16, 3072  ;;  %p3719_p0 = scmp.lt.s32.totalorder %s110_s16, %s110_s16 }
  0x40   :  { %p3715_p13 = scmp.ne.s32.totalorder %s110_s16, %s3714_s25  ;;  %p3720_p1 = scmp.lt.s32.totalorder %s3714_s25, %s3714_s25 }
  0x42   :  { %p3721_p2 = por %p3720_p1, %p3719_p0 }
  0x44   :  { %p3722_p3 = pnand %p3721_p2, %p3715_p13 }
  0x46   :  { %3725 = shalt.err (!%p3722_p3)
}
  0x47   :  { %s3903_s5 = smov 128   ;;  %s3904_s30 = smov 8  }
  0x48   :  { %115 = dma.hbm_to_vmem [thread:$0]  %s4371_s7, 3072, %s110_s16, [#allocation15], %s3903_s5, %s3903_s5, %s3904_s30  }
  0x49   :  { %s3905_s29 = smov [#allocation2]   ;;  %s3906_s12 = smov [#allocation7]  }
  0x4a   :  { %s28_s11 = sshll.u32 %s3905_s29, 4  ;;  %s49_s28 = sshll.u32 %s3906_s12, 4  ;;  %s29_s11 = int_to_ptr.vmem [resolvable:$true] %s28_s11  ;;  %s50_s28 = int_to_ptr.vmem [resolvable:$true] %s49_s28 }
  0x4b   :  { %s3726_s17 = scalar_lea.hbm %s4364_s0, 128 }
  0x4c   :  { %p3727_p4 = scmp.ne.s32.totalorder %s4364_s0, %s3726_s17  ;;  %p3730_p5 = scmp.lt.u32.totalorder %s3726_s17, %s4364_s0 }
  0x4e   :  { %p3732_p6 = pnand %p3730_p5, %p3727_p4 }
  0x50   :  { %3735 = shalt.err (!%p3732_p6)
}
  0x51   :  { %s3736_s7 = scalar_lea.vmem %s29_s11, 128  ;;  %p3741_p8 = scmp.lt.s32.totalorder %s29_s11, %s29_s11 }
  0x52   :  { %p3737_p7 = scmp.ne.s32.totalorder %s29_s11, %s3736_s7  ;;  %p3742_p9 = scmp.lt.s32.totalorder %s3736_s7, %s3736_s7 }
  0x54   :  { %p3743_p10 = por %p3742_p9, %p3741_p8 }
  0x56   :  { %p3744_p11 = pnand %p3743_p10, %p3737_p7 }
  0x58   :  { %3747 = shalt.err (!%p3744_p11)
}
  0x59   :  { %31 = dma.hbm_to_vmem [thread:$0]  %s4364_s0, 128, %s29_s11, [#allocation3]  }
  0x5a   :  { %s3748_s5 = scalar_lea.hbm %s4366_s2, 192 }
  0x5b   :  { %p3749_p12 = scmp.ne.s32.totalorder %s4366_s2, %s3748_s5  ;;  %p3752_p13 = scmp.lt.u32.totalorder %s3748_s5, %s4366_s2 }
  0x5d   :  { %p3754_p0 = pnand %p3752_p13, %p3749_p12 }
  0x5f   :  { %3757 = shalt.err (!%p3754_p0)
}
  0x60   :  { %s3758_s12 = scalar_lea.vmem %s50_s28, 192  ;;  %p3763_p2 = scmp.lt.s32.totalorder %s50_s28, %s50_s28 }
  0x61   :  { %p3759_p1 = scmp.ne.s32.totalorder %s50_s28, %s3758_s12  ;;  %p3764_p3 = scmp.lt.s32.totalorder %s3758_s12, %s3758_s12 }
  0x63   :  { %p3765_p4 = por %p3764_p3, %p3763_p2 }
  0x65   :  { %p3766_p5 = pnand %p3765_p4, %p3759_p1 }
  0x67   :  { %3769 = shalt.err (!%p3766_p5)
}
  0x68   :  { %55 = dma.hbm_to_vmem [thread:$0]  %s4366_s2, 192, %s50_s28, [#allocation6], %s3899_s14, %s3899_s14, %s3900_s19  }
  0x69   :  { %s3907_s13 = smov [#allocation10]   ;;  %s3770_s1 = scalar_lea.hbm %s4368_s4, 12288 }
  0x6a   :  { %s73_s15 = sshll.u32 %s3907_s13, 4  ;;  %p3771_p6 = scmp.ne.s32.totalorder %s4368_s4, %s3770_s1  ;;  %s74_s15 = int_to_ptr.vmem [resolvable:$true] %s73_s15 }
  0x6b   :  { %p3774_p7 = scmp.lt.u32.totalorder %s3770_s1, %s4368_s4 }
  0x6d   :  { %p3776_p8 = pnand %p3774_p7, %p3771_p6 }
  0x6f   :  { %3779 = shalt.err (!%p3776_p8)
}
  0x70   :  { %s3780_s22 = scalar_lea.vmem %s74_s15, 12288  ;;  %p3785_p10 = scmp.lt.s32.totalorder %s74_s15, %s74_s15 }
  0x71   :  { %p3781_p9 = scmp.ne.s32.totalorder %s74_s15, %s3780_s22  ;;  %p3786_p11 = scmp.lt.s32.totalorder %s3780_s22, %s3780_s22 }
  0x73   :  { %p3787_p12 = por %p3786_p11, %p3785_p10 }
  0x75   :  { %p3788_p13 = pnand %p3787_p12, %p3781_p9 }
  0x77   :  { %3791 = shalt.err (!%p3788_p13)
}
  0x78   :  { %s3908_s2 = smov 256   ;;  %s3909_s14 = smov 16  }
  0x79   :  { %79 = dma.hbm_to_vmem [thread:$0]  %s4368_s4, 12288, %s74_s15, [#allocation9], %s3908_s2, %s3908_s2, %s3909_s14  }
  0x7a   :  { %s3910_s23 = smov [#allocation13]   ;;  %s3911_s5 = smov [#allocation16]  }
  0x7b   :  { %s97_s25 = sshll.u32 %s3910_s23, 4  ;;  %s121_s30 = sshll.u32 %s3911_s5, 4  ;;  %s98_s25 = int_to_ptr.vmem [resolvable:$true] %s97_s25  ;;  %s4066_s30 = int_to_ptr.vmem [resolvable:$true] %s121_s30 }
  0x7c   :  { %s3792_s29 = scalar_lea.hbm %s4370_s6, 96 }
  0x7d   :  { %p3793_p0 = scmp.ne.s32.totalorder %s4370_s6, %s3792_s29  ;;  %p3796_p1 = scmp.lt.u32.totalorder %s3792_s29, %s4370_s6 }
  0x7f   :  { %p3798_p2 = pnand %p3796_p1, %p3793_p0 }
  0x81   :  { %3801 = shalt.err (!%p3798_p2)
}
  0x82   :  { %s3802_s4 = scalar_lea.vmem %s98_s25, 96  ;;  %p3807_p4 = scmp.lt.s32.totalorder %s98_s25, %s98_s25 }
  0x83   :  { %p3803_p3 = scmp.ne.s32.totalorder %s98_s25, %s3802_s4  ;;  %p3808_p5 = scmp.lt.s32.totalorder %s3802_s4, %s3802_s4 }
  0x85   :  { %p3809_p6 = por %p3808_p5, %p3807_p4 }
  0x87   :  { %p3810_p7 = pnand %p3809_p6, %p3803_p3 }
  0x89   :  { %3813 = shalt.err (!%p3810_p7)
}
  0x8a   :  { %103 = dma.hbm_to_vmem [thread:$0]  %s4370_s6, 96, %s98_s25, [#allocation12], %s3896_s24, %s3896_s24, %s3901_s3  }
  0x8b   :  { %s3814_s20 = scalar_lea.hbm %s4372_s8, 48 }
  0x8c   :  { %p3815_p8 = scmp.ne.s32.totalorder %s4372_s8, %s3814_s20  ;;  %p3818_p9 = scmp.lt.u32.totalorder %s3814_s20, %s4372_s8 }
  0x8e   :  { %p3820_p10 = pnand %p3818_p9, %p3815_p8 }
  0x90   :  { %3823 = shalt.err (!%p3820_p10)
}
  0x91   :  { %s3824_s2 = scalar_lea.vmem %s4066_s30, 48  ;;  %s3828_s6 = scalar_lea.vmem %s4066_s30, 64 }
  0x92   :  { %p3825_p11 = scmp.ne.s32.totalorder %s4066_s30, %s3824_s2  ;;  %p3829_p12 = scmp.lt.s32.totalorder %s4066_s30, %s4066_s30 }
  0x93   :  { %p3830_p13 = scmp.lt.s32.totalorder %s3828_s6, %s3824_s2 }
  0x95   :  { %p3831_p0 = por %p3830_p13, %p3829_p12 }
  0x97   :  { %p3832_p1 = pnand %p3831_p0, %p3825_p11 }
  0x99   :  { %3835 = shalt.err (!%p3832_p1)
}
  0x9a   :  { %s3912_s19 = smov 1   ;;  %s3913_s25 = smov [#allocation17]  }
  0x9b   :  { %127 = dma.hbm_to_vmem [thread:$0]  %s4372_s8, 48, %s4066_s30, [#allocation15], %s3909_s14, %s3909_s14, %s3912_s19  }
  0x9c   :  { %s133_s5 = sshll.u32 %s3913_s25, 4  ;;  %s3836_s29 = scalar_lea.hbm %s4373_s9, 48  ;;  %s134_s5 = int_to_ptr.vmem [resolvable:$true] %s133_s5 }
  0x9d   :  { %p3837_p2 = scmp.ne.s32.totalorder %s4373_s9, %s3836_s29  ;;  %p3840_p3 = scmp.lt.u32.totalorder %s3836_s29, %s4373_s9 }
  0x9f   :  { %p3842_p4 = pnand %p3840_p3, %p3837_p2 }
  0xa1   :  { %3845 = shalt.err (!%p3842_p4)
}
  0xa2   :  { %s3846_s4 = scalar_lea.vmem %s134_s5, 48  ;;  %s3850_s8 = scalar_lea.vmem %s134_s5, 64 }
  0xa3   :  { %p3847_p5 = scmp.ne.s32.totalorder %s134_s5, %s3846_s4  ;;  %p3851_p6 = scmp.lt.s32.totalorder %s134_s5, %s134_s5 }
  0xa4   :  { %p3852_p7 = scmp.lt.s32.totalorder %s3850_s8, %s3846_s4 }
  0xa6   :  { %p3853_p8 = por %p3852_p7, %p3851_p6 }
  0xa8   :  { %p3854_p9 = pnand %p3853_p8, %p3847_p5 }
  0xaa   :  { %3857 = shalt.err (!%p3854_p9)
}
  0xab   :  { %139 = dma.hbm_to_vmem [thread:$0]  %s4373_s9, 48, %s134_s5, [#allocation18], %s3909_s14, %s3909_s14, %s3912_s19  }
  0xac   :  { %3880 = dma.done.wait [#allocation3], 128  }
  0xad   :  { %3881 = vsyncadd [#allocation3], 4294967168 }
  0xae   :  { %3882 = dma.done.wait [#allocation6], 49344  }
  0xaf   :  { %3883 = vsyncadd [#allocation6], 4294917952 }
  0xb0   :  { %3884 = dma.done.wait [#allocation9], 12480  }
  0xb1   :  { %3885 = vsyncadd [#allocation9], 4294954816 }
  0xb2   :  { %3886 = dma.done.wait [#allocation12], 192  }
  0xb3   :  { %3887 = vsyncadd [#allocation12], 4294967104 }
  0xb4   :  { %3888 = dma.done.wait [#allocation15], 3120  }
  0xb5   :  { %3889 = vsyncadd [#allocation15], 4294964176 }
  0xb6   :  { %3890 = dma.done.wait [#allocation18], 48  }
  0xb7   :  { %3891 = vsyncadd [#allocation18], 4294967248  ;;  %v173_v0 = vld [vmem:[#allocation5 + $0x8] sm:$0xff]  ;;  %v172_v2 = vld [vmem:[#allocation5] sm:$0xff]  ;;  %v3914_v18 = vmov 1966171168   ;;  %v561_v20 = vlaneseq }
  0xb8   :  { %v205_v1 = vld [vmem:[#allocation5 + $0x108] sm:$0xff]  ;;  %v301_v3 = vunpack.c.l.s8.bf16 %v173_v0  ;;  %v305_v4 = vunpack.c.h.s8.bf16 %v173_v0  ;;  %v204_v7 = vld [vmem:[#allocation5 + $0x100] sm:$0xff]  ;;  %v300_v8 = vunpack.c.l.s8.bf16 %v172_v2  ;;  %v304_v12 = vunpack.c.h.s8.bf16 %v172_v2  ;;  %v4122_v36 = vld [vmem:[#allocation2] sm:$0xff]  ;;  %s3915_s9 = smov [#allocation19]  }
  0xb9   :  { %v365_v5 = vunpack.c.l.s8.bf16 %v205_v1  ;;  %v369_v6 = vunpack.c.h.s8.bf16 %v205_v1  ;;  %v364_v9 = vunpack.c.l.s8.bf16 %v204_v7  ;;  %v177_v10 = vld [vmem:[#allocation5 + $0x28] sm:$0xff]  ;;  %v368_v13 = vunpack.c.h.s8.bf16 %v204_v7  ;;  %v176_v16 = vld [vmem:[#allocation5 + $0x20] sm:$0xff]  ;;  %s3444_s14 = sshll.u32 %s3915_s9, 4  ;;  %s3445_s14 = int_to_ptr.vmem [resolvable:$true] %s3444_s14 }
  0xba   :  { %v209_v11 = vld [vmem:[#allocation5 + $0x128] sm:$0xff]  ;;  %614 = vmatprep.subr.bf16.mxu1 %v301_v3  ;;  %v309_v14 = vunpack.c.l.s8.bf16 %v177_v10  ;;  %v208_v17 = vld [vmem:[#allocation5 + $0x120] sm:$0xff]  ;;  %v559_v19 = vunpack.c.l.s4 %v3914_v18  ;;  %v308_v21 = vunpack.c.l.s8.bf16 %v176_v16  ;;  %v313_v23 = vunpack.c.h.s8.bf16 %v177_v10  ;;  %s3858_s17 = scalar_lea.vmem %s3445_s14, 96  ;;  %p3863_p11 = scmp.lt.s32.totalorder %s3445_s14, %s3445_s14 }
  0xbb   :  { %655 = vmatprep.subr.bf16.mxu0 %v365_v5  ;;  %615 = vmatpush1.bf16.msra.mxu1 %v300_v8  ;;  %v373_v15 = vunpack.c.l.s8.bf16 %v209_v11  ;;  %v372_v22 = vunpack.c.l.s8.bf16 %v208_v17  ;;  %v377_v24 = vunpack.c.h.s8.bf16 %v209_v11  ;;  %v4117_v26 = vshrl.u32 %v561_v20, 7  ;;  %v181_v27 = vld [vmem:[#allocation5 + $0x48] sm:$0xff]  ;;  %v180_v33 = vld [vmem:[#allocation5 + $0x40] sm:$0xff]  ;;  %p3859_p10 = scmp.ne.s32.totalorder %s3445_s14, %s3858_s17  ;;  %p3864_p12 = scmp.lt.s32.totalorder %s3858_s17, %s3858_s17 }
  0xbc   :  { %656 = vmatpush1.bf16.msra.mxu0 %v364_v9  ;;  %616 = vmatprep.subr.bf16.mxu1 %v305_v4  ;;  %v560_v25 = vunpack.c.0.s8 %v559_v19  ;;  %v213_v28 = vld [vmem:[#allocation5 + $0x148] sm:$0xff]  ;;  %v312_v29 = vunpack.c.h.s8.bf16 %v176_v16  ;;  %v376_v30 = vunpack.c.h.s8.bf16 %v208_v17  ;;  %v317_v31 = vunpack.c.l.s8.bf16 %v181_v27  ;;  %v212_v34 = vld [vmem:[#allocation5 + $0x140] sm:$0xff] }
  0xbd   :  { %657 = vmatprep.subr.bf16.mxu0 %v369_v6  ;;  %v381_v32 = vunpack.c.l.s8.bf16 %v213_v28  ;;  %v316_v37 = vunpack.c.l.s8.bf16 %v180_v33  ;;  %v380_v38 = vunpack.c.l.s8.bf16 %v212_v34  ;;  %v321_v39 = vunpack.c.h.s8.bf16 %v181_v27  ;;  %v185_v42 = vld [vmem:[#allocation5 + $0x68] sm:$0xff]  ;;  %v184_v49 = vld [vmem:[#allocation5 + $0x60] sm:$0xff]  ;;  %p3865_p13 = por %p3864_p12, %p3863_p11 }
  0xbe   :  { %v4120_v35 = vsub.s32 %v560_v25, %v4117_v26  ;;  %v385_v40 = vunpack.c.h.s8.bf16 %v213_v28  ;;  %v217_v43 = vld [vmem:[#allocation5 + $0x168] sm:$0xff]  ;;  %v320_v45 = vunpack.c.h.s8.bf16 %v180_v33  ;;  %v384_v46 = vunpack.c.h.s8.bf16 %v212_v34  ;;  %v216_v50 = vld [vmem:[#allocation5 + $0x160] sm:$0xff] }
  0xbf   :  { %617 = vmatpush1.bf16.msra.mxu1 %v304_v12  ;;  %v325_v47 = vunpack.c.l.s8.bf16 %v185_v42  ;;  %v389_v48 = vunpack.c.l.s8.bf16 %v217_v43  ;;  %v324_v53 = vunpack.c.l.s8.bf16 %v184_v49  ;;  %v388_v54 = vunpack.c.l.s8.bf16 %v216_v50  ;;  %v189_v57 = vld [vmem:[#allocation5 + $0x88] sm:$0xff]  ;;  %v188_v63 = vld [vmem:[#allocation5 + $0x80] sm:$0xff]  ;;  %p3866_p0 = pnand %p3865_p13, %p3859_p10 }
  0xc0   :  { %658 = vmatpush1.bf16.msra.mxu0 %v368_v13  ;;  %618 = vmatprep.subr.bf16.mxu1 %v309_v14  ;;  %v4126_v41 = vrot.slane %v4122_v36, %v4120_v35  ;;  %v329_v55 = vunpack.c.h.s8.bf16 %v185_v42  ;;  %v393_v56 = vunpack.c.h.s8.bf16 %v217_v43  ;;  %v221_v58 = vld [vmem:[#allocation5 + $0x188] sm:$0xff]  ;;  %v328_v59 = vunpack.c.h.s8.bf16 %v184_v49  ;;  %v220_v0 = vld [vmem:[#allocation5 + $0x180] sm:$0xff] }
  0xc1   :  { %659 = vmatprep.subr.bf16.mxu0 %v373_v15  ;;  %v392_v60 = vunpack.c.h.s8.bf16 %v216_v50  ;;  %v333_v61 = vunpack.c.l.s8.bf16 %v189_v57  ;;  %v397_v62 = vunpack.c.l.s8.bf16 %v221_v58  ;;  %v332_v1 = vunpack.c.l.s8.bf16 %v188_v63  ;;  %v193_v5 = vld [vmem:[#allocation5 + $0xa8] sm:$0xff]  ;;  %v192_v13 = vld [vmem:[#allocation5 + $0xa0] sm:$0xff] }
  0xc2   :  { %v572_v44 = vcombine.high %v4126_v41, %v4126_v41  ;;  %v396_v2 = vunpack.c.l.s8.bf16 %v220_v0  ;;  %v337_v3 = vunpack.c.h.s8.bf16 %v189_v57  ;;  %v401_v4 = vunpack.c.h.s8.bf16 %v221_v58  ;;  %v225_v6 = vld [vmem:[#allocation5 + $0x1a8] sm:$0xff]  ;;  %v224_v14 = vld [vmem:[#allocation5 + $0x1a0] sm:$0xff]  ;;  %v174_v57 = vld [vmem:[#allocation5 + $0x10] sm:$0xff] }
  0xc3   :  { %619 = vmatpush1.bf16.msra.mxu1 %v308_v21  ;;  %v557_v7 = vcombine.high %v4122_v36, %v4122_v36  ;;  %v336_v8 = vunpack.c.h.s8.bf16 %v188_v63  ;;  %v400_v9 = vunpack.c.h.s8.bf16 %v220_v0  ;;  %v341_v11 = vunpack.c.l.s8.bf16 %v193_v5  ;;  %v197_v20 = vld [vmem:[#allocation5 + $0xc8] sm:$0xff]  ;;  %v196_v27 = vld [vmem:[#allocation5 + $0xc0] sm:$0xff]  ;;  %v179_v0 = vld [vmem:[#allocation5 + $0x38] sm:$0xff] }
  0xc4   :  { %660 = vmatpush1.bf16.msra.mxu0 %v372_v22  ;;  %620 = vmatprep.subr.bf16.mxu1 %v313_v23  ;;  %v4131_v51 = vrot.slane %v572_v44, %v4120_v35  ;;  %v405_v12 = vunpack.c.l.s8.bf16 %v225_v6  ;;  %v340_v16 = vunpack.c.l.s8.bf16 %v192_v13  ;;  %v404_v17 = vunpack.c.l.s8.bf16 %v224_v14  ;;  %v229_v21 = vld [vmem:[#allocation5 + $0x1c8] sm:$0xff]  ;;  %v228_v28 = vld [vmem:[#allocation5 + $0x1c0] sm:$0xff] }
  0xc5   :  { %661 = vmatprep.subr.bf16.mxu0 %v377_v24  ;;  %v4142_v10 = vrot.slane %v557_v7, %v4120_v35  ;;  %v345_v18 = vunpack.c.h.s8.bf16 %v193_v5  ;;  %v409_v19 = vunpack.c.h.s8.bf16 %v225_v6  ;;  %v344_v22 = vunpack.c.h.s8.bf16 %v192_v13  ;;  %v201_v33 = vld [vmem:[#allocation5 + $0xe8] sm:$0xff]  ;;  %v232_v42 = vld [vmem:[#allocation5 + $0x1e0] sm:$0xff]  ;;  %v178_v7 = vld [vmem:[#allocation5 + $0x30] sm:$0xff] }
  0xc6   :  { %646 = vmatprep.mubr.bf16.mxu1 %v4131_v51  ;;  %v4136_v52 = vcombine.high %v4131_v51, %v4131_v51  ;;  %v408_v23 = vunpack.c.h.s8.bf16 %v224_v14  ;;  %v349_v24 = vunpack.c.l.s8.bf16 %v197_v20  ;;  %v413_v25 = vunpack.c.l.s8.bf16 %v229_v21  ;;  %v233_v34 = vld [vmem:[#allocation5 + $0x1e8] sm:$0xff]  ;;  %v240_v6 = vld [vmem:[#allocation5 + $0x220] sm:$0xff] }
  0xc7   :  { %621 = vmatpush1.bf16.msra.mxu1 %v312_v29  ;;  %v4146_v15 = vrot.slane %v4142_v10, %v4120_v35  ;;  %v348_v29 = vunpack.c.l.s8.bf16 %v196_v27  ;;  %v352_v36 = vunpack.c.h.s8.bf16 %v196_v27  ;;  %v420_v44 = vunpack.c.l.s8.bf16 %v232_v42  ;;  %v241_v63 = vld [vmem:[#allocation5 + $0x228] sm:$0xff] }
  0xc8   :  { %662 = vmatpush1.bf16.msra.mxu0 %v376_v30  ;;  %622 = vmatprep.subr.bf16.mxu1 %v317_v31  ;;  %v412_v30 = vunpack.c.l.s8.bf16 %v228_v28  ;;  %v353_v31 = vunpack.c.h.s8.bf16 %v197_v20  ;;  %v4150_v49 = vrot.slane %v4126_v41, %v4120_v35  ;;  %v573_v58 = vcombine.high %v4142_v10, %v4142_v10 }
  0xc9   :  { %663 = vmatprep.subr.bf16.mxu0 %v381_v32  ;;  %687 = vmatprep.mubr.bf16.mxu0 %v4136_v52  ;;  %v417_v32 = vunpack.c.h.s8.bf16 %v229_v21  ;;  %v311_v5 = vunpack.c.l.s8.bf16 %v179_v0  ;;  %v315_v10 = vunpack.c.h.s8.bf16 %v179_v0  ;;  %v440_v13 = vunpack.c.h.s8.bf16 %v240_v6 }
  0xca   :  { %v314_v14 = vunpack.c.h.s8.bf16 %v178_v7 }
  0xcb   :  { %623 = vmatpush1.bf16.msra.mxu1 %v316_v37  ;;  %v416_v37 = vunpack.c.h.s8.bf16 %v228_v28 }
  0xcc   :  { %664 = vmatpush1.bf16.msra.mxu0 %v380_v38  ;;  %624 = vmatprep.subr.bf16.mxu1 %v321_v39  ;;  %v357_v38 = vunpack.c.l.s8.bf16 %v201_v33  ;;  %v421_v39 = vunpack.c.l.s8.bf16 %v233_v34 }
  0xcd   :  { %665 = vmatprep.subr.bf16.mxu0 %v385_v40  ;;  %v200_v40 = vld [vmem:[#allocation5 + $0xe0] sm:$0xff] }
  0xce   :  { %v356_v43 = vunpack.c.l.s8.bf16 %v200_v40  ;;  %v360_v50 = vunpack.c.h.s8.bf16 %v200_v40 }
  0xcf   :  { %625 = vmatpush1.bf16.msra.mxu1 %v320_v45  ;;  %v361_v45 = vunpack.c.h.s8.bf16 %v201_v33 }
  0xd0   :  { %666 = vmatpush1.bf16.msra.mxu0 %v384_v46  ;;  %626 = vmatprep.subr.bf16.mxu1 %v325_v47  ;;  %v425_v46 = vunpack.c.h.s8.bf16 %v233_v34  ;;  %v237_v47 = vld [vmem:[#allocation5 + $0x208] sm:$0xff] }
  0xd1   :  { %667 = vmatprep.subr.bf16.mxu0 %v389_v48  ;;  %v175_v48 = vld [vmem:[#allocation5 + $0x18] sm:$0xff] }
  0xd3   :  { %627 = vmatpush1.bf16.msra.mxu1 %v324_v53  ;;  %v424_v53 = vunpack.c.h.s8.bf16 %v232_v42 }
  0xd4   :  { %668 = vmatpush1.bf16.msra.mxu0 %v388_v54  ;;  %628 = vmatprep.subr.bf16.mxu1 %v329_v55  ;;  %v429_v54 = vunpack.c.l.s8.bf16 %v237_v47  ;;  %v303_v55 = vunpack.c.l.s8.bf16 %v175_v48 }
  0xd5   :  { %669 = vmatprep.subr.bf16.mxu0 %v393_v56  ;;  %v236_v56 = vld [vmem:[#allocation5 + $0x200] sm:$0xff] }
  0xd6   :  { %v428_v41 = vunpack.c.l.s8.bf16 %v236_v56 }
  0xd7   :  { %629 = vmatpush1.bf16.msra.mxu1 %v328_v59  ;;  %v4156_v59 = vcombine.high %v4150_v49, %v4150_v49 }
  0xd8   :  { %670 = vmatpush1.bf16.msra.mxu0 %v392_v60  ;;  %630 = vmatprep.subr.bf16.mxu1 %v333_v61  ;;  %v302_v60 = vunpack.c.l.s8.bf16 %v174_v57  ;;  %v433_v61 = vunpack.c.h.s8.bf16 %v237_v47 }
  0xd9   :  { %671 = vmatprep.subr.bf16.mxu0 %v397_v62  ;;  %v307_v62 = vunpack.c.h.s8.bf16 %v175_v48 }
  0xdb   :  { %631 = vmatpush1.bf16.msra.mxu1 %v332_v1  ;;  %v4159_v1 = vrot.slane %v573_v58, %v4120_v35  ;;  %v436_v35 = vunpack.c.l.s8.bf16 %v240_v6 }
  0xdc   :  { %672 = vmatpush1.bf16.msra.mxu0 %v396_v2  ;;  %632 = vmatprep.subr.bf16.mxu1 %v337_v3  ;;  %v432_v2 = vunpack.c.h.s8.bf16 %v236_v56  ;;  %v306_v3 = vunpack.c.h.s8.bf16 %v174_v57 }
  0xdd   :  { %673 = vmatprep.subr.bf16.mxu0 %v401_v4  ;;  %v437_v4 = vunpack.c.l.s8.bf16 %v241_v63 }
  0xdf   :  { %633 = vmatpush1.bf16.msra.mxu1 %v336_v8  ;;  %v310_v8 = vunpack.c.l.s8.bf16 %v178_v7 }
  0xe0   :  { %674 = vmatpush1.bf16.msra.mxu0 %v400_v9  ;;  %634 = vmatprep.subr.bf16.mxu1 %v341_v11  ;;  %v441_v9 = vunpack.c.h.s8.bf16 %v241_v63  ;;  %v245_v11 = vld [vmem:[#allocation5 + $0x248] sm:$0xff] }
  0xe1   :  { %675 = vmatprep.subr.bf16.mxu0 %v405_v12  ;;  %v183_v12 = vld [vmem:[#allocation5 + $0x58] sm:$0xff] }
  0xe3   :  { %635 = vmatpush1.bf16.msra.mxu1 %v340_v16  ;;  %v445_v16 = vunpack.c.l.s8.bf16 %v245_v11 }
  0xe4   :  { %676 = vmatpush1.bf16.msra.mxu0 %v404_v17  ;;  %636 = vmatprep.subr.bf16.mxu1 %v345_v18  ;;  %v319_v17 = vunpack.c.l.s8.bf16 %v183_v12  ;;  %v244_v18 = vld [vmem:[#allocation5 + $0x240] sm:$0xff] }
  0xe5   :  { %677 = vmatprep.subr.bf16.mxu0 %v409_v19  ;;  %v182_v19 = vld [vmem:[#allocation5 + $0x50] sm:$0xff]  ;;  %v444_v20 = vunpack.c.l.s8.bf16 %v244_v18  ;;  %v448_v27 = vunpack.c.h.s8.bf16 %v244_v18 }
  0xe6   :  { %v318_v21 = vunpack.c.l.s8.bf16 %v182_v19  ;;  %v322_v28 = vunpack.c.h.s8.bf16 %v182_v19 }
  0xe7   :  { %637 = vmatpush1.bf16.msra.mxu1 %v344_v22  ;;  %v449_v22 = vunpack.c.h.s8.bf16 %v245_v11 }
  0xe8   :  { %678 = vmatpush1.bf16.msra.mxu0 %v408_v23  ;;  %638 = vmatprep.subr.bf16.mxu1 %v349_v24  ;;  %v323_v23 = vunpack.c.h.s8.bf16 %v183_v12  ;;  %v249_v24 = vld [vmem:[#allocation5 + $0x268] sm:$0xff] }
  0xe9   :  { %679 = vmatprep.subr.bf16.mxu0 %v413_v25  ;;  %v187_v25 = vld [vmem:[#allocation5 + $0x78] sm:$0xff] }
  0xeb   :  { %639 = vmatpush1.bf16.msra.mxu1 %v348_v29  ;;  %v453_v29 = vunpack.c.l.s8.bf16 %v249_v24 }
  0xec   :  { %680 = vmatpush1.bf16.msra.mxu0 %v412_v30  ;;  %640 = vmatprep.subr.bf16.mxu1 %v353_v31  ;;  %v327_v30 = vunpack.c.l.s8.bf16 %v187_v25  ;;  %v248_v31 = vld [vmem:[#allocation5 + $0x260] sm:$0xff] }
  0xed   :  { %681 = vmatprep.subr.bf16.mxu0 %v417_v32  ;;  %v186_v32 = vld [vmem:[#allocation5 + $0x70] sm:$0xff]  ;;  %v452_v33 = vunpack.c.l.s8.bf16 %v248_v31  ;;  %v456_v40 = vunpack.c.h.s8.bf16 %v248_v31 }
  0xee   :  { %v326_v34 = vunpack.c.l.s8.bf16 %v186_v32  ;;  %v330_v42 = vunpack.c.h.s8.bf16 %v186_v32 }
  0xef   :  { %641 = vmatpush1.bf16.msra.mxu1 %v352_v36  ;;  %v457_v36 = vunpack.c.h.s8.bf16 %v249_v24 }
  0xf0   :  { %682 = vmatpush1.bf16.msra.mxu0 %v416_v37  ;;  %642 = vmatprep.subr.bf16.mxu1 %v357_v38  ;;  %v331_v37 = vunpack.c.h.s8.bf16 %v187_v25  ;;  %v253_v38 = vld [vmem:[#allocation5 + $0x288] sm:$0xff] }
  0xf1   :  { %683 = vmatprep.subr.bf16.mxu0 %v421_v39  ;;  %v191_v39 = vld [vmem:[#allocation5 + $0x98] sm:$0xff] }
  0xf3   :  { %643 = vmatpush1.bf16.msra.mxu1 %v356_v43  ;;  %v461_v43 = vunpack.c.l.s8.bf16 %v253_v38 }
  0xf4   :  { %684 = vmatpush1.bf16.msra.mxu0 %v420_v44  ;;  %644 = vmatprep.subr.bf16.mxu1 %v361_v45  ;;  %v335_v44 = vunpack.c.l.s8.bf16 %v191_v39  ;;  %v252_v45 = vld [vmem:[#allocation5 + $0x280] sm:$0xff] }
  0xf5   :  { %685 = vmatprep.subr.bf16.mxu0 %v425_v46  ;;  %v190_v46 = vld [vmem:[#allocation5 + $0x90] sm:$0xff]  ;;  %v460_v47 = vunpack.c.l.s8.bf16 %v252_v45  ;;  %v464_v56 = vunpack.c.h.s8.bf16 %v252_v45 }
  0xf6   :  { %v334_v48 = vunpack.c.l.s8.bf16 %v190_v46  ;;  %v338_v57 = vunpack.c.h.s8.bf16 %v190_v46 }
  0xf7   :  { %645 = vmatpush1.bf16.msra.mxu1 %v360_v50  ;;  %v465_v50 = vunpack.c.h.s8.bf16 %v253_v38 }
  0xf8   :  { %686 = vmatpush1.bf16.msra.mxu0 %v424_v53  ;;  %778 = vmatprep.subr.bf16.mxu1 %v303_v55  ;;  %v339_v53 = vunpack.c.h.s8.bf16 %v191_v39  ;;  %v195_v55 = vld [vmem:[#allocation5 + $0xb8] sm:$0xff] }
  0xf9   :  { %696 = vmatprep.subr.bf16.mxu0 %v429_v54  ;;  %v257_v54 = vld [vmem:[#allocation5 + $0x2a8] sm:$0xff] }
  0xfa   :  { %647 = vmatmul.mubr.bf16.vlgmr.msra.gmra.mrb[0].mxu1 %v4150_v49  ;;  %v469_v58 = vunpack.c.l.s8.bf16 %v257_v54  ;;  %v473_v0 = vunpack.c.h.s8.bf16 %v257_v54 }
  0xfb   :  { %688 = vmatmul.mubr.bf16.vlgmr.msra.gmra.mrb[0].mxu0 %v4156_v59  ;;  %779 = vmatpush1.bf16.msra.mxu1 %v302_v60  ;;  %v256_v60 = vld [vmem:[#allocation5 + $0x2a0] sm:$0xff] }
  0xfc   :  { %697 = vmatpush1.bf16.msra.mxu0 %v428_v41  ;;  %780 = vmatprep.subr.bf16.mxu1 %v307_v62  ;;  %v343_v41 = vunpack.c.l.s8.bf16 %v195_v55  ;;  %v468_v62 = vunpack.c.l.s8.bf16 %v256_v60 }
  0xfd   :  { %698 = vmatprep.subr.bf16.mxu0 %v433_v61  ;;  %728 = vmatprep.mubr.bf16.mxu0 %v4159_v1  ;;  %v194_v61 = vld [vmem:[#allocation5 + $0xb0] sm:$0xff] }
  0xfe   :  { %810 = vmatprep.mubr.bf16.mxu1 %v4131_v51  ;;  %v342_v63 = vunpack.c.l.s8.bf16 %v194_v61  ;;  %v346_v6 = vunpack.c.h.s8.bf16 %v194_v61 }
  0xff   :  { %781 = vmatpush1.bf16.msra.mxu1 %v306_v3  ;;  %v261_v3 = vld [vmem:[#allocation5 + $0x2c8] sm:$0xff] }
 0x100   :  { %699 = vmatpush1.bf16.msra.mxu0 %v432_v2  ;;  %782 = vmatprep.subr.bf16.mxu1 %v311_v5  ;;  %v347_v2 = vunpack.c.h.s8.bf16 %v195_v55  ;;  %v472_v5 = vunpack.c.h.s8.bf16 %v256_v60  ;;  %v477_v7 = vunpack.c.l.s8.bf16 %v261_v3  ;;  %v481_v12 = vunpack.c.h.s8.bf16 %v261_v3 }
 0x101   :  { %700 = vmatprep.subr.bf16.mxu0 %v437_v4  ;;  %v199_v4 = vld [vmem:[#allocation5 + $0xd8] sm:$0xff] }
 0x103   :  { %783 = vmatpush1.bf16.msra.mxu1 %v310_v8  ;;  %v260_v8 = vld [vmem:[#allocation5 + $0x2c0] sm:$0xff] }
 0x104   :  { %701 = vmatpush1.bf16.msra.mxu0 %v436_v35  ;;  %784 = vmatprep.subr.bf16.mxu1 %v315_v10  ;;  %v351_v35 = vunpack.c.l.s8.bf16 %v199_v4  ;;  %v476_v10 = vunpack.c.l.s8.bf16 %v260_v8 }
 0x105   :  { %702 = vmatprep.subr.bf16.mxu0 %v441_v9  ;;  %v198_v9 = vld [vmem:[#allocation5 + $0xd0] sm:$0xff] }
 0x106   :  { %v350_v11 = vunpack.c.l.s8.bf16 %v198_v9  ;;  %v354_v18 = vunpack.c.h.s8.bf16 %v198_v9 }
 0x107   :  { %785 = vmatpush1.bf16.msra.mxu1 %v314_v14  ;;  %v265_v14 = vld [vmem:[#allocation5 + $0x2e8] sm:$0xff] }
 0x108   :  { %703 = vmatpush1.bf16.msra.mxu0 %v440_v13  ;;  %786 = vmatprep.subr.bf16.mxu1 %v319_v17  ;;  %v355_v13 = vunpack.c.h.s8.bf16 %v199_v4  ;;  %v480_v17 = vunpack.c.h.s8.bf16 %v260_v8  ;;  %v485_v19 = vunpack.c.l.s8.bf16 %v265_v14  ;;  %v489_v25 = vunpack.c.h.s8.bf16 %v265_v14 }
 0x109   :  { %704 = vmatprep.subr.bf16.mxu0 %v445_v16  ;;  %v203_v16 = vld [vmem:[#allocation5 + $0xf8] sm:$0xff] }
 0x10b   :  { %787 = vmatpush1.bf16.msra.mxu1 %v318_v21  ;;  %v264_v21 = vld [vmem:[#allocation5 + $0x2e0] sm:$0xff] }
 0x10c   :  { %705 = vmatpush1.bf16.msra.mxu0 %v444_v20  ;;  %788 = vmatprep.subr.bf16.mxu1 %v323_v23  ;;  %v359_v20 = vunpack.c.l.s8.bf16 %v203_v16  ;;  %v484_v23 = vunpack.c.l.s8.bf16 %v264_v21 }
 0x10d   :  { %706 = vmatprep.subr.bf16.mxu0 %v449_v22  ;;  %v202_v22 = vld [vmem:[#allocation5 + $0xf0] sm:$0xff] }
 0x10e   :  { %v358_v24 = vunpack.c.l.s8.bf16 %v202_v22  ;;  %v362_v31 = vunpack.c.h.s8.bf16 %v202_v22 }
 0x10f   :  { %789 = vmatpush1.bf16.msra.mxu1 %v322_v28  ;;  %v269_v28 = vld [vmem:[#allocation5 + $0x308] sm:$0xff] }
 0x110   :  { %707 = vmatpush1.bf16.msra.mxu0 %v448_v27  ;;  %790 = vmatprep.subr.bf16.mxu1 %v327_v30  ;;  %v363_v27 = vunpack.c.h.s8.bf16 %v203_v16  ;;  %v488_v30 = vunpack.c.h.s8.bf16 %v264_v21  ;;  %v493_v32 = vunpack.c.l.s8.bf16 %v269_v28  ;;  %v497_v39 = vunpack.c.h.s8.bf16 %v269_v28 }
 0x111   :  { %708 = vmatprep.subr.bf16.mxu0 %v453_v29  ;;  %v207_v29 = vld [vmem:[#allocation5 + $0x118] sm:$0xff] }
 0x113   :  { %791 = vmatpush1.bf16.msra.mxu1 %v326_v34  ;;  %v268_v34 = vld [vmem:[#allocation5 + $0x300] sm:$0xff] }
 0x114   :  { %709 = vmatpush1.bf16.msra.mxu0 %v452_v33  ;;  %792 = vmatprep.subr.bf16.mxu1 %v331_v37  ;;  %v367_v33 = vunpack.c.l.s8.bf16 %v207_v29  ;;  %v492_v37 = vunpack.c.l.s8.bf16 %v268_v34  ;;  %v496_v45 = vunpack.c.h.s8.bf16 %v268_v34 }
 0x115   :  { %710 = vmatprep.subr.bf16.mxu0 %v457_v36  ;;  %v206_v36 = vld [vmem:[#allocation5 + $0x110] sm:$0xff] }
 0x116   :  { %v366_v38 = vunpack.c.l.s8.bf16 %v206_v36  ;;  %v370_v46 = vunpack.c.h.s8.bf16 %v206_v36 }
 0x117   :  { %793 = vmatpush1.bf16.msra.mxu1 %v330_v42  ;;  %v273_v42 = vld [vmem:[#allocation5 + $0x328] sm:$0xff] }
 0x118   :  { %711 = vmatpush1.bf16.msra.mxu0 %v456_v40  ;;  %794 = vmatprep.subr.bf16.mxu1 %v335_v44  ;;  %v371_v40 = vunpack.c.h.s8.bf16 %v207_v29  ;;  %v4167_v44 = vcombine.high %v4159_v1, %v4159_v1 }
 0x119   :  { %712 = vmatprep.subr.bf16.mxu0 %v461_v43  ;;  %v211_v43 = vld [vmem:[#allocation5 + $0x138] sm:$0xff] }
 0x11b   :  { %795 = vmatpush1.bf16.msra.mxu1 %v334_v48  ;;  %v375_v48 = vunpack.c.l.s8.bf16 %v211_v43 }
 0x11c   :  { %713 = vmatpush1.bf16.msra.mxu0 %v460_v47  ;;  %796 = vmatprep.subr.bf16.mxu1 %v339_v53  ;;  %v501_v47 = vunpack.c.l.s8.bf16 %v273_v42  ;;  %v210_v53 = vld [vmem:[#allocation5 + $0x130] sm:$0xff] }
 0x11d   :  { %714 = vmatprep.subr.bf16.mxu0 %v465_v50  ;;  %v272_v50 = vld [vmem:[#allocation5 + $0x320] sm:$0xff]  ;;  %v374_v55 = vunpack.c.l.s8.bf16 %v210_v53  ;;  %v378_v61 = vunpack.c.h.s8.bf16 %v210_v53 }
 0x11e   :  { %v500_v54 = vunpack.c.l.s8.bf16 %v272_v50  ;;  %v504_v60 = vunpack.c.h.s8.bf16 %v272_v50 }
 0x11f   :  { %797 = vmatpush1.bf16.msra.mxu1 %v338_v57  ;;  %v379_v57 = vunpack.c.h.s8.bf16 %v211_v43 }
 0x120   :  { %715 = vmatpush1.bf16.msra.mxu0 %v464_v56  ;;  %798 = vmatprep.subr.bf16.mxu1 %v343_v41  ;;  %v505_v56 = vunpack.c.h.s8.bf16 %v273_v42  ;;  %v215_v41 = vld [vmem:[#allocation5 + $0x158] sm:$0xff] }
 0x121   :  { %716 = vmatprep.subr.bf16.mxu0 %v469_v58  ;;  %v277_v58 = vld [vmem:[#allocation5 + $0x348] sm:$0xff] }
 0x123   :  { %799 = vmatpush1.bf16.msra.mxu1 %v342_v63  ;;  %v383_v63 = vunpack.c.l.s8.bf16 %v215_v41 }
 0x124   :  { %717 = vmatpush1.bf16.msra.mxu0 %v468_v62  ;;  %800 = vmatprep.subr.bf16.mxu1 %v347_v2  ;;  %v509_v62 = vunpack.c.l.s8.bf16 %v277_v58  ;;  %v214_v2 = vld [vmem:[#allocation5 + $0x150] sm:$0xff] }
 0x125   :  { %718 = vmatprep.subr.bf16.mxu0 %v473_v0  ;;  %v276_v0 = vld [vmem:[#allocation5 + $0x340] sm:$0xff]  ;;  %v382_v4 = vunpack.c.l.s8.bf16 %v214_v2  ;;  %v386_v9 = vunpack.c.h.s8.bf16 %v214_v2 }
 0x126   :  { %v508_v3 = vunpack.c.l.s8.bf16 %v276_v0  ;;  %v512_v8 = vunpack.c.h.s8.bf16 %v276_v0 }
 0x127   :  { %801 = vmatpush1.bf16.msra.mxu1 %v346_v6  ;;  %v387_v6 = vunpack.c.h.s8.bf16 %v215_v41 }
 0x128   :  { %719 = vmatpush1.bf16.msra.mxu0 %v472_v5  ;;  %802 = vmatprep.subr.bf16.mxu1 %v351_v35  ;;  %v513_v5 = vunpack.c.h.s8.bf16 %v277_v58  ;;  %v219_v35 = vld [vmem:[#allocation5 + $0x178] sm:$0xff] }
 0x129   :  { %720 = vmatprep.subr.bf16.mxu0 %v477_v7  ;;  %v281_v7 = vld [vmem:[#allocation5 + $0x368] sm:$0xff] }
 0x12b   :  { %803 = vmatpush1.bf16.msra.mxu1 %v350_v11  ;;  %v391_v11 = vunpack.c.l.s8.bf16 %v219_v35 }
 0x12c   :  { %721 = vmatpush1.bf16.msra.mxu0 %v476_v10  ;;  %804 = vmatprep.subr.bf16.mxu1 %v355_v13  ;;  %v517_v10 = vunpack.c.l.s8.bf16 %v281_v7  ;;  %v218_v13 = vld [vmem:[#allocation5 + $0x170] sm:$0xff] }
 0x12d   :  { %722 = vmatprep.subr.bf16.mxu0 %v481_v12  ;;  %v280_v12 = vld [vmem:[#allocation5 + $0x360] sm:$0xff]  ;;  %v390_v16 = vunpack.c.l.s8.bf16 %v218_v13  ;;  %v394_v22 = vunpack.c.h.s8.bf16 %v218_v13 }
 0x12e   :  { %v516_v14 = vunpack.c.l.s8.bf16 %v280_v12  ;;  %v520_v21 = vunpack.c.h.s8.bf16 %v280_v12 }
 0x12f   :  { %805 = vmatpush1.bf16.msra.mxu1 %v354_v18  ;;  %v395_v18 = vunpack.c.h.s8.bf16 %v219_v35 }
 0x130   :  { %723 = vmatpush1.bf16.msra.mxu0 %v480_v17  ;;  %806 = vmatprep.subr.bf16.mxu1 %v359_v20  ;;  %v521_v17 = vunpack.c.h.s8.bf16 %v281_v7  ;;  %v223_v20 = vld [vmem:[#allocation5 + $0x198] sm:$0xff] }
 0x131   :  { %724 = vmatprep.subr.bf16.mxu0 %v485_v19  ;;  %v285_v19 = vld [vmem:[#allocation5 + $0x388] sm:$0xff] }
 0x133   :  { %807 = vmatpush1.bf16.msra.mxu1 %v358_v24  ;;  %v399_v24 = vunpack.c.l.s8.bf16 %v223_v20 }
 0x134   :  { %725 = vmatpush1.bf16.msra.mxu0 %v484_v23  ;;  %808 = vmatprep.subr.bf16.mxu1 %v363_v27  ;;  %v525_v23 = vunpack.c.l.s8.bf16 %v285_v19  ;;  %v222_v27 = vld [vmem:[#allocation5 + $0x190] sm:$0xff] }
 0x135   :  { %726 = vmatprep.subr.bf16.mxu0 %v489_v25  ;;  %v284_v25 = vld [vmem:[#allocation5 + $0x380] sm:$0xff]  ;;  %v398_v29 = vunpack.c.l.s8.bf16 %v222_v27  ;;  %v402_v36 = vunpack.c.h.s8.bf16 %v222_v27 }
 0x136   :  { %v524_v28 = vunpack.c.l.s8.bf16 %v284_v25  ;;  %v528_v34 = vunpack.c.h.s8.bf16 %v284_v25 }
 0x137   :  { %809 = vmatpush1.bf16.msra.mxu1 %v362_v31  ;;  %v403_v31 = vunpack.c.h.s8.bf16 %v223_v20  ;;  %v999_v20 = vld [vmem:[#allocation10 + $0x8] sm:$0xff] }
 0x138   :  { %727 = vmatpush1.bf16.msra.mxu0 %v488_v30  ;;  %819 = vmatprep.subr.bf16.mxu1 %v367_v33  ;;  %v529_v30 = vunpack.c.h.s8.bf16 %v285_v19  ;;  %v227_v33 = vld [vmem:[#allocation5 + $0x1b8] sm:$0xff]  ;;  %v1033_v25 = vunpack.c.h.s8.bf16 %v999_v20 }
 0x139   :  { %737 = vmatprep.subr.bf16.mxu0 %v493_v32  ;;  %v289_v32 = vld [vmem:[#allocation5 + $0x3a8] sm:$0xff]  ;;  %v243_v19 = vld [vmem:[#allocation5 + $0x238] sm:$0xff] }
 0x13a   :  { %811 = vmatmul.mubr.bf16.vlgmr.msra.gmra.mrb[4].mxu1 %v4150_v49  ;;  %v439_v27 = vunpack.c.l.s8.bf16 %v243_v19 }
 0x13b   :  { %729 = vmatmul.mubr.bf16.vlgmr.msra.gmra.mrb[0].mxu0 %v4146_v15  ;;  %820 = vmatpush1.bf16.msra.mxu1 %v366_v38  ;;  %v407_v38 = vunpack.c.l.s8.bf16 %v227_v33 }
 0x13c   :  { %738 = vmatpush1.bf16.msra.mxu0 %v492_v37  ;;  %821 = vmatprep.subr.bf16.mxu1 %v371_v40  ;;  %v533_v37 = vunpack.c.l.s8.bf16 %v289_v32  ;;  %v226_v40 = vld [vmem:[#allocation5 + $0x1b0] sm:$0xff] }
 0x13d   :  { %739 = vmatprep.subr.bf16.mxu0 %v497_v39  ;;  %769 = vmatprep.mubr.bf16.mxu0 %v4167_v44  ;;  %v288_v39 = vld [vmem:[#allocation5 + $0x3a0] sm:$0xff]  ;;  %v406_v43 = vunpack.c.l.s8.bf16 %v226_v40  ;;  %v410_v53 = vunpack.c.h.s8.bf16 %v226_v40 }
 0x13e   :  { %851 = vmatprep.mubr.bf16.mxu1 %v4136_v52  ;;  %v532_v42 = vunpack.c.l.s8.bf16 %v288_v39  ;;  %v536_v50 = vunpack.c.h.s8.bf16 %v288_v39 }
 0x13f   :  { %822 = vmatpush1.bf16.msra.mxu1 %v370_v46  ;;  %v411_v46 = vunpack.c.h.s8.bf16 %v227_v33  ;;  %v1000_v33 = vld [vmem:[#allocation10 + $0x10] sm:$0xff] }
 0x140   :  { %740 = vmatpush1.bf16.msra.mxu0 %v496_v45  ;;  %823 = vmatprep.subr.bf16.mxu1 %v375_v48  ;;  %v537_v45 = vunpack.c.h.s8.bf16 %v289_v32  ;;  %v231_v48 = vld [vmem:[#allocation5 + $0x1d8] sm:$0xff] }
 0x141   :  { %741 = vmatprep.subr.bf16.mxu0 %v501_v47  ;;  %v293_v47 = vld [vmem:[#allocation5 + $0x3c8] sm:$0xff] }
 0x143   :  { %824 = vmatpush1.bf16.msra.mxu1 %v374_v55  ;;  %v415_v55 = vunpack.c.l.s8.bf16 %v231_v48 }
 0x144   :  { %742 = vmatpush1.bf16.msra.mxu0 %v500_v54  ;;  %825 = vmatprep.subr.bf16.mxu1 %v379_v57  ;;  %v541_v54 = vunpack.c.l.s8.bf16 %v293_v47  ;;  %v230_v57 = vld [vmem:[#allocation5 + $0x1d0] sm:$0xff] }
 0x145   :  { %743 = vmatprep.subr.bf16.mxu0 %v505_v56  ;;  %v292_v56 = vld [vmem:[#allocation5 + $0x3c0] sm:$0xff]  ;;  %v414_v41 = vunpack.c.l.s8.bf16 %v230_v57  ;;  %v418_v2 = vunpack.c.h.s8.bf16 %v230_v57 }
 0x146   :  { %v540_v58 = vunpack.c.l.s8.bf16 %v292_v56  ;;  %v544_v0 = vunpack.c.h.s8.bf16 %v292_v56 }
 0x147   :  { %826 = vmatpush1.bf16.msra.mxu1 %v378_v61  ;;  %v419_v61 = vunpack.c.h.s8.bf16 %v231_v48  ;;  %v1002_v48 = vld [vmem:[#allocation10 + $0x20] sm:$0xff] }
 0x148   :  { %744 = vmatpush1.bf16.msra.mxu0 %v504_v60  ;;  %827 = vmatprep.subr.bf16.mxu1 %v383_v63  ;;  %v545_v60 = vunpack.c.h.s8.bf16 %v293_v47  ;;  %v235_v63 = vld [vmem:[#allocation5 + $0x1f8] sm:$0xff] }
 0x149   :  { %745 = vmatprep.subr.bf16.mxu0 %v509_v62  ;;  %v297_v62 = vld [vmem:[#allocation5 + $0x3e8] sm:$0xff] }
 0x14b   :  { %828 = vmatpush1.bf16.msra.mxu1 %v382_v4  ;;  %v423_v4 = vunpack.c.l.s8.bf16 %v235_v63 }
 0x14c   :  { %746 = vmatpush1.bf16.msra.mxu0 %v508_v3  ;;  %829 = vmatprep.subr.bf16.mxu1 %v387_v6  ;;  %v549_v3 = vunpack.c.l.s8.bf16 %v297_v62  ;;  %v234_v6 = vld [vmem:[#allocation5 + $0x1f0] sm:$0xff] }
 0x14d   :  { %747 = vmatprep.subr.bf16.mxu0 %v513_v5  ;;  %v296_v5 = vld [vmem:[#allocation5 + $0x3e0] sm:$0xff]  ;;  %v422_v35 = vunpack.c.l.s8.bf16 %v234_v6  ;;  %v426_v12 = vunpack.c.h.s8.bf16 %v234_v6 }
 0x14e   :  { %v548_v7 = vunpack.c.l.s8.bf16 %v296_v5 }
 0x14f   :  { %830 = vmatpush1.bf16.msra.mxu1 %v386_v9  ;;  %v427_v9 = vunpack.c.h.s8.bf16 %v235_v63  ;;  %v1004_v63 = vld [vmem:[#allocation10 + $0x30] sm:$0xff] }
 0x150   :  { %748 = vmatpush1.bf16.msra.mxu0 %v512_v8  ;;  %831 = vmatprep.subr.bf16.mxu1 %v391_v11  ;;  %v553_v8 = vunpack.c.h.s8.bf16 %v297_v62  ;;  %v552_v11 = vunpack.c.h.s8.bf16 %v296_v5 }
 0x151   :  { %749 = vmatprep.subr.bf16.mxu0 %v517_v10  ;;  %v239_v10 = vld [vmem:[#allocation5 + $0x218] sm:$0xff] }
 0x152   :  { %v431_v13 = vunpack.c.l.s8.bf16 %v239_v10 }
 0x153   :  { %832 = vmatpush1.bf16.msra.mxu1 %v390_v16  ;;  %v4175_v16 = vcombine.high %v4146_v15, %v4146_v15 }
 0x154   :  { %750 = vmatpush1.bf16.msra.mxu0 %v516_v14  ;;  %833 = vmatprep.subr.bf16.mxu1 %v395_v18  ;;  %v238_v14 = vld [vmem:[#allocation5 + $0x210] sm:$0xff]  ;;  %v435_v18 = vunpack.c.h.s8.bf16 %v239_v10 }
 0x155   :  { %751 = vmatprep.subr.bf16.mxu0 %v521_v17  ;;  %v430_v17 = vunpack.c.l.s8.bf16 %v238_v14 }
 0x157   :  { %834 = vmatpush1.bf16.msra.mxu1 %v394_v22  ;;  %v434_v22 = vunpack.c.h.s8.bf16 %v238_v14 }
 0x158   :  { %752 = vmatpush1.bf16.msra.mxu0 %v520_v21  ;;  %835 = vmatprep.subr.bf16.mxu1 %v399_v24  ;;  %v998_v21 = vld [vmem:[#allocation10] sm:$0xff] }
 0x159   :  { %753 = vmatprep.subr.bf16.mxu0 %v525_v23  ;;  %v1031_v23 = vunpack.c.l.s8.bf16 %v999_v20  ;;  %v1030_v24 = vunpack.c.l.s8.bf16 %v998_v21  ;;  %v258_v20 = vld [vmem:[#allocation5 + $0x2b0] sm:$0xff] }
 0x15b   :  { %836 = vmatpush1.bf16.msra.mxu1 %v398_v29  ;;  %v1001_v29 = vld [vmem:[#allocation10 + $0x18] sm:$0xff] }
 0x15c   :  { %754 = vmatpush1.bf16.msra.mxu0 %v524_v28  ;;  %837 = vmatprep.subr.bf16.mxu1 %v403_v31  ;;  %v242_v28 = vld [vmem:[#allocation5 + $0x230] sm:$0xff]  ;;  %v1035_v32 = vunpack.c.l.s8.bf16 %v1001_v29  ;;  %v1037_v39 = vunpack.c.h.s8.bf16 %v1001_v29 }
 0x15d   :  { %755 = vmatprep.subr.bf16.mxu0 %v529_v30  ;;  %v1032_v30 = vunpack.c.h.s8.bf16 %v998_v21  ;;  %v438_v31 = vunpack.c.l.s8.bf16 %v242_v28  ;;  %v1009_v21 = vld [vmem:[#allocation10 + $0x58] sm:$0xff] }
 0x15f   :  { %838 = vmatpush1.bf16.msra.mxu1 %v402_v36  ;;  %v247_v36 = vld [vmem:[#allocation5 + $0x258] sm:$0xff] }
 0x160   :  { %756 = vmatpush1.bf16.msra.mxu0 %v528_v34  ;;  %839 = vmatprep.subr.bf16.mxu1 %v407_v38  ;;  %v443_v34 = vunpack.c.h.s8.bf16 %v243_v19  ;;  %v442_v38 = vunpack.c.h.s8.bf16 %v242_v28  ;;  %v447_v40 = vunpack.c.l.s8.bf16 %v247_v36  ;;  %v263_v28 = vld [vmem:[#allocation5 + $0x2d8] sm:$0xff] }
 0x161   :  { %757 = vmatprep.subr.bf16.mxu0 %v533_v37  ;;  %v1034_v37 = vunpack.c.l.s8.bf16 %v1000_v33 }
 0x163   :  { %840 = vmatpush1.bf16.msra.mxu1 %v406_v43  ;;  %v1003_v43 = vld [vmem:[#allocation10 + $0x28] sm:$0xff] }
 0x164   :  { %758 = vmatpush1.bf16.msra.mxu0 %v532_v42  ;;  %841 = vmatprep.subr.bf16.mxu1 %v411_v46  ;;  %v246_v42 = vld [vmem:[#allocation5 + $0x250] sm:$0xff]  ;;  %v1039_v47 = vunpack.c.l.s8.bf16 %v1003_v43  ;;  %v1041_v56 = vunpack.c.h.s8.bf16 %v1003_v43 }
 0x165   :  { %759 = vmatprep.subr.bf16.mxu0 %v537_v45  ;;  %v1036_v45 = vunpack.c.h.s8.bf16 %v1000_v33  ;;  %v446_v46 = vunpack.c.l.s8.bf16 %v246_v42  ;;  %v262_v33 = vld [vmem:[#allocation5 + $0x2d0] sm:$0xff] }
 0x167   :  { %842 = vmatpush1.bf16.msra.mxu1 %v410_v53  ;;  %v251_v53 = vld [vmem:[#allocation5 + $0x278] sm:$0xff] }
 0x168   :  { %760 = vmatpush1.bf16.msra.mxu0 %v536_v50  ;;  %843 = vmatprep.subr.bf16.mxu1 %v415_v55  ;;  %v451_v50 = vunpack.c.h.s8.bf16 %v247_v36  ;;  %v450_v55 = vunpack.c.h.s8.bf16 %v246_v42  ;;  %v455_v57 = vunpack.c.l.s8.bf16 %v251_v53  ;;  %v267_v42 = vld [vmem:[#allocation5 + $0x2f8] sm:$0xff] }
 0x169   :  { %761 = vmatprep.subr.bf16.mxu0 %v541_v54  ;;  %v1038_v54 = vunpack.c.l.s8.bf16 %v1002_v48 }
 0x16b   :  { %844 = vmatpush1.bf16.msra.mxu1 %v414_v41  ;;  %v1005_v41 = vld [vmem:[#allocation10 + $0x38] sm:$0xff] }
 0x16c   :  { %762 = vmatpush1.bf16.msra.mxu0 %v540_v58  ;;  %845 = vmatprep.subr.bf16.mxu1 %v419_v61  ;;  %v250_v58 = vld [vmem:[#allocation5 + $0x270] sm:$0xff]  ;;  %v1043_v62 = vunpack.c.l.s8.bf16 %v1005_v41  ;;  %v1045_v5 = vunpack.c.h.s8.bf16 %v1005_v41  ;;  %v275_v41 = vld [vmem:[#allocation5 + $0x338] sm:$0xff] }
 0x16d   :  { %763 = vmatprep.subr.bf16.mxu0 %v545_v60  ;;  %v1040_v60 = vunpack.c.h.s8.bf16 %v1002_v48  ;;  %v454_v61 = vunpack.c.l.s8.bf16 %v250_v58 }
 0x16f   :  { %846 = vmatpush1.bf16.msra.mxu1 %v418_v2  ;;  %v255_v2 = vld [vmem:[#allocation5 + $0x298] sm:$0xff] }
 0x170   :  { %764 = vmatpush1.bf16.msra.mxu0 %v544_v0  ;;  %847 = vmatprep.subr.bf16.mxu1 %v423_v4  ;;  %v459_v0 = vunpack.c.h.s8.bf16 %v251_v53  ;;  %v458_v4 = vunpack.c.h.s8.bf16 %v250_v58  ;;  %v463_v6 = vunpack.c.l.s8.bf16 %v255_v2  ;;  %v271_v53 = vld [vmem:[#allocation5 + $0x318] sm:$0xff] }
 0x171   :  { %765 = vmatprep.subr.bf16.mxu0 %v549_v3  ;;  %v1042_v3 = vunpack.c.l.s8.bf16 %v1004_v63  ;;  %v499_v58 = vunpack.c.h.s8.bf16 %v271_v53 }
 0x173   :  { %848 = vmatpush1.bf16.msra.mxu1 %v422_v35  ;;  %v1007_v35 = vld [vmem:[#allocation10 + $0x48] sm:$0xff] }
 0x174   :  { %766 = vmatpush1.bf16.msra.mxu0 %v548_v7  ;;  %849 = vmatprep.subr.bf16.mxu1 %v427_v9  ;;  %v254_v7 = vld [vmem:[#allocation5 + $0x290] sm:$0xff]  ;;  %v1047_v10 = vunpack.c.l.s8.bf16 %v1007_v35 }
 0x175   :  { %767 = vmatprep.subr.bf16.mxu0 %v553_v8  ;;  %v1044_v8 = vunpack.c.h.s8.bf16 %v1004_v63  ;;  %v462_v9 = vunpack.c.l.s8.bf16 %v254_v7 }
 0x177   :  { %850 = vmatpush1.bf16.msra.mxu1 %v426_v12  ;;  %v467_v12 = vunpack.c.h.s8.bf16 %v255_v2  ;;  %v279_v2 = vld [vmem:[#allocation5 + $0x358] sm:$0xff] }
 0x178   :  { %768 = vmatpush1.bf16.msra.mxu0 %v552_v11  ;;  %860 = vmatprep.subr.bf16.mxu1 %v431_v13  ;;  %v1006_v11 = vld [vmem:[#allocation10 + $0x40] sm:$0xff] }
 0x179   :  { %1098 = vmatprep.subr.bf16.mxu0 %v1031_v23  ;;  %v259_v13 = vld [vmem:[#allocation5 + $0x2b8] sm:$0xff]  ;;  %v1046_v14 = vunpack.c.l.s8.bf16 %v1006_v11  ;;  %v470_v23 = vunpack.c.l.s8.bf16 %v258_v20 }
 0x17a   :  { %852 = vmatmul.mubr.bf16.vlgmr.msra.gmra.mrb[4].mxu1 %v4156_v59  ;;  %v471_v19 = vunpack.c.l.s8.bf16 %v259_v13 }
 0x17b   :  { %770 = vmatmul.mubr.bf16.vlgmr.msra.gmra.mrb[0].mxu0 %v4175_v16  ;;  %861 = vmatpush1.bf16.msra.mxu1 %v430_v17  ;;  %v466_v17 = vunpack.c.h.s8.bf16 %v254_v7  ;;  %v515_v7 = vunpack.c.h.s8.bf16 %v279_v2 }
 0x17c   :  { %892 = vmatprep.mubr.bf16.mxu1 %v4159_v1  ;;  %862 = vmatprep.subr.bf16.mxu1 %v435_v18  ;;  %v1049_v18 = vunpack.c.h.s8.bf16 %v1007_v35  ;;  %v283_v35 = vld [vmem:[#allocation5 + $0x378] sm:$0xff] }
 0x17d   :  { %1099 = vmatpush1.bf16.msra.mxu0 %v1030_v24  ;;  %v1051_v24 = vunpack.c.l.s8.bf16 %v1009_v21 }
 0x17e   :  { %1100 = vmatprep.subr.bf16.mxu0 %v1033_v25  ;;  %v1008_v25 = vld [vmem:[#allocation10 + $0x50] sm:$0xff] }
 0x17f   :  { %863 = vmatpush1.bf16.msra.mxu1 %v434_v22  ;;  %v1048_v22 = vunpack.c.h.s8.bf16 %v1006_v11  ;;  %v1050_v29 = vunpack.c.l.s8.bf16 %v1008_v25  ;;  %v1052_v36 = vunpack.c.h.s8.bf16 %v1008_v25 }
 0x180   :  { %864 = vmatprep.subr.bf16.mxu1 %v439_v27  ;;  %v475_v27 = vunpack.c.h.s8.bf16 %v259_v13 }
 0x181   :  { %1101 = vmatpush1.bf16.msra.mxu0 %v1032_v30  ;;  %v474_v30 = vunpack.c.h.s8.bf16 %v258_v20 }
 0x182   :  { %1102 = vmatprep.subr.bf16.mxu0 %v1035_v32  ;;  %v479_v32 = vunpack.c.l.s8.bf16 %v263_v28 }
 0x183   :  { %865 = vmatpush1.bf16.msra.mxu1 %v438_v31  ;;  %v1053_v31 = vunpack.c.h.s8.bf16 %v1009_v21  ;;  %v523_v21 = vunpack.c.h.s8.bf16 %v283_v35 }
 0x184   :  { %866 = vmatprep.subr.bf16.mxu1 %v443_v34  ;;  %v4180_v34 = vld [vmem:[#allocation10 + $0x68] sm:$0xff] }
 0x185   :  { %1103 = vmatpush1.bf16.msra.mxu0 %v1034_v37  ;;  %v478_v37 = vunpack.c.l.s8.bf16 %v262_v33  ;;  %v1057_v11 = vunpack.c.h.s8.bf16 %v4180_v34 }
 0x186   :  { %1104 = vmatprep.subr.bf16.mxu0 %v1037_v39  ;;  %v4183_v39 = vld [vmem:[#allocation10 + $0x60] sm:$0xff] }
 0x187   :  { %867 = vmatpush1.bf16.msra.mxu1 %v442_v38  ;;  %v1055_v38 = vunpack.c.l.s8.bf16 %v4180_v34  ;;  %v1054_v43 = vunpack.c.l.s8.bf16 %v4183_v39  ;;  %v1056_v13 = vunpack.c.h.s8.bf16 %v4183_v39  ;;  %v291_v34 = vld [vmem:[#allocation5 + $0x3b8] sm:$0xff] }
 0x188   :  { %868 = vmatprep.subr.bf16.mxu1 %v447_v40  ;;  %v483_v40 = vunpack.c.h.s8.bf16 %v263_v28  ;;  %v535_v39 = vunpack.c.l.s8.bf16 %v291_v34 }
 0x189   :  { %1105 = vmatpush1.bf16.msra.mxu0 %v1036_v45  ;;  %v482_v45 = vunpack.c.h.s8.bf16 %v262_v33 }
 0x18a   :  { %1106 = vmatprep.subr.bf16.mxu0 %v1039_v47  ;;  %v266_v47 = vld [vmem:[#allocation5 + $0x2f0] sm:$0xff] }
 0x18b   :  { %869 = vmatpush1.bf16.msra.mxu1 %v446_v46  ;;  %v487_v46 = vunpack.c.l.s8.bf16 %v267_v42  ;;  %v486_v48 = vunpack.c.l.s8.bf16 %v266_v47 }
 0x18c   :  { %870 = vmatprep.subr.bf16.mxu1 %v451_v50  ;;  %v491_v50 = vunpack.c.h.s8.bf16 %v267_v42 }
 0x18d   :  { %1107 = vmatpush1.bf16.msra.mxu0 %v1038_v54  ;;  %v490_v54 = vunpack.c.h.s8.bf16 %v266_v47 }
 0x18e   :  { %1108 = vmatprep.subr.bf16.mxu0 %v1041_v56  ;;  %v270_v56 = vld [vmem:[#allocation5 + $0x310] sm:$0xff] }
 0x18f   :  { %871 = vmatpush1.bf16.msra.mxu1 %v450_v55  ;;  %v495_v55 = vunpack.c.l.s8.bf16 %v271_v53 }
 0x190   :  { %872 = vmatprep.subr.bf16.mxu1 %v455_v57  ;;  %v494_v57 = vunpack.c.l.s8.bf16 %v270_v56 }
 0x191   :  { %1109 = vmatpush1.bf16.msra.mxu0 %v1040_v60  ;;  %v498_v60 = vunpack.c.h.s8.bf16 %v270_v56 }
 0x192   :  { %1110 = vmatprep.subr.bf16.mxu0 %v1043_v62  ;;  %v274_v62 = vld [vmem:[#allocation5 + $0x330] sm:$0xff] }
 0x193   :  { %873 = vmatpush1.bf16.msra.mxu1 %v454_v61  ;;  %v503_v61 = vunpack.c.l.s8.bf16 %v275_v41  ;;  %v502_v63 = vunpack.c.l.s8.bf16 %v274_v62 }
 0x194   :  { %874 = vmatprep.subr.bf16.mxu1 %v459_v0  ;;  %v507_v0 = vunpack.c.h.s8.bf16 %v275_v41 }
 0x195   :  { %1111 = vmatpush1.bf16.msra.mxu0 %v1042_v3  ;;  %v506_v3 = vunpack.c.h.s8.bf16 %v274_v62  ;;  %v4202_v62 = vsub.s32 1, %v4117_v26 }
 0x196   :  { %1112 = vmatprep.subr.bf16.mxu0 %v1045_v5  ;;  %v278_v5 = vld [vmem:[#allocation5 + $0x350] sm:$0xff] }
 0x197   :  { %875 = vmatpush1.bf16.msra.mxu1 %v458_v4  ;;  %v511_v4 = vunpack.c.l.s8.bf16 %v279_v2 }
 0x198   :  { %876 = vmatprep.subr.bf16.mxu1 %v463_v6  ;;  %v510_v6 = vunpack.c.l.s8.bf16 %v278_v5 }
 0x199   :  { %1113 = vmatpush1.bf16.msra.mxu0 %v1044_v8  ;;  %v514_v8 = vunpack.c.h.s8.bf16 %v278_v5 }
 0x19a   :  { %1114 = vmatprep.subr.bf16.mxu0 %v1047_v10  ;;  %v282_v10 = vld [vmem:[#allocation5 + $0x370] sm:$0xff] }
 0x19b   :  { %877 = vmatpush1.bf16.msra.mxu1 %v462_v9  ;;  %v519_v9 = vunpack.c.l.s8.bf16 %v283_v35 }
 0x19c   :  { %878 = vmatprep.subr.bf16.mxu1 %v467_v12 }
 0x19d   :  { %1115 = vmatpush1.bf16.msra.mxu0 %v1046_v14 }
 0x19e   :  { %1116 = vmatprep.subr.bf16.mxu0 %v1049_v18  ;;  %v518_v18 = vunpack.c.l.s8.bf16 %v282_v10 }
 0x19f   :  { %879 = vmatpush1.bf16.msra.mxu1 %v466_v17 }
 0x1a0   :  { %880 = vmatprep.subr.bf16.mxu1 %v471_v19  ;;  %v1013_v19 = vld [vmem:[#allocation10 + $0x78] sm:$0xff] }
 0x1a1   :  { %1117 = vmatpush1.bf16.msra.mxu0 %v1048_v22  ;;  %v1059_v22 = vunpack.c.l.s8.bf16 %v1013_v19 }
 0x1a2   :  { %1118 = vmatprep.subr.bf16.mxu0 %v1051_v24  ;;  %v287_v24 = vld [vmem:[#allocation5 + $0x398] sm:$0xff] }
 0x1a3   :  { %881 = vmatpush1.bf16.msra.mxu1 %v470_v23  ;;  %v1012_v23 = vld [vmem:[#allocation10 + $0x70] sm:$0xff]  ;;  %v527_v28 = vunpack.c.l.s8.bf16 %v287_v24  ;;  %v531_v33 = vunpack.c.h.s8.bf16 %v287_v24 }
 0x1a4   :  { %882 = vmatprep.subr.bf16.mxu1 %v475_v27  ;;  %v1058_v25 = vunpack.c.l.s8.bf16 %v1012_v23  ;;  %v522_v27 = vunpack.c.h.s8.bf16 %v282_v10 }
 0x1a5   :  { %1119 = vmatpush1.bf16.msra.mxu0 %v1050_v29  ;;  %v286_v29 = vld [vmem:[#allocation5 + $0x390] sm:$0xff] }
 0x1a6   :  { %1120 = vmatprep.subr.bf16.mxu0 %v1053_v31  ;;  %v1060_v31 = vunpack.c.h.s8.bf16 %v1012_v23 }
 0x1a7   :  { %883 = vmatpush1.bf16.msra.mxu1 %v474_v30  ;;  %v1061_v30 = vunpack.c.h.s8.bf16 %v1013_v19 }
 0x1a8   :  { %884 = vmatprep.subr.bf16.mxu1 %v479_v32  ;;  %v526_v32 = vunpack.c.l.s8.bf16 %v286_v29 }
 0x1a9   :  { %1121 = vmatpush1.bf16.msra.mxu0 %v1052_v36  ;;  %v4194_v36 = vld [vmem:[#allocation10 + $0x88] sm:$0xff] }
 0x1aa   :  { %1122 = vmatprep.subr.bf16.mxu0 %v1055_v38  ;;  %v1063_v38 = vunpack.c.l.s8.bf16 %v4194_v36  ;;  %v1065_v24 = vunpack.c.h.s8.bf16 %v4194_v36 }
 0x1ab   :  { %885 = vmatpush1.bf16.msra.mxu1 %v478_v37  ;;  %v530_v37 = vunpack.c.h.s8.bf16 %v286_v29 }
 0x1ac   :  { %886 = vmatprep.subr.bf16.mxu1 %v483_v40  ;;  %v290_v40 = vld [vmem:[#allocation5 + $0x3b0] sm:$0xff] }
 0x1ad   :  { %1123 = vmatpush1.bf16.msra.mxu0 %v1054_v43  ;;  %v534_v42 = vunpack.c.l.s8.bf16 %v290_v40  ;;  %v539_v43 = vunpack.c.h.s8.bf16 %v291_v34  ;;  %v1018_v34 = vld [vmem:[#allocation10 + $0xa0] sm:$0xff] }
 0x1ae   :  { %1124 = vmatprep.subr.bf16.mxu0 %v1057_v11  ;;  %v1070_v36 = vunpack.c.l.s8.bf16 %v1018_v34 }
 0x1af   :  { %887 = vmatpush1.bf16.msra.mxu1 %v482_v45  ;;  %v295_v45 = vld [vmem:[#allocation5 + $0x3d8] sm:$0xff] }
 0x1b0   :  { %888 = vmatprep.subr.bf16.mxu1 %v487_v46  ;;  %v538_v46 = vunpack.c.h.s8.bf16 %v290_v40  ;;  %v543_v47 = vunpack.c.l.s8.bf16 %v295_v45  ;;  %v547_v53 = vunpack.c.h.s8.bf16 %v295_v45 }
 0x1b1   :  { %1125 = vmatpush1.bf16.msra.mxu0 %v1056_v13 }
 0x1b2   :  { %1126 = vmatprep.subr.bf16.mxu0 %v1059_v22 }
 0x1b3   :  { %889 = vmatpush1.bf16.msra.mxu1 %v486_v48  ;;  %v294_v48 = vld [vmem:[#allocation5 + $0x3d0] sm:$0xff] }
 0x1b4   :  { %890 = vmatprep.subr.bf16.mxu1 %v491_v50  ;;  %v542_v50 = vunpack.c.l.s8.bf16 %v294_v48 }
 0x1b5   :  { %1127 = vmatpush1.bf16.msra.mxu0 %v1058_v25  ;;  %v1017_v25 = vld [vmem:[#allocation10 + $0x98] sm:$0xff] }
 0x1b6   :  { %1128 = vmatprep.subr.bf16.mxu0 %v1061_v30  ;;  %v1069_v30 = vunpack.c.h.s8.bf16 %v1017_v25 }
 0x1b7   :  { %891 = vmatpush1.bf16.msra.mxu1 %v490_v54  ;;  %v299_v54 = vld [vmem:[#allocation5 + $0x3f8] sm:$0xff] }
 0x1b8   :  { %901 = vmatprep.subr.bf16.mxu1 %v495_v55  ;;  %v546_v55 = vunpack.c.h.s8.bf16 %v294_v48  ;;  %v551_v56 = vunpack.c.l.s8.bf16 %v299_v54  ;;  %v555_v41 = vunpack.c.h.s8.bf16 %v299_v54 }
 0x1b9   :  { %1129 = vmatpush1.bf16.msra.mxu0 %v1060_v31  ;;  %v1019_v31 = vld [vmem:[#allocation10 + $0xa8] sm:$0xff] }
 0x1ba   :  { %893 = vmatmul.mubr.bf16.vlgmr.msra.gmra.mrb[4].mxu1 %v4146_v15  ;;  %1139 = vmatprep.subr.bf16.mxu0 %v1063_v38  ;;  %v1021_v38 = vld [vmem:[#allocation10 + $0xb8] sm:$0xff] }
 0x1bb   :  { %902 = vmatpush1.bf16.msra.mxu1 %v494_v57  ;;  %933 = vmatprep.mubr.bf16.mxu1 %v4167_v44  ;;  %v298_v57 = vld [vmem:[#allocation5 + $0x3f0] sm:$0xff]  ;;  %v1075_v40 = vunpack.c.l.s8.bf16 %v1021_v38  ;;  %v1077_v45 = vunpack.c.h.s8.bf16 %v1021_v38 }
 0x1bc   :  { %903 = vmatprep.subr.bf16.mxu1 %v499_v58  ;;  %v550_v58 = vunpack.c.l.s8.bf16 %v298_v57 }
 0x1bf   :  { %904 = vmatpush1.bf16.msra.mxu1 %v498_v60  ;;  %v554_v60 = vunpack.c.h.s8.bf16 %v298_v57 }
 0x1c0   :  { %905 = vmatprep.subr.bf16.mxu1 %v503_v61  ;;  %v4199_v61 = vsub.s32 0, %v4117_v26 }
 0x1c3   :  { %906 = vmatpush1.bf16.msra.mxu1 %v502_v63  ;;  %v4204_v63 = vld [vmem:[#allocation7] sm:$0xf] }
 0x1c4   :  { %907 = vmatprep.subr.bf16.mxu1 %v507_v0  ;;  %v4206_v0 = vld [vmem:[#allocation8] sm:$0xf]  ;;  %v947_v2 = vrot.slane %v4204_v63, %v4199_v61 }
 0x1c7   :  { %908 = vmatpush1.bf16.msra.mxu1 %v506_v3 }
 0x1c8   :  { %909 = vmatprep.subr.bf16.mxu1 %v511_v4  ;;  %v951_v4 = vrot.slane %v4204_v63, %v4202_v62 }
 0x1cb   :  { %910 = vmatpush1.bf16.msra.mxu1 %v510_v6  ;;  %v973_v6 = vrot.slane %v4206_v0, %v4199_v61 }
 0x1cc   :  { %911 = vmatprep.subr.bf16.mxu1 %v515_v7 }
 0x1cd   :  { %v4189_v12 = vpop.f32.mrb[0].mxu1 }
 0x1ce   :  { %v4192_v14 = vpop.f32.mrb[1].mxu1 }
 0x1cf   :  { %v652_v17 = vpop.f32.mrb[2].mxu1  ;;  %912 = vmatpush1.bf16.msra.mxu1 %v514_v8  ;;  %v977_v8 = vrot.slane %v4206_v0, %v4202_v62 }
 0x1d0   :  { %v653_v20 = vpop.f32.mrb[3].mxu1  ;;  %913 = vmatprep.subr.bf16.mxu1 %v519_v9 }
 0x1d1   :  { %v1014_v20 = vld [vmem:[#allocation10 + $0x80] sm:$0xff] }
 0x1d3   :  { %914 = vmatpush1.bf16.msra.mxu1 %v518_v18 }
 0x1d4   :  { %915 = vmatprep.subr.bf16.mxu1 %v523_v21 }
 0x1d7   :  { %916 = vmatpush1.bf16.msra.mxu1 %v522_v27  ;;  %v1067_v27 = vunpack.c.l.s8.bf16 %v1017_v25  ;;  %v1215_v25 = vld [vmem:[#allocation14 + $0x28] sm:$0xff] }
 0x1d8   :  { %917 = vmatprep.subr.bf16.mxu1 %v527_v28  ;;  %v1016_v28 = vld [vmem:[#allocation10 + $0x90] sm:$0xff] }
 0x1d9   :  { %v1066_v29 = vunpack.c.l.s8.bf16 %v1016_v28 }
 0x1db   :  { %918 = vmatpush1.bf16.msra.mxu1 %v526_v32  ;;  %v1068_v32 = vunpack.c.h.s8.bf16 %v1016_v28 }
 0x1dc   :  { %919 = vmatprep.subr.bf16.mxu1 %v531_v33  ;;  %v1071_v33 = vunpack.c.l.s8.bf16 %v1019_v31 }
 0x1df   :  { %920 = vmatpush1.bf16.msra.mxu1 %v530_v37  ;;  %v1073_v37 = vunpack.c.h.s8.bf16 %v1019_v31  ;;  %v4223_v31 = vsub.s32 2, %v4117_v26 }
 0x1e0   :  { %921 = vmatprep.subr.bf16.mxu1 %v535_v39  ;;  %v1072_v39 = vunpack.c.h.s8.bf16 %v1018_v34  ;;  %v1212_v34 = vld [vmem:[#allocation14 + $0x10] sm:$0xff] }
 0x1e1   :  { %v1222_v38 = vunpack.c.l.s8.bf16 %v1212_v34 }
 0x1e3   :  { %922 = vmatpush1.bf16.msra.mxu1 %v534_v42  ;;  %v1020_v42 = vld [vmem:[#allocation10 + $0xb0] sm:$0xff] }
 0x1e4   :  { %923 = vmatprep.subr.bf16.mxu1 %v539_v43  ;;  %v1074_v43 = vunpack.c.l.s8.bf16 %v1020_v42 }
 0x1e7   :  { %924 = vmatpush1.bf16.msra.mxu1 %v538_v46  ;;  %v1023_v46 = vld [vmem:[#allocation10 + $0xc8] sm:$0xff] }
 0x1e8   :  { %925 = vmatprep.subr.bf16.mxu1 %v543_v47  ;;  %v1076_v47 = vunpack.c.h.s8.bf16 %v1020_v42  ;;  %v1079_v48 = vunpack.c.l.s8.bf16 %v1023_v46  ;;  %v1081_v54 = vunpack.c.h.s8.bf16 %v1023_v46 }
 0x1eb   :  { %926 = vmatpush1.bf16.msra.mxu1 %v542_v50  ;;  %v1022_v50 = vld [vmem:[#allocation10 + $0xc0] sm:$0xff] }
 0x1ec   :  { %927 = vmatprep.subr.bf16.mxu1 %v547_v53  ;;  %v1078_v53 = vunpack.c.l.s8.bf16 %v1022_v50 }
 0x1ef   :  { %928 = vmatpush1.bf16.msra.mxu1 %v546_v55  ;;  %v1025_v55 = vld [vmem:[#allocation10 + $0xd8] sm:$0xff] }
 0x1f0   :  { %929 = vmatprep.subr.bf16.mxu1 %v551_v56  ;;  %v1080_v56 = vunpack.c.h.s8.bf16 %v1022_v50  ;;  %v1083_v57 = vunpack.c.l.s8.bf16 %v1025_v55 }
 0x1f3   :  { %930 = vmatpush1.bf16.msra.mxu1 %v550_v58  ;;  %v1024_v58 = vld [vmem:[#allocation10 + $0xd0] sm:$0xff] }
 0x1f4   :  { %931 = vmatprep.subr.bf16.mxu1 %v555_v41  ;;  %v1082_v41 = vunpack.c.l.s8.bf16 %v1024_v58 }
 0x1f7   :  { %932 = vmatpush1.bf16.msra.mxu1 %v554_v60  ;;  %v1085_v60 = vunpack.c.h.s8.bf16 %v1025_v55 }
 0x1fa   :  { %934 = vmatmul.mubr.bf16.vlgmr.msra.gmra.mrb[4].mxu1 %v4175_v16 }
 0x24e   :  { %v771_v3 = vpop.f32.mrb[0].mxu0 }
 0x24f   :  { %v3533_v5 = vadd.f32 %v771_v3, %v4189_v12  ;;  %v773_v7 = vpop.f32.mrb[1].mxu0  ;;  %v1062_v12 = vunpack.c.l.s8.bf16 %v1014_v20  ;;  %v1084_v3 = vunpack.c.h.s8.bf16 %v1024_v58 }
 0x250   :  { %v3534_v35 = vadd.f32 %v773_v7, %v4192_v14  ;;  %v775_v9 = vpop.f32.mrb[2].mxu0  ;;  %v1064_v14 = vunpack.c.h.s8.bf16 %v1014_v20  ;;  %v1214_v20 = vld [vmem:[#allocation14 + $0x20] sm:$0xff] }
 0x251   :  { %v964_v10 = vmul.f32 %v3533_v5, %v947_v2  ;;  %v776_v11 = vpop.f32.mrb[3].mxu0  ;;  %v1027_v2 = vld [vmem:[#allocation10 + $0xe8] sm:$0xff]  ;;  %v1026_v5 = vld [vmem:[#allocation10 + $0xe0] sm:$0xff] }
 0x252   :  { %v965_v13 = vmul.f32 %v3534_v35, %v951_v4  ;;  %v1087_v4 = vunpack.c.l.s8.bf16 %v1027_v2  ;;  %v1089_v7 = vunpack.c.h.s8.bf16 %v1027_v2  ;;  %v1029_v35 = vld [vmem:[#allocation10 + $0xf8] sm:$0xff]  ;;  %v1301_v2 = vld [vmem:[#allocation5 + $0x438] sm:$0xff] }
 0x253   :  { %v990_v17 = vadd.f32 %v973_v6, %v964_v10  ;;  %v1086_v6 = vunpack.c.l.s8.bf16 %v1026_v5  ;;  %v1091_v9 = vunpack.c.l.s8.bf16 %v1029_v35  ;;  %v1028_v10 = vld [vmem:[#allocation10 + $0xf0] sm:$0xff] }
 0x254   :  { %v991_v18 = vadd.f32 %v977_v8, %v965_v13  ;;  %v1088_v8 = vunpack.c.h.s8.bf16 %v1026_v5  ;;  %v1090_v11 = vunpack.c.l.s8.bf16 %v1028_v10  ;;  %v1093_v13 = vunpack.c.h.s8.bf16 %v1029_v35  ;;  %v1300_v5 = vld [vmem:[#allocation5 + $0x430] sm:$0xff]  ;;  %v1305_v35 = vld [vmem:[#allocation5 + $0x458] sm:$0xff] }
 0x255   :  { %v994_v19 = vmax.f32 %v990_v17, 0.0  ;;  %v4219_v17 = vld [vmem:[#allocation5 + $0x418] sm:$0xff] }
 0x256   :  { %v995_v21 = vmax.f32 %v991_v18, 0.0  ;;  %v1092_v18 = vunpack.c.h.s8.bf16 %v1028_v10  ;;  %v1304_v10 = vld [vmem:[#allocation5 + $0x450] sm:$0xff] }
 0x257   :  { %v1094_v23 = vpack.c.bf16 %v994_v19, %v994_v19  ;;  %v1425_v19 = vunpack.c.l.s8.bf16 %v4219_v17 }
 0x258   :  { %v1095_v22 = vpack.c.bf16 %v995_v21, %v995_v21  ;;  %v1210_v21 = vld [vmem:[#allocation14] sm:$0xff] }
 0x25a   :  { %1130 = vmatprep.mubr.bf16.mxu0 %v1095_v22  ;;  %v1226_v22 = vunpack.c.l.s8.bf16 %v1214_v20 }
 0x25b   :  { %1131 = vmatmul.mubr.bf16.vlgmr.msra.gmra.mrb[4].mxu0 %v1094_v23  ;;  %v1227_v23 = vunpack.c.h.s8.bf16 %v1214_v20  ;;  %v1308_v20 = vld [vmem:[#allocation5 + $0x470] sm:$0xff] }
 0x25c   :  { %1140 = vmatpush1.bf16.msra.mxu0 %v1062_v12  ;;  %v1218_v12 = vunpack.c.l.s8.bf16 %v1210_v21  ;;  %3467 = vmatprep.subr.bf16.mxu1 %v1226_v22 }
 0x25d   :  { %1141 = vmatprep.subr.bf16.mxu0 %v1065_v24  ;;  %v1219_v24 = vunpack.c.h.s8.bf16 %v1210_v21  ;;  %v1448_v21 = vunpack.c.l.s8.bf16 %v1308_v20 }
 0x25e   :  { %3468 = vmatpush3.bf16.msra.mxu1 %v1218_v12  ;;  %v1313_v12 = vld [vmem:[#allocation5 + $0x498] sm:$0xff] }
 0x25f   :  { %3469 = vmatprep.subr.bf16.mxu1 %v1227_v23  ;;  %v1452_v23 = vunpack.c.h.s8.bf16 %v1308_v20 }
 0x260   :  { %1142 = vmatpush1.bf16.msra.mxu0 %v1064_v14  ;;  %v1211_v14 = vld [vmem:[#allocation14 + $0x8] sm:$0xff] }
 0x261   :  { %1143 = vmatprep.subr.bf16.mxu0 %v1067_v27  ;;  %v1228_v27 = vunpack.c.l.s8.bf16 %v1215_v25  ;;  %v1220_v28 = vunpack.c.l.s8.bf16 %v1211_v14 }
 0x262   :  { %3470 = vmatpush3.bf16.msra.mxu1 %v1219_v24  ;;  %v1457_v24 = vunpack.c.l.s8.bf16 %v1313_v12 }
 0x263   :  { %3471 = vmatprep.subr.bf16.mxu1 %v1228_v27  ;;  %v1461_v27 = vunpack.c.h.s8.bf16 %v1313_v12  ;;  %v1345_v12 = vld [vmem:[#allocation5 + $0x598] sm:$0xff] }
 0x264   :  { %1144 = vmatpush1.bf16.msra.mxu0 %v1066_v29  ;;  %v1229_v29 = vunpack.c.h.s8.bf16 %v1215_v25  ;;  %v1312_v25 = vld [vmem:[#allocation5 + $0x490] sm:$0xff] }
 0x265   :  { %1145 = vmatprep.subr.bf16.mxu0 %v1069_v30  ;;  %v1221_v30 = vunpack.c.h.s8.bf16 %v1211_v14  ;;  %v1456_v14 = vunpack.c.l.s8.bf16 %v1312_v25 }
 0x266   :  { %3472 = vmatpush3.bf16.msra.mxu1 %v1220_v28  ;;  %v1317_v28 = vld [vmem:[#allocation5 + $0x4b8] sm:$0xff] }
 0x267   :  { %3473 = vmatprep.subr.bf16.mxu1 %v1229_v29  ;;  %v1460_v29 = vunpack.c.h.s8.bf16 %v1312_v25 }
 0x268   :  { %1146 = vmatpush1.bf16.msra.mxu0 %v1068_v32  ;;  %v4226_v32 = vsub.s32 3, %v4117_v26 }
 0x269   :  { %1147 = vmatprep.subr.bf16.mxu0 %v1071_v33  ;;  %v1216_v33 = vld [vmem:[#allocation14 + $0x30] sm:$0xff] }
 0x26a   :  { %3474 = vmatpush3.bf16.msra.mxu1 %v1221_v30  ;;  %v985_v26 = vrot.slane %v4206_v0, %v4226_v32  ;;  %v1465_v30 = vunpack.c.l.s8.bf16 %v1317_v28 }
 0x26c   :  { %1148 = vmatpush1.bf16.msra.mxu0 %v1070_v36  ;;  %v955_v36 = vrot.slane %v4204_v63, %v4223_v31 }
 0x26d   :  { %1149 = vmatprep.subr.bf16.mxu0 %v1073_v37  ;;  %v1230_v37 = vunpack.c.l.s8.bf16 %v1216_v33 }
 0x26f   :  { %3475 = vmatprep.subr.bf16.mxu1 %v1230_v37  ;;  %v1321_v37 = vld [vmem:[#allocation5 + $0x4d8] sm:$0xff] }
 0x270   :  { %1150 = vmatpush1.bf16.msra.mxu0 %v1072_v39  ;;  %v959_v39 = vrot.slane %v4204_v63, %v4226_v32  ;;  %3476 = vmatpush3.bf16.msra.mxu1 %v1222_v38 }
 0x271   :  { %1151 = vmatprep.subr.bf16.mxu0 %v1075_v40  ;;  %v981_v40 = vrot.slane %v4206_v0, %v4223_v31  ;;  %v1429_v0 = vunpack.c.h.s8.bf16 %v4219_v17  ;;  %v1309_v17 = vld [vmem:[#allocation5 + $0x478] sm:$0xff] }
 0x272   :  { %v1453_v22 = vunpack.c.h.s8.bf16 %v1309_v17 }
 0x274   :  { %1152 = vmatpush1.bf16.msra.mxu0 %v1074_v43  ;;  %v1231_v43 = vunpack.c.h.s8.bf16 %v1216_v33  ;;  %v1316_v33 = vld [vmem:[#allocation5 + $0x4b0] sm:$0xff] }
 0x275   :  { %1153 = vmatprep.subr.bf16.mxu0 %v1077_v45  ;;  %v1223_v45 = vunpack.c.h.s8.bf16 %v1212_v34  ;;  %v1464_v34 = vunpack.c.l.s8.bf16 %v1316_v33  ;;  %v1468_v38 = vunpack.c.h.s8.bf16 %v1316_v33  ;;  %v1525_v33 = vunpack.c.h.s8.bf16 %v1345_v12 }
 0x276   :  { %3477 = vmatprep.subr.bf16.mxu1 %v1231_v43  ;;  %v1325_v43 = vld [vmem:[#allocation5 + $0x4f8] sm:$0xff] }
 0x277   :  { %3478 = vmatpush3.bf16.msra.mxu1 %v1223_v45 }
 0x278   :  { %1154 = vmatpush1.bf16.msra.mxu0 %v1076_v47 }
 0x279   :  { %1155 = vmatprep.subr.bf16.mxu0 %v1079_v48 }
 0x27c   :  { %1156 = vmatpush1.bf16.msra.mxu0 %v1078_v53 }
 0x27d   :  { %1157 = vmatprep.subr.bf16.mxu0 %v1081_v54 }
 0x280   :  { %1158 = vmatpush1.bf16.msra.mxu0 %v1080_v56  ;;  %v1296_v56 = vld [vmem:[#allocation5 + $0x410] sm:$0xff] }
 0x281   :  { %1159 = vmatprep.subr.bf16.mxu0 %v1083_v57 }
 0x284   :  { %1160 = vmatpush1.bf16.msra.mxu0 %v1082_v41  ;;  %v1424_v41 = vunpack.c.l.s8.bf16 %v1296_v56 }
 0x285   :  { %1161 = vmatprep.subr.bf16.mxu0 %v1085_v60 }
 0x288   :  { %1162 = vmatpush1.bf16.msra.mxu0 %v1084_v3  ;;  %v1428_v3 = vunpack.c.h.s8.bf16 %v1296_v56 }
 0x289   :  { %1163 = vmatprep.subr.bf16.mxu0 %v1087_v4  ;;  %v1433_v4 = vunpack.c.l.s8.bf16 %v1301_v2 }
 0x28c   :  { %1164 = vmatpush1.bf16.msra.mxu0 %v1086_v6  ;;  %v1432_v6 = vunpack.c.l.s8.bf16 %v1300_v5 }
 0x28d   :  { %1165 = vmatprep.subr.bf16.mxu0 %v1089_v7  ;;  %v1437_v7 = vunpack.c.h.s8.bf16 %v1301_v2 }
 0x290   :  { %1166 = vmatpush1.bf16.msra.mxu0 %v1088_v8  ;;  %v1436_v8 = vunpack.c.h.s8.bf16 %v1300_v5 }
 0x291   :  { %1167 = vmatprep.subr.bf16.mxu0 %v1091_v9  ;;  %v1441_v9 = vunpack.c.l.s8.bf16 %v1305_v35 }
 0x294   :  { %1168 = vmatpush1.bf16.msra.mxu0 %v1090_v11  ;;  %v1440_v11 = vunpack.c.l.s8.bf16 %v1304_v10 }
 0x295   :  { %1169 = vmatprep.subr.bf16.mxu0 %v1093_v13  ;;  %v1445_v13 = vunpack.c.h.s8.bf16 %v1305_v35 }
 0x298   :  { %1170 = vmatpush1.bf16.msra.mxu0 %v1092_v18  ;;  %v1444_v18 = vunpack.c.h.s8.bf16 %v1304_v10 }
 0x299   :  { %1842 = vmatprep.subr.bf16.mxu0 %v1425_v19  ;;  %v1449_v19 = vunpack.c.l.s8.bf16 %v1309_v17  ;;  %v1217_v17 = vld [vmem:[#allocation14 + $0x38] sm:$0xff] }
 0x2cd   :  { %v935_v42 = vpop.f32.mrb[4].mxu1 }
 0x2ce   :  { %v966_v46 = vmul.f32 %v955_v36, %v935_v42  ;;  %v937_v47 = vpop.f32.mrb[5].mxu1  ;;  %v1469_v36 = vunpack.c.h.s8.bf16 %v1317_v28  ;;  %v4240_v28 = vld [vmem:[#allocation5 + $0x408] sm:$0xff] }
 0x2cf   :  { %v967_v48 = vmul.f32 %v959_v39, %v937_v47  ;;  %v939_v50 = vpop.f32.mrb[6].mxu1  ;;  %v1473_v39 = vunpack.c.l.s8.bf16 %v1321_v37  ;;  %v1324_v47 = vld [vmem:[#allocation5 + $0x4f0] sm:$0xff] }
 0x2d0   :  { %v992_v53 = vadd.f32 %v981_v40, %v966_v46  ;;  %v940_v54 = vpop.f32.mrb[7].mxu1  ;;  %v1320_v40 = vld [vmem:[#allocation5 + $0x4d0] sm:$0xff]  ;;  %v1481_v46 = vunpack.c.l.s8.bf16 %v1325_v43  ;;  %v1485_v50 = vunpack.c.h.s8.bf16 %v1325_v43 }
 0x2d1   :  { %v993_v55 = vadd.f32 %v985_v26, %v967_v48  ;;  %v1472_v42 = vunpack.c.l.s8.bf16 %v1320_v40  ;;  %v1477_v26 = vunpack.c.h.s8.bf16 %v1321_v37  ;;  %v1476_v45 = vunpack.c.h.s8.bf16 %v1320_v40 }
 0x2d2   :  { %v996_v63 = vmax.f32 %v992_v53, 0.0  ;;  %v1480_v48 = vunpack.c.l.s8.bf16 %v1324_v47  ;;  %v1329_v53 = vld [vmem:[#allocation5 + $0x518] sm:$0xff]  ;;  %v1484_v54 = vunpack.c.h.s8.bf16 %v1324_v47 }
 0x2d3   :  { %v997_v57 = vmax.f32 %v993_v55, 0.0  ;;  %v1489_v55 = vunpack.c.l.s8.bf16 %v1329_v53 }
 0x2d4   :  { %v1096_v60 = vpack.c.bf16 %v996_v63, %v996_v63  ;;  %v1328_v63 = vld [vmem:[#allocation5 + $0x510] sm:$0xff] }
 0x2d5   :  { %v1097_v58 = vpack.c.bf16 %v997_v57, %v997_v57  ;;  %v1488_v56 = vunpack.c.l.s8.bf16 %v1328_v63  ;;  %v1493_v57 = vunpack.c.h.s8.bf16 %v1329_v53 }
 0x2d7   :  { %1171 = vmatprep.mubr.bf16.mxu0 %v1097_v58  ;;  %v1333_v58 = vld [vmem:[#allocation5 + $0x538] sm:$0xff] }
 0x2d8   :  { %1172 = vmatmul.mubr.bf16.vlgmr.msra.gmra.mrb[4].mxu0 %v1096_v60  ;;  %v1497_v60 = vunpack.c.l.s8.bf16 %v1333_v58 }
 0x2d9   :  { %1843 = vmatpush1.bf16.msra.mxu0 %v1424_v41  ;;  %1874 = vmatprep.mubr.bf16.mxu0 %v4131_v51  ;;  %v1492_v41 = vunpack.c.h.s8.bf16 %v1328_v63 }
 0x2da   :  { %1844 = vmatprep.subr.bf16.mxu0 %v1429_v0  ;;  %v1332_v0 = vld [vmem:[#allocation5 + $0x530] sm:$0xff] }
 0x2db   :  { %v1496_v2 = vunpack.c.l.s8.bf16 %v1332_v0  ;;  %v1500_v5 = vunpack.c.h.s8.bf16 %v1332_v0 }
 0x2dd   :  { %1845 = vmatpush1.bf16.msra.mxu0 %v1428_v3  ;;  %v1501_v3 = vunpack.c.h.s8.bf16 %v1333_v58 }
 0x2de   :  { %1846 = vmatprep.subr.bf16.mxu0 %v1433_v4  ;;  %v1337_v4 = vld [vmem:[#allocation5 + $0x558] sm:$0xff] }
 0x2e1   :  { %1847 = vmatpush1.bf16.msra.mxu0 %v1432_v6  ;;  %v1505_v6 = vunpack.c.l.s8.bf16 %v1337_v4 }
 0x2e2   :  { %1848 = vmatprep.subr.bf16.mxu0 %v1437_v7  ;;  %v1336_v7 = vld [vmem:[#allocation5 + $0x550] sm:$0xff] }
 0x2e3   :  { %v1504_v35 = vunpack.c.l.s8.bf16 %v1336_v7  ;;  %v1508_v10 = vunpack.c.h.s8.bf16 %v1336_v7 }
 0x2e5   :  { %1849 = vmatpush1.bf16.msra.mxu0 %v1436_v8  ;;  %v1509_v8 = vunpack.c.h.s8.bf16 %v1337_v4 }
 0x2e6   :  { %1850 = vmatprep.subr.bf16.mxu0 %v1441_v9  ;;  %v1341_v9 = vld [vmem:[#allocation5 + $0x578] sm:$0xff] }
 0x2e9   :  { %1851 = vmatpush1.bf16.msra.mxu0 %v1440_v11  ;;  %v1513_v11 = vunpack.c.l.s8.bf16 %v1341_v9 }
 0x2ea   :  { %1852 = vmatprep.subr.bf16.mxu0 %v1445_v13  ;;  %v1340_v13 = vld [vmem:[#allocation5 + $0x570] sm:$0xff] }
 0x2eb   :  { %v1516_v25 = vunpack.c.h.s8.bf16 %v1340_v13 }
 0x2ed   :  { %1853 = vmatpush1.bf16.msra.mxu0 %v1444_v18  ;;  %v1232_v18 = vunpack.c.l.s8.bf16 %v1217_v17 }
 0x2ee   :  { %1854 = vmatprep.subr.bf16.mxu0 %v1449_v19  ;;  %v1213_v19 = vld [vmem:[#allocation14 + $0x18] sm:$0xff] }
 0x2ef   :  { %v1224_v20 = vunpack.c.l.s8.bf16 %v1213_v19  ;;  %3479 = vmatprep.subr.bf16.mxu1 %v1232_v18 }
 0x2f1   :  { %1855 = vmatpush1.bf16.msra.mxu0 %v1448_v21  ;;  %v1512_v21 = vunpack.c.l.s8.bf16 %v1340_v13  ;;  %3480 = vmatpush3.bf16.msra.mxu1 %v1224_v20  ;;  %v1372_v20 = vld [vmem:[#allocation5 + $0x670] sm:$0xff] }
 0x2f2   :  { %1856 = vmatprep.subr.bf16.mxu0 %v1453_v22  ;;  %v1517_v22 = vunpack.c.h.s8.bf16 %v1341_v9 }
 0x2f5   :  { %1857 = vmatpush1.bf16.msra.mxu0 %v1452_v23  ;;  %v1233_v23 = vunpack.c.h.s8.bf16 %v1217_v17  ;;  %v1373_v17 = vld [vmem:[#allocation5 + $0x678] sm:$0xff] }
 0x2f6   :  { %1858 = vmatprep.subr.bf16.mxu0 %v1457_v24  ;;  %v1225_v24 = vunpack.c.h.s8.bf16 %v1213_v19  ;;  %v1577_v19 = vunpack.c.l.s8.bf16 %v1373_v17 }
 0x2f7   :  { %3481 = vmatprep.subr.bf16.mxu1 %v1233_v23  ;;  %v1580_v23 = vunpack.c.h.s8.bf16 %v1372_v20 }
 0x2f8   :  { %3482 = vmatpush3.bf16.msra.mxu1 %v1225_v24 }
 0x2f9   :  { %1859 = vmatpush1.bf16.msra.mxu0 %v1456_v14  ;;  %v1521_v14 = vunpack.c.l.s8.bf16 %v1345_v12  ;;  %v1377_v12 = vld [vmem:[#allocation5 + $0x698] sm:$0xff] }
 0x2fa   :  { %1860 = vmatprep.subr.bf16.mxu0 %v1461_v27  ;;  %v1344_v27 = vld [vmem:[#allocation5 + $0x590] sm:$0xff]  ;;  %v1585_v24 = vunpack.c.l.s8.bf16 %v1377_v12 }
 0x2fd   :  { %1861 = vmatpush1.bf16.msra.mxu0 %v1460_v29  ;;  %v1423_v29 = vunpack.c.l.s8.bf16 %v4240_v28 }
 0x2fe   :  { %1862 = vmatprep.subr.bf16.mxu0 %v1465_v30  ;;  %v1520_v30 = vunpack.c.l.s8.bf16 %v1344_v27 }
 0x2ff   :  { %1678 = vmatprep.subr.bf16.mxu1 %v1423_v29  ;;  %v1381_v29 = vld [vmem:[#allocation5 + $0x6b8] sm:$0xff] }
 0x301   :  { %1863 = vmatpush1.bf16.msra.mxu0 %v1464_v34  ;;  %v1349_v34 = vld [vmem:[#allocation5 + $0x5b8] sm:$0xff] }
 0x302   :  { %1864 = vmatprep.subr.bf16.mxu0 %v1469_v36  ;;  %v1524_v36 = vunpack.c.h.s8.bf16 %v1344_v27  ;;  %v1529_v37 = vunpack.c.l.s8.bf16 %v1349_v34  ;;  %v1533_v40 = vunpack.c.h.s8.bf16 %v1349_v34  ;;  %v1589_v27 = vunpack.c.h.s8.bf16 %v1377_v12  ;;  %v1380_v34 = vld [vmem:[#allocation5 + $0x6b0] sm:$0xff] }
 0x305   :  { %1865 = vmatpush1.bf16.msra.mxu0 %v1468_v38  ;;  %v1348_v38 = vld [vmem:[#allocation5 + $0x5b0] sm:$0xff] }
 0x306   :  { %1866 = vmatprep.subr.bf16.mxu0 %v1473_v39  ;;  %v1528_v39 = vunpack.c.l.s8.bf16 %v1348_v38 }
 0x309   :  { %1867 = vmatpush1.bf16.msra.mxu0 %v1472_v42  ;;  %v1353_v42 = vld [vmem:[#allocation5 + $0x5d8] sm:$0xff] }
 0x30a   :  { %1868 = vmatprep.subr.bf16.mxu0 %v1477_v26  ;;  %v1532_v26 = vunpack.c.h.s8.bf16 %v1348_v38  ;;  %v1537_v43 = vunpack.c.l.s8.bf16 %v1353_v42  ;;  %v1541_v47 = vunpack.c.h.s8.bf16 %v1353_v42  ;;  %v1385_v38 = vld [vmem:[#allocation5 + $0x6d8] sm:$0xff]  ;;  %v1384_v42 = vld [vmem:[#allocation5 + $0x6d0] sm:$0xff] }
 0x30d   :  { %1869 = vmatpush1.bf16.msra.mxu0 %v1476_v45  ;;  %v1352_v45 = vld [vmem:[#allocation5 + $0x5d0] sm:$0xff] }
 0x30e   :  { %1870 = vmatprep.subr.bf16.mxu0 %v1481_v46  ;;  %v1536_v46 = vunpack.c.l.s8.bf16 %v1352_v45 }
 0x311   :  { %1871 = vmatpush1.bf16.msra.mxu0 %v1480_v48  ;;  %v1357_v48 = vld [vmem:[#allocation5 + $0x5f8] sm:$0xff] }
 0x312   :  { %1872 = vmatprep.subr.bf16.mxu0 %v1485_v50  ;;  %v1540_v50 = vunpack.c.h.s8.bf16 %v1352_v45  ;;  %v1545_v53 = vunpack.c.l.s8.bf16 %v1357_v48  ;;  %v1549_v63 = vunpack.c.h.s8.bf16 %v1357_v48  ;;  %v1389_v45 = vld [vmem:[#allocation5 + $0x6f8] sm:$0xff]  ;;  %v1388_v48 = vld [vmem:[#allocation5 + $0x6f0] sm:$0xff] }
 0x315   :  { %1873 = vmatpush1.bf16.msra.mxu0 %v1484_v54  ;;  %v1356_v54 = vld [vmem:[#allocation5 + $0x5f0] sm:$0xff] }
 0x316   :  { %1883 = vmatprep.subr.bf16.mxu0 %v1489_v55  ;;  %v1544_v55 = vunpack.c.l.s8.bf16 %v1356_v54 }
 0x318   :  { %1875 = vmatmul.mubr.bf16.vlgmr.msra.gmra.mrb[8].mxu0 %v4150_v49 }
 0x319   :  { %1884 = vmatpush1.bf16.msra.mxu0 %v1488_v56  ;;  %1915 = vmatprep.mubr.bf16.mxu0 %v4136_v52  ;;  %v1361_v56 = vld [vmem:[#allocation5 + $0x618] sm:$0xff] }
 0x31a   :  { %1885 = vmatprep.subr.bf16.mxu0 %v1493_v57  ;;  %v1548_v57 = vunpack.c.h.s8.bf16 %v1356_v54  ;;  %v1553_v58 = vunpack.c.l.s8.bf16 %v1361_v56  ;;  %v1557_v0 = vunpack.c.h.s8.bf16 %v1361_v56  ;;  %v1393_v54 = vld [vmem:[#allocation5 + $0x718] sm:$0xff]  ;;  %v1392_v56 = vld [vmem:[#allocation5 + $0x710] sm:$0xff] }
 0x31d   :  { %1886 = vmatpush1.bf16.msra.mxu0 %v1492_v41  ;;  %v1360_v41 = vld [vmem:[#allocation5 + $0x610] sm:$0xff] }
 0x31e   :  { %1887 = vmatprep.subr.bf16.mxu0 %v1497_v60  ;;  %v1552_v60 = vunpack.c.l.s8.bf16 %v1360_v41 }
 0x321   :  { %1888 = vmatpush1.bf16.msra.mxu0 %v1496_v2  ;;  %v1365_v2 = vld [vmem:[#allocation5 + $0x638] sm:$0xff] }
 0x322   :  { %1889 = vmatprep.subr.bf16.mxu0 %v1501_v3  ;;  %v1556_v3 = vunpack.c.h.s8.bf16 %v1360_v41  ;;  %v1561_v4 = vunpack.c.l.s8.bf16 %v1365_v2  ;;  %v1565_v7 = vunpack.c.h.s8.bf16 %v1365_v2  ;;  %v1397_v41 = vld [vmem:[#allocation5 + $0x738] sm:$0xff]  ;;  %v1396_v2 = vld [vmem:[#allocation5 + $0x730] sm:$0xff] }
 0x325   :  { %1890 = vmatpush1.bf16.msra.mxu0 %v1500_v5  ;;  %v1364_v5 = vld [vmem:[#allocation5 + $0x630] sm:$0xff] }
 0x326   :  { %1891 = vmatprep.subr.bf16.mxu0 %v1505_v6  ;;  %v1560_v6 = vunpack.c.l.s8.bf16 %v1364_v5 }
 0x329   :  { %1892 = vmatpush1.bf16.msra.mxu0 %v1504_v35  ;;  %v1369_v35 = vld [vmem:[#allocation5 + $0x658] sm:$0xff] }
 0x32a   :  { %1893 = vmatprep.subr.bf16.mxu0 %v1509_v8  ;;  %v1564_v8 = vunpack.c.h.s8.bf16 %v1364_v5  ;;  %v1569_v9 = vunpack.c.l.s8.bf16 %v1369_v35  ;;  %v1573_v13 = vunpack.c.h.s8.bf16 %v1369_v35  ;;  %v1401_v5 = vld [vmem:[#allocation5 + $0x758] sm:$0xff]  ;;  %v1400_v35 = vld [vmem:[#allocation5 + $0x750] sm:$0xff] }
 0x32d   :  { %1894 = vmatpush1.bf16.msra.mxu0 %v1508_v10  ;;  %v1368_v10 = vld [vmem:[#allocation5 + $0x650] sm:$0xff] }
 0x32e   :  { %1895 = vmatprep.subr.bf16.mxu0 %v1513_v11  ;;  %v1568_v11 = vunpack.c.l.s8.bf16 %v1368_v10  ;;  %v1572_v18 = vunpack.c.h.s8.bf16 %v1368_v10  ;;  %v1637_v10 = vunpack.c.h.s8.bf16 %v1401_v5 }
 0x331   :  { %1896 = vmatpush1.bf16.msra.mxu0 %v1512_v21  ;;  %v1576_v21 = vunpack.c.l.s8.bf16 %v1372_v20 }
 0x332   :  { %1897 = vmatprep.subr.bf16.mxu0 %v1517_v22  ;;  %v1581_v22 = vunpack.c.h.s8.bf16 %v1373_v17 }
 0x335   :  { %1898 = vmatpush1.bf16.msra.mxu0 %v1516_v25  ;;  %v1376_v25 = vld [vmem:[#allocation5 + $0x690] sm:$0xff] }
 0x336   :  { %1899 = vmatprep.subr.bf16.mxu0 %v1521_v14  ;;  %v1584_v14 = vunpack.c.l.s8.bf16 %v1376_v25 }
 0x339   :  { %1900 = vmatpush1.bf16.msra.mxu0 %v1520_v30  ;;  %v1588_v30 = vunpack.c.h.s8.bf16 %v1376_v25 }
 0x33a   :  { %1901 = vmatprep.subr.bf16.mxu0 %v1525_v33  ;;  %v1593_v33 = vunpack.c.l.s8.bf16 %v1381_v29 }
 0x33d   :  { %1902 = vmatpush1.bf16.msra.mxu0 %v1524_v36  ;;  %v1592_v36 = vunpack.c.l.s8.bf16 %v1380_v34 }
 0x33e   :  { %1903 = vmatprep.subr.bf16.mxu0 %v1529_v37  ;;  %v1597_v37 = vunpack.c.h.s8.bf16 %v1381_v29 }
 0x341   :  { %1904 = vmatpush1.bf16.msra.mxu0 %v1528_v39  ;;  %v1596_v39 = vunpack.c.h.s8.bf16 %v1380_v34 }
 0x342   :  { %1905 = vmatprep.subr.bf16.mxu0 %v1533_v40  ;;  %v1601_v40 = vunpack.c.l.s8.bf16 %v1385_v38 }
 0x345   :  { %1906 = vmatpush1.bf16.msra.mxu0 %v1532_v26  ;;  %v1600_v26 = vunpack.c.l.s8.bf16 %v1384_v42 }
 0x346   :  { %1907 = vmatprep.subr.bf16.mxu0 %v1537_v43  ;;  %v1605_v43 = vunpack.c.h.s8.bf16 %v1385_v38 }
 0x349   :  { %1908 = vmatpush1.bf16.msra.mxu0 %v1536_v46  ;;  %v1604_v46 = vunpack.c.h.s8.bf16 %v1384_v42 }
 0x34a   :  { %1909 = vmatprep.subr.bf16.mxu0 %v1541_v47  ;;  %v1609_v47 = vunpack.c.l.s8.bf16 %v1389_v45 }
 0x34d   :  { %1910 = vmatpush1.bf16.msra.mxu0 %v1540_v50  ;;  %v1608_v50 = vunpack.c.l.s8.bf16 %v1388_v48 }
 0x34e   :  { %1911 = vmatprep.subr.bf16.mxu0 %v1545_v53  ;;  %v1613_v53 = vunpack.c.h.s8.bf16 %v1389_v45 }
 0x351   :  { %1912 = vmatpush1.bf16.msra.mxu0 %v1544_v55  ;;  %v1612_v55 = vunpack.c.h.s8.bf16 %v1388_v48  ;;  %v1427_v48 = vunpack.c.h.s8.bf16 %v4240_v28  ;;  %v1412_v28 = vld [vmem:[#allocation5 + $0x7b0] sm:$0xff] }
 0x352   :  { %1913 = vmatprep.subr.bf16.mxu0 %v1549_v63  ;;  %v1617_v63 = vunpack.c.l.s8.bf16 %v1393_v54 }
 0x355   :  { %1914 = vmatpush1.bf16.msra.mxu0 %v1548_v57  ;;  %v1616_v57 = vunpack.c.l.s8.bf16 %v1392_v56 }
 0x356   :  { %1924 = vmatprep.subr.bf16.mxu0 %v1553_v58  ;;  %v1621_v58 = vunpack.c.h.s8.bf16 %v1393_v54 }
 0x358   :  { %1916 = vmatmul.mubr.bf16.vlgmr.msra.gmra.mrb[8].mxu0 %v4156_v59 }
 0x359   :  { %1925 = vmatpush1.bf16.msra.mxu0 %v1552_v60  ;;  %1956 = vmatprep.mubr.bf16.mxu0 %v4159_v1  ;;  %v1620_v60 = vunpack.c.h.s8.bf16 %v1392_v56 }
 0x35a   :  { %1926 = vmatprep.subr.bf16.mxu0 %v1557_v0  ;;  %v1625_v0 = vunpack.c.l.s8.bf16 %v1397_v41 }
 0x35d   :  { %1927 = vmatpush1.bf16.msra.mxu0 %v1556_v3  ;;  %v1624_v3 = vunpack.c.l.s8.bf16 %v1396_v2 }
 0x35e   :  { %1928 = vmatprep.subr.bf16.mxu0 %v1561_v4  ;;  %v1629_v4 = vunpack.c.h.s8.bf16 %v1397_v41 }
 0x361   :  { %1929 = vmatpush1.bf16.msra.mxu0 %v1560_v6  ;;  %v1628_v6 = vunpack.c.h.s8.bf16 %v1396_v2  ;;  %v1303_v2 = vld [vmem:[#allocation5 + $0x448] sm:$0xff] }
 0x362   :  { %1930 = vmatprep.subr.bf16.mxu0 %v1565_v7  ;;  %v1633_v7 = vunpack.c.l.s8.bf16 %v1401_v5 }
 0x365   :  { %1931 = vmatpush1.bf16.msra.mxu0 %v1564_v8  ;;  %v1180_v8 = vld [vmem:[#allocation11] sm:$0x3] }
 0x366   :  { %1932 = vmatprep.subr.bf16.mxu0 %v1569_v9  ;;  %v1632_v9 = vunpack.c.l.s8.bf16 %v1400_v35  ;;  %v1185_v17 = vrot.slane %v1180_v8, %v4199_v61 }
 0x369   :  { %1933 = vmatpush1.bf16.msra.mxu0 %v1568_v11  ;;  %v1194_v11 = vld [vmem:[#allocation13] sm:$0x3] }
 0x36a   :  { %1934 = vmatprep.subr.bf16.mxu0 %v1573_v13  ;;  %v1405_v13 = vld [vmem:[#allocation5 + $0x778] sm:$0xff]  ;;  %v1199_v20 = vrot.slane %v1194_v11, %v4199_v61 }
 0x36b   :  { %v1645_v34 = vunpack.c.h.s8.bf16 %v1405_v13 }
 0x36d   :  { %1935 = vmatpush1.bf16.msra.mxu0 %v1572_v18  ;;  %v1189_v18 = vrot.slane %v1180_v8, %v4202_v62  ;;  %v1660_v8 = vunpack.c.h.s8.bf16 %v1412_v28 }
 0x36e   :  { %1936 = vmatprep.subr.bf16.mxu0 %v1577_v19  ;;  %v1636_v19 = vunpack.c.h.s8.bf16 %v1400_v35  ;;  %v1302_v35 = vld [vmem:[#allocation5 + $0x440] sm:$0xff] }
 0x371   :  { %1937 = vmatpush1.bf16.msra.mxu0 %v1576_v21  ;;  %v1641_v21 = vunpack.c.l.s8.bf16 %v1405_v13  ;;  %v1443_v13 = vunpack.c.h.s8.bf16 %v1303_v2 }
 0x372   :  { %1938 = vmatprep.subr.bf16.mxu0 %v1581_v22  ;;  %v1404_v22 = vld [vmem:[#allocation5 + $0x770] sm:$0xff] }
 0x373   :  { %v1640_v29 = vunpack.c.l.s8.bf16 %v1404_v22  ;;  %v1644_v42 = vunpack.c.h.s8.bf16 %v1404_v22 }
 0x375   :  { %1939 = vmatpush1.bf16.msra.mxu0 %v1580_v23  ;;  %v1203_v23 = vrot.slane %v1194_v11, %v4202_v62  ;;  %v1438_v11 = vunpack.c.l.s8.bf16 %v1302_v35 }
 0x376   :  { %1940 = vmatprep.subr.bf16.mxu0 %v1585_v24 }
 0x379   :  { %1941 = vmatpush1.bf16.msra.mxu0 %v1584_v14 }
 0x37a   :  { %1942 = vmatprep.subr.bf16.mxu0 %v1589_v27 }
 0x37d   :  { %1943 = vmatpush1.bf16.msra.mxu0 %v1588_v30 }
 0x37e   :  { %1944 = vmatprep.subr.bf16.mxu0 %v1593_v33 }
 0x381   :  { %1945 = vmatpush1.bf16.msra.mxu0 %v1592_v36 }
 0x382   :  { %1946 = vmatprep.subr.bf16.mxu0 %v1597_v37  ;;  %v1409_v37 = vld [vmem:[#allocation5 + $0x798] sm:$0xff] }
 0x383   :  { %v1653_v54 = vunpack.c.h.s8.bf16 %v1409_v37 }
 0x385   :  { %1947 = vmatpush1.bf16.msra.mxu0 %v1596_v39  ;;  %v1294_v39 = vld [vmem:[#allocation5 + $0x400] sm:$0xff] }
 0x386   :  { %1948 = vmatprep.subr.bf16.mxu0 %v1601_v40 }
 0x389   :  { %1949 = vmatpush1.bf16.msra.mxu0 %v1600_v26  ;;  %v1649_v26 = vunpack.c.l.s8.bf16 %v1409_v37  ;;  %v1310_v37 = vld [vmem:[#allocation5 + $0x480] sm:$0xff] }
 0x38a   :  { %1950 = vmatprep.subr.bf16.mxu0 %v1605_v43  ;;  %v1408_v43 = vld [vmem:[#allocation5 + $0x790] sm:$0xff] }
 0x38d   :  { %1951 = vmatpush1.bf16.msra.mxu0 %v1604_v46  ;;  %v1422_v46 = vunpack.c.l.s8.bf16 %v1294_v39 }
 0x38e   :  { %1952 = vmatprep.subr.bf16.mxu0 %v1609_v47 }
 0x391   :  { %1953 = vmatpush1.bf16.msra.mxu0 %v1608_v50  ;;  %v1299_v50 = vld [vmem:[#allocation5 + $0x428] sm:$0xff] }
 0x392   :  { %1954 = vmatprep.subr.bf16.mxu0 %v1613_v53  ;;  %v1648_v53 = vunpack.c.l.s8.bf16 %v1408_v43  ;;  %v1431_v56 = vunpack.c.l.s8.bf16 %v1299_v50 }
 0x395   :  { %1955 = vmatpush1.bf16.msra.mxu0 %v1612_v55  ;;  %v1426_v55 = vunpack.c.h.s8.bf16 %v1294_v39  ;;  %v1454_v39 = vunpack.c.l.s8.bf16 %v1310_v37 }
 0x396   :  { %1965 = vmatprep.subr.bf16.mxu0 %v1617_v63  ;;  %v1413_v63 = vld [vmem:[#allocation5 + $0x7b8] sm:$0xff] }
 0x397   :  { %v1657_v41 = vunpack.c.l.s8.bf16 %v1413_v63 }
 0x398   :  { %1957 = vmatmul.mubr.bf16.vlgmr.msra.gmra.mrb[8].mxu0 %v4146_v15 }
 0x399   :  { %1966 = vmatpush1.bf16.msra.mxu0 %v1616_v57  ;;  %1997 = vmatprep.mubr.bf16.mxu0 %v4167_v44  ;;  %v1298_v57 = vld [vmem:[#allocation5 + $0x420] sm:$0xff] }
 0x39a   :  { %1967 = vmatprep.subr.bf16.mxu0 %v1621_v58  ;;  %v1652_v58 = vunpack.c.h.s8.bf16 %v1408_v43  ;;  %v1434_v5 = vunpack.c.h.s8.bf16 %v1298_v57 }
 0x39d   :  { %1968 = vmatpush1.bf16.msra.mxu0 %v1620_v60  ;;  %v1430_v60 = vunpack.c.l.s8.bf16 %v1298_v57 }
 0x39e   :  { %1969 = vmatprep.subr.bf16.mxu0 %v1625_v0  ;;  %v1435_v0 = vunpack.c.h.s8.bf16 %v1299_v50 }
 0x3a1   :  { %1970 = vmatpush1.bf16.msra.mxu0 %v1624_v3  ;;  %v1656_v3 = vunpack.c.l.s8.bf16 %v1412_v28 }
 0x3a2   :  { %1971 = vmatprep.subr.bf16.mxu0 %v1629_v4  ;;  %v1661_v4 = vunpack.c.h.s8.bf16 %v1413_v63 }
 0x3a5   :  { %1972 = vmatpush1.bf16.msra.mxu0 %v1628_v6  ;;  %v1417_v6 = vld [vmem:[#allocation5 + $0x7d8] sm:$0xff] }
 0x3a6   :  { %1973 = vmatprep.subr.bf16.mxu0 %v1633_v7  ;;  %v1439_v7 = vunpack.c.l.s8.bf16 %v1303_v2 }
 0x3a9   :  { %1974 = vmatpush1.bf16.msra.mxu0 %v1632_v9  ;;  %v1665_v9 = vunpack.c.l.s8.bf16 %v1417_v6 }
 0x3aa   :  { %1975 = vmatprep.subr.bf16.mxu0 %v1637_v10  ;;  %v1416_v10 = vld [vmem:[#allocation5 + $0x7d0] sm:$0xff] }
 0x3ab   :  { %v1173_v12 = vpop.f32.mrb[4].mxu0 }
 0x3ac   :  { %v1192_v24 = vmul.f32 %v1185_v17, %v1173_v12  ;;  %v1175_v25 = vpop.f32.mrb[5].mxu0  ;;  %v1307_v17 = vld [vmem:[#allocation5 + $0x468] sm:$0xff]  ;;  %v1306_v12 = vld [vmem:[#allocation5 + $0x460] sm:$0xff] }
 0x3ad   :  { %v1193_v14 = vmul.f32 %v1189_v18, %v1175_v25  ;;  %v1177_v27 = vpop.f32.mrb[6].mxu0  ;;  %1976 = vmatpush1.bf16.msra.mxu0 %v1636_v19  ;;  %v1664_v18 = vunpack.c.l.s8.bf16 %v1416_v10  ;;  %v1669_v19 = vunpack.c.h.s8.bf16 %v1417_v6  ;;  %v1447_v22 = vunpack.c.l.s8.bf16 %v1307_v17  ;;  %v1420_v25 = vld [vmem:[#allocation5 + $0x7f0] sm:$0xff] }
 0x3ae   :  { %v1206_v30 = vadd.f32 %v1199_v20, %v1192_v24  ;;  %v1178_v33 = vpop.f32.mrb[7].mxu0  ;;  %1977 = vmatprep.subr.bf16.mxu0 %v1641_v21  ;;  %v1442_v20 = vunpack.c.h.s8.bf16 %v1302_v35  ;;  %v1421_v21 = vld [vmem:[#allocation5 + $0x7f8] sm:$0xff]  ;;  %v1451_v27 = vunpack.c.h.s8.bf16 %v1307_v17 }
 0x3af   :  { %v1207_v36 = vadd.f32 %v1203_v23, %v1193_v14  ;;  %v1668_v23 = vunpack.c.h.s8.bf16 %v1416_v10  ;;  %v1673_v24 = vunpack.c.l.s8.bf16 %v1421_v21  ;;  %v1446_v14 = vunpack.c.l.s8.bf16 %v1306_v12 }
 0x3b0   :  { %v1208_v38 = vmax.f32 %v1206_v30, 0.0  ;;  %v1672_v30 = vunpack.c.l.s8.bf16 %v1420_v25  ;;  %v1677_v33 = vunpack.c.h.s8.bf16 %v1421_v21 }
 0x3b1   :  { %v1209_v40 = vmax.f32 %v1207_v36, 0.0  ;;  %1978 = vmatpush1.bf16.msra.mxu0 %v1640_v29  ;;  %v1311_v29 = vld [vmem:[#allocation5 + $0x488] sm:$0xff] }
 0x3b2   :  { %1979 = vmatprep.subr.bf16.mxu0 %v1645_v34  ;;  %v1234_v47 = vpack.c.bf16 %v1208_v38, %v1208_v38  ;;  %v1450_v34 = vunpack.c.h.s8.bf16 %v1306_v12  ;;  %v1455_v36 = vunpack.c.l.s8.bf16 %v1311_v29  ;;  %v1676_v38 = vunpack.c.h.s8.bf16 %v1420_v25 }
 0x3b3   :  { %v1235_v45 = vpack.c.bf16 %v1209_v40, %v1209_v40  ;;  %v1459_v40 = vunpack.c.h.s8.bf16 %v1311_v29 }
 0x3b5   :  { %1268 = vmatprep.mubr.bf16.mxu1 %v1235_v45  ;;  %1980 = vmatpush1.bf16.msra.mxu0 %v1644_v42  ;;  %v1315_v42 = vld [vmem:[#allocation5 + $0x4a8] sm:$0xff]  ;;  %v1314_v45 = vld [vmem:[#allocation5 + $0x4a0] sm:$0xff] }
 0x3b6   :  { %1269 = vmatmul.mubr.bf16.vlgmr.msra.gmra.mrb[8].mxu1 %v1234_v47  ;;  %1981 = vmatprep.subr.bf16.mxu0 %v1649_v26  ;;  %v1458_v26 = vunpack.c.h.s8.bf16 %v1310_v37  ;;  %v1463_v43 = vunpack.c.l.s8.bf16 %v1315_v42  ;;  %v1467_v47 = vunpack.c.h.s8.bf16 %v1315_v42  ;;  %v1466_v50 = vunpack.c.h.s8.bf16 %v1314_v45  ;;  %v1347_v37 = vld [vmem:[#allocation5 + $0x5a8] sm:$0xff] }
 0x3b7   :  { %1679 = vmatpush1.bf16.msra.mxu1 %v1422_v46  ;;  %1710 = vmatprep.mubr.bf16.mxu1 %v4131_v51  ;;  %v1462_v46 = vunpack.c.l.s8.bf16 %v1314_v45 }
 0x3b8   :  { %1680 = vmatprep.subr.bf16.mxu1 %v1427_v48  ;;  %v1319_v48 = vld [vmem:[#allocation5 + $0x4c8] sm:$0xff] }
 0x3b9   :  { %1982 = vmatpush1.bf16.msra.mxu0 %v1648_v53  ;;  %v1471_v53 = vunpack.c.l.s8.bf16 %v1319_v48  ;;  %v1475_v63 = vunpack.c.h.s8.bf16 %v1319_v48 }
 0x3ba   :  { %1983 = vmatprep.subr.bf16.mxu0 %v1653_v54  ;;  %v1318_v54 = vld [vmem:[#allocation5 + $0x4c0] sm:$0xff] }
 0x3bb   :  { %1681 = vmatpush1.bf16.msra.mxu1 %v1426_v55  ;;  %v1470_v55 = vunpack.c.l.s8.bf16 %v1318_v54  ;;  %v1474_v57 = vunpack.c.h.s8.bf16 %v1318_v54 }
 0x3bc   :  { %1682 = vmatprep.subr.bf16.mxu1 %v1431_v56  ;;  %v1323_v56 = vld [vmem:[#allocation5 + $0x4e8] sm:$0xff] }
 0x3bd   :  { %1984 = vmatpush1.bf16.msra.mxu0 %v1652_v58  ;;  %v1479_v58 = vunpack.c.l.s8.bf16 %v1323_v56 }
 0x3be   :  { %1985 = vmatprep.subr.bf16.mxu0 %v1657_v41  ;;  %v1322_v41 = vld [vmem:[#allocation5 + $0x4e0] sm:$0xff] }
 0x3bf   :  { %1683 = vmatpush1.bf16.msra.mxu1 %v1430_v60  ;;  %v1478_v28 = vunpack.c.l.s8.bf16 %v1322_v41  ;;  %v1483_v60 = vunpack.c.h.s8.bf16 %v1323_v56  ;;  %v1482_v2 = vunpack.c.h.s8.bf16 %v1322_v41 }
 0x3c0   :  { %1684 = vmatprep.subr.bf16.mxu1 %v1435_v0  ;;  %v1327_v0 = vld [vmem:[#allocation5 + $0x508] sm:$0xff] }
 0x3c1   :  { %1986 = vmatpush1.bf16.msra.mxu0 %v1656_v3  ;;  %v1487_v3 = vunpack.c.l.s8.bf16 %v1327_v0  ;;  %v1491_v6 = vunpack.c.h.s8.bf16 %v1327_v0 }
 0x3c2   :  { %1987 = vmatprep.subr.bf16.mxu0 %v1661_v4  ;;  %v1326_v4 = vld [vmem:[#allocation5 + $0x500] sm:$0xff] }
 0x3c3   :  { %1685 = vmatpush1.bf16.msra.mxu1 %v1434_v5  ;;  %v1486_v5 = vunpack.c.l.s8.bf16 %v1326_v4  ;;  %v1490_v35 = vunpack.c.h.s8.bf16 %v1326_v4 }
 0x3c4   :  { %1686 = vmatprep.subr.bf16.mxu1 %v1439_v7  ;;  %v1331_v7 = vld [vmem:[#allocation5 + $0x528] sm:$0xff] }
 0x3c5   :  { %1988 = vmatpush1.bf16.msra.mxu0 %v1660_v8  ;;  %v1495_v8 = vunpack.c.l.s8.bf16 %v1331_v7 }
 0x3c6   :  { %1989 = vmatprep.subr.bf16.mxu0 %v1665_v9  ;;  %v1330_v9 = vld [vmem:[#allocation5 + $0x520] sm:$0xff] }
 0x3c7   :  { %1687 = vmatpush1.bf16.msra.mxu1 %v1438_v11  ;;  %v1494_v10 = vunpack.c.l.s8.bf16 %v1330_v9  ;;  %v1499_v11 = vunpack.c.h.s8.bf16 %v1331_v7  ;;  %v1498_v17 = vunpack.c.h.s8.bf16 %v1330_v9 }
 0x3c8   :  { %1688 = vmatprep.subr.bf16.mxu1 %v1443_v13  ;;  %v1335_v13 = vld [vmem:[#allocation5 + $0x548] sm:$0xff] }
 0x3c9   :  { %1990 = vmatpush1.bf16.msra.mxu0 %v1664_v18  ;;  %v1503_v18 = vunpack.c.l.s8.bf16 %v1335_v13  ;;  %v1507_v21 = vunpack.c.h.s8.bf16 %v1335_v13 }
 0x3ca   :  { %1991 = vmatprep.subr.bf16.mxu0 %v1669_v19  ;;  %v1334_v19 = vld [vmem:[#allocation5 + $0x540] sm:$0xff] }
 0x3cb   :  { %1689 = vmatpush1.bf16.msra.mxu1 %v1442_v20  ;;  %v1502_v20 = vunpack.c.l.s8.bf16 %v1334_v19  ;;  %v1506_v12 = vunpack.c.h.s8.bf16 %v1334_v19 }
 0x3cc   :  { %1690 = vmatprep.subr.bf16.mxu1 %v1447_v22  ;;  %v1339_v22 = vld [vmem:[#allocation5 + $0x568] sm:$0xff] }
 0x3cd   :  { %1992 = vmatpush1.bf16.msra.mxu0 %v1668_v23  ;;  %v1511_v23 = vunpack.c.l.s8.bf16 %v1339_v22 }
 0x3ce   :  { %1993 = vmatprep.subr.bf16.mxu0 %v1673_v24  ;;  %v1338_v24 = vld [vmem:[#allocation5 + $0x560] sm:$0xff] }
 0x3cf   :  { %1691 = vmatpush1.bf16.msra.mxu1 %v1446_v14  ;;  %v1510_v25 = vunpack.c.l.s8.bf16 %v1338_v24  ;;  %v1515_v14 = vunpack.c.h.s8.bf16 %v1339_v22  ;;  %v1514_v29 = vunpack.c.h.s8.bf16 %v1338_v24 }
 0x3d0   :  { %1692 = vmatprep.subr.bf16.mxu1 %v1451_v27  ;;  %v1343_v27 = vld [vmem:[#allocation5 + $0x588] sm:$0xff] }
 0x3d1   :  { %1994 = vmatpush1.bf16.msra.mxu0 %v1672_v30  ;;  %v1519_v30 = vunpack.c.l.s8.bf16 %v1343_v27 }
 0x3d2   :  { %1995 = vmatprep.subr.bf16.mxu0 %v1677_v33  ;;  %v1342_v33 = vld [vmem:[#allocation5 + $0x580] sm:$0xff] }
 0x3d3   :  { %1693 = vmatpush1.bf16.msra.mxu1 %v1450_v34  ;;  %v1518_v34 = vunpack.c.l.s8.bf16 %v1342_v33 }
 0x3d4   :  { %1694 = vmatprep.subr.bf16.mxu1 %v1455_v36  ;;  %v1523_v36 = vunpack.c.h.s8.bf16 %v1343_v27 }
 0x3d5   :  { %1996 = vmatpush1.bf16.msra.mxu0 %v1676_v38  ;;  %v1522_v38 = vunpack.c.h.s8.bf16 %v1342_v33 }
 0x3d7   :  { %1695 = vmatpush1.bf16.msra.mxu1 %v1454_v39  ;;  %v1527_v39 = vunpack.c.l.s8.bf16 %v1347_v37 }
 0x3d8   :  { %1696 = vmatprep.subr.bf16.mxu1 %v1459_v40  ;;  %1998 = vmatmul.mubr.bf16.vlgmr.msra.gmra.mrb[8].mxu0 %v4175_v16  ;;  %v1346_v40 = vld [vmem:[#allocation5 + $0x5a0] sm:$0xff] }
 0x3d9   :  { %v1526_v42 = vunpack.c.l.s8.bf16 %v1346_v40  ;;  %v1530_v45 = vunpack.c.h.s8.bf16 %v1346_v40 }
 0x3db   :  { %1697 = vmatpush1.bf16.msra.mxu1 %v1458_v26  ;;  %v1531_v26 = vunpack.c.h.s8.bf16 %v1347_v37 }
 0x3dc   :  { %1698 = vmatprep.subr.bf16.mxu1 %v1463_v43  ;;  %v1351_v43 = vld [vmem:[#allocation5 + $0x5c8] sm:$0xff] }
 0x3df   :  { %1699 = vmatpush1.bf16.msra.mxu1 %v1462_v46  ;;  %v1535_v46 = vunpack.c.l.s8.bf16 %v1351_v43 }
 0x3e0   :  { %1700 = vmatprep.subr.bf16.mxu1 %v1467_v47  ;;  %v1350_v47 = vld [vmem:[#allocation5 + $0x5c0] sm:$0xff] }
 0x3e1   :  { %v1534_v48 = vunpack.c.l.s8.bf16 %v1350_v47  ;;  %v1538_v54 = vunpack.c.h.s8.bf16 %v1350_v47 }
 0x3e3   :  { %1701 = vmatpush1.bf16.msra.mxu1 %v1466_v50  ;;  %v1539_v50 = vunpack.c.h.s8.bf16 %v1351_v43 }
 0x3e4   :  { %1702 = vmatprep.subr.bf16.mxu1 %v1471_v53  ;;  %v1355_v53 = vld [vmem:[#allocation5 + $0x5e8] sm:$0xff] }
 0x3e7   :  { %1703 = vmatpush1.bf16.msra.mxu1 %v1470_v55  ;;  %v1543_v55 = vunpack.c.l.s8.bf16 %v1355_v53 }
 0x3e8   :  { %1704 = vmatprep.subr.bf16.mxu1 %v1475_v63  ;;  %v1354_v63 = vld [vmem:[#allocation5 + $0x5e0] sm:$0xff] }
 0x3e9   :  { %v1542_v56 = vunpack.c.l.s8.bf16 %v1354_v63  ;;  %v1546_v41 = vunpack.c.h.s8.bf16 %v1354_v63 }
 0x3eb   :  { %1705 = vmatpush1.bf16.msra.mxu1 %v1474_v57  ;;  %v1547_v57 = vunpack.c.h.s8.bf16 %v1355_v53 }
 0x3ec   :  { %1706 = vmatprep.subr.bf16.mxu1 %v1479_v58  ;;  %v1359_v58 = vld [vmem:[#allocation5 + $0x608] sm:$0xff] }
 0x3ef   :  { %1707 = vmatpush1.bf16.msra.mxu1 %v1478_v28  ;;  %v1551_v28 = vunpack.c.l.s8.bf16 %v1359_v58 }
 0x3f0   :  { %1708 = vmatprep.subr.bf16.mxu1 %v1483_v60  ;;  %v1358_v60 = vld [vmem:[#allocation5 + $0x600] sm:$0xff] }
 0x3f1   :  { %v1550_v0 = vunpack.c.l.s8.bf16 %v1358_v60  ;;  %v1554_v4 = vunpack.c.h.s8.bf16 %v1358_v60 }
 0x3f3   :  { %1709 = vmatpush1.bf16.msra.mxu1 %v1482_v2  ;;  %v1555_v2 = vunpack.c.h.s8.bf16 %v1359_v58 }
 0x3f4   :  { %1719 = vmatprep.subr.bf16.mxu1 %v1487_v3  ;;  %v1363_v3 = vld [vmem:[#allocation5 + $0x628] sm:$0xff] }
 0x3f6   :  { %1711 = vmatmul.mubr.bf16.vlgmr.msra.gmra.mrb[12].mxu1 %v4150_v49 }
 0x3f7   :  { %1720 = vmatpush1.bf16.msra.mxu1 %v1486_v5  ;;  %1751 = vmatprep.mubr.bf16.mxu1 %v4136_v52  ;;  %v1559_v5 = vunpack.c.l.s8.bf16 %v1363_v3 }
 0x3f8   :  { %1721 = vmatprep.subr.bf16.mxu1 %v1491_v6  ;;  %v1362_v6 = vld [vmem:[#allocation5 + $0x620] sm:$0xff] }
 0x3f9   :  { %v1558_v7 = vunpack.c.l.s8.bf16 %v1362_v6  ;;  %v1562_v9 = vunpack.c.h.s8.bf16 %v1362_v6 }
 0x3fb   :  { %1722 = vmatpush1.bf16.msra.mxu1 %v1490_v35  ;;  %v1563_v35 = vunpack.c.h.s8.bf16 %v1363_v3 }
 0x3fc   :  { %1723 = vmatprep.subr.bf16.mxu1 %v1495_v8  ;;  %v1367_v8 = vld [vmem:[#allocation5 + $0x648] sm:$0xff] }
 0x3ff   :  { %1724 = vmatpush1.bf16.msra.mxu1 %v1494_v10  ;;  %v1567_v10 = vunpack.c.l.s8.bf16 %v1367_v8 }
 0x400   :  { %1725 = vmatprep.subr.bf16.mxu1 %v1499_v11  ;;  %v1366_v11 = vld [vmem:[#allocation5 + $0x640] sm:$0xff] }
 0x401   :  { %v1566_v13 = vunpack.c.l.s8.bf16 %v1366_v11  ;;  %v1570_v19 = vunpack.c.h.s8.bf16 %v1366_v11 }
 0x403   :  { %1726 = vmatpush1.bf16.msra.mxu1 %v1498_v17  ;;  %v1571_v17 = vunpack.c.h.s8.bf16 %v1367_v8 }
 0x404   :  { %1727 = vmatprep.subr.bf16.mxu1 %v1503_v18  ;;  %v1371_v18 = vld [vmem:[#allocation5 + $0x668] sm:$0xff] }
 0x407   :  { %1728 = vmatpush1.bf16.msra.mxu1 %v1502_v20  ;;  %v1575_v20 = vunpack.c.l.s8.bf16 %v1371_v18 }
 0x408   :  { %1729 = vmatprep.subr.bf16.mxu1 %v1507_v21  ;;  %v1370_v21 = vld [vmem:[#allocation5 + $0x660] sm:$0xff] }
 0x409   :  { %v1574_v22 = vunpack.c.l.s8.bf16 %v1370_v21  ;;  %v1578_v24 = vunpack.c.h.s8.bf16 %v1370_v21 }
 0x40b   :  { %1730 = vmatpush1.bf16.msra.mxu1 %v1506_v12  ;;  %v1579_v12 = vunpack.c.h.s8.bf16 %v1371_v18 }
 0x40c   :  { %1731 = vmatprep.subr.bf16.mxu1 %v1511_v23  ;;  %v1375_v23 = vld [vmem:[#allocation5 + $0x688] sm:$0xff] }
 0x40f   :  { %1732 = vmatpush1.bf16.msra.mxu1 %v1510_v25  ;;  %v1583_v25 = vunpack.c.l.s8.bf16 %v1375_v23 }
 0x410   :  { %1733 = vmatprep.subr.bf16.mxu1 %v1515_v14  ;;  %v1374_v14 = vld [vmem:[#allocation5 + $0x680] sm:$0xff] }
 0x411   :  { %v1582_v27 = vunpack.c.l.s8.bf16 %v1374_v14  ;;  %v1586_v33 = vunpack.c.h.s8.bf16 %v1374_v14 }
 0x413   :  { %1734 = vmatpush1.bf16.msra.mxu1 %v1514_v29  ;;  %v1587_v29 = vunpack.c.h.s8.bf16 %v1375_v23  ;;  %v3462_v23 = vld [vmem:[#allocation17] ss:$0 sm:$0xff] }
 0x414   :  { %1735 = vmatprep.subr.bf16.mxu1 %v1519_v30  ;;  %v1379_v30 = vld [vmem:[#allocation5 + $0x6a8] sm:$0xff] }
 0x417   :  { %1736 = vmatpush1.bf16.msra.mxu1 %v1518_v34  ;;  %v1591_v34 = vunpack.c.l.s8.bf16 %v1379_v30 }
 0x418   :  { %1737 = vmatprep.subr.bf16.mxu1 %v1523_v36  ;;  %v1378_v36 = vld [vmem:[#allocation5 + $0x6a0] sm:$0xff] }
 0x419   :  { %v1590_v37 = vunpack.c.l.s8.bf16 %v1378_v36  ;;  %v1594_v40 = vunpack.c.h.s8.bf16 %v1378_v36 }
 0x41b   :  { %1738 = vmatpush1.bf16.msra.mxu1 %v1522_v38  ;;  %v1595_v38 = vunpack.c.h.s8.bf16 %v1379_v30 }
 0x41c   :  { %1739 = vmatprep.subr.bf16.mxu1 %v1527_v39  ;;  %v1383_v39 = vld [vmem:[#allocation5 + $0x6c8] sm:$0xff] }
 0x41f   :  { %1740 = vmatpush1.bf16.msra.mxu1 %v1526_v42  ;;  %v1599_v42 = vunpack.c.l.s8.bf16 %v1383_v39 }
 0x420   :  { %1741 = vmatprep.subr.bf16.mxu1 %v1531_v26  ;;  %v1382_v26 = vld [vmem:[#allocation5 + $0x6c0] sm:$0xff] }
 0x421   :  { %v1598_v43 = vunpack.c.l.s8.bf16 %v1382_v26  ;;  %v1602_v47 = vunpack.c.h.s8.bf16 %v1382_v26 }
 0x423   :  { %1742 = vmatpush1.bf16.msra.mxu1 %v1530_v45  ;;  %v1603_v45 = vunpack.c.h.s8.bf16 %v1383_v39 }
 0x424   :  { %1743 = vmatprep.subr.bf16.mxu1 %v1535_v46  ;;  %v1387_v46 = vld [vmem:[#allocation5 + $0x6e8] sm:$0xff] }
 0x427   :  { %1744 = vmatpush1.bf16.msra.mxu1 %v1534_v48  ;;  %v1607_v48 = vunpack.c.l.s8.bf16 %v1387_v46 }
 0x428   :  { %1745 = vmatprep.subr.bf16.mxu1 %v1539_v50  ;;  %v1386_v50 = vld [vmem:[#allocation5 + $0x6e0] sm:$0xff] }
 0x429   :  { %v1606_v53 = vunpack.c.l.s8.bf16 %v1386_v50  ;;  %v1610_v63 = vunpack.c.h.s8.bf16 %v1386_v50 }
 0x42b   :  { %1746 = vmatpush1.bf16.msra.mxu1 %v1538_v54  ;;  %v1611_v54 = vunpack.c.h.s8.bf16 %v1387_v46 }
 0x42c   :  { %1747 = vmatprep.subr.bf16.mxu1 %v1543_v55  ;;  %v1391_v55 = vld [vmem:[#allocation5 + $0x708] sm:$0xff] }
 0x42f   :  { %1748 = vmatpush1.bf16.msra.mxu1 %v1542_v56  ;;  %v1615_v56 = vunpack.c.l.s8.bf16 %v1391_v55 }
 0x430   :  { %1749 = vmatprep.subr.bf16.mxu1 %v1547_v57  ;;  %v1390_v57 = vld [vmem:[#allocation5 + $0x700] sm:$0xff] }
 0x431   :  { %v1614_v58 = vunpack.c.l.s8.bf16 %v1390_v57  ;;  %v1618_v60 = vunpack.c.h.s8.bf16 %v1390_v57 }
 0x433   :  { %1750 = vmatpush1.bf16.msra.mxu1 %v1546_v41  ;;  %v1619_v41 = vunpack.c.h.s8.bf16 %v1391_v55 }
 0x434   :  { %1760 = vmatprep.subr.bf16.mxu1 %v1551_v28  ;;  %v1395_v28 = vld [vmem:[#allocation5 + $0x728] sm:$0xff] }
 0x436   :  { %1752 = vmatmul.mubr.bf16.vlgmr.msra.gmra.mrb[12].mxu1 %v4156_v59 }
 0x437   :  { %1761 = vmatpush1.bf16.msra.mxu1 %v1550_v0  ;;  %1792 = vmatprep.mubr.bf16.mxu1 %v4159_v1  ;;  %v1623_v0 = vunpack.c.l.s8.bf16 %v1395_v28 }
 0x438   :  { %1762 = vmatprep.subr.bf16.mxu1 %v1555_v2  ;;  %v1394_v2 = vld [vmem:[#allocation5 + $0x720] sm:$0xff] }
 0x439   :  { %v1622_v3 = vunpack.c.l.s8.bf16 %v1394_v2  ;;  %v1626_v6 = vunpack.c.h.s8.bf16 %v1394_v2 }
 0x43b   :  { %1763 = vmatpush1.bf16.msra.mxu1 %v1554_v4  ;;  %v1627_v4 = vunpack.c.h.s8.bf16 %v1395_v28 }
 0x43c   :  { %1764 = vmatprep.subr.bf16.mxu1 %v1559_v5  ;;  %v1399_v5 = vld [vmem:[#allocation5 + $0x748] sm:$0xff] }
 0x43f   :  { %1765 = vmatpush1.bf16.msra.mxu1 %v1558_v7  ;;  %v1631_v7 = vunpack.c.l.s8.bf16 %v1399_v5 }
 0x440   :  { %1766 = vmatprep.subr.bf16.mxu1 %v1563_v35  ;;  %v1398_v35 = vld [vmem:[#allocation5 + $0x740] sm:$0xff] }
 0x441   :  { %v1630_v8 = vunpack.c.l.s8.bf16 %v1398_v35  ;;  %v1634_v11 = vunpack.c.h.s8.bf16 %v1398_v35  ;;  %v2068_v35 = vld [vmem:[#allocation10 + $0x118] sm:$0xff] }
 0x443   :  { %1767 = vmatpush1.bf16.msra.mxu1 %v1562_v9  ;;  %v1635_v9 = vunpack.c.h.s8.bf16 %v1399_v5  ;;  %v2065_v5 = vld [vmem:[#allocation10 + $0x100] sm:$0xff] }
 0x444   :  { %1768 = vmatprep.subr.bf16.mxu1 %v1567_v10  ;;  %v1403_v10 = vld [vmem:[#allocation5 + $0x768] sm:$0xff] }
 0x447   :  { %1769 = vmatpush1.bf16.msra.mxu1 %v1566_v13  ;;  %v1639_v13 = vunpack.c.l.s8.bf16 %v1403_v10 }
 0x448   :  { %1770 = vmatprep.subr.bf16.mxu1 %v1571_v17  ;;  %v1402_v17 = vld [vmem:[#allocation5 + $0x760] sm:$0xff] }
 0x449   :  { %v1642_v30 = vunpack.c.h.s8.bf16 %v1402_v17 }
 0x44b   :  { %1771 = vmatpush1.bf16.msra.mxu1 %v1570_v19 }
 0x44c   :  { %1772 = vmatprep.subr.bf16.mxu1 %v1575_v20  ;;  %v3461_v20 = vld [vmem:[#allocation16] ss:$0 sm:$0xff] }
 0x44f   :  { %1773 = vmatpush1.bf16.msra.mxu1 %v1574_v22 }
 0x450   :  { %1774 = vmatprep.subr.bf16.mxu1 %v1579_v12  ;;  %v1638_v12 = vunpack.c.l.s8.bf16 %v1402_v17  ;;  %v2070_v17 = vld [vmem:[#allocation10 + $0x128] sm:$0xff] }
 0x453   :  { %1775 = vmatpush1.bf16.msra.mxu1 %v1578_v24 }
 0x454   :  { %1776 = vmatprep.subr.bf16.mxu1 %v1583_v25  ;;  %v1643_v25 = vunpack.c.h.s8.bf16 %v1403_v10  ;;  %v2067_v10 = vld [vmem:[#allocation10 + $0x110] sm:$0xff] }
 0x457   :  { %1777 = vmatpush1.bf16.msra.mxu1 %v1582_v27  ;;  %v1407_v27 = vld [vmem:[#allocation5 + $0x788] sm:$0xff] }
 0x458   :  { %1778 = vmatprep.subr.bf16.mxu1 %v1587_v29 }
 0x45b   :  { %1779 = vmatpush1.bf16.msra.mxu1 %v1586_v33  ;;  %v1647_v33 = vunpack.c.l.s8.bf16 %v1407_v27 }
 0x45c   :  { %1780 = vmatprep.subr.bf16.mxu1 %v1591_v34  ;;  %v1406_v34 = vld [vmem:[#allocation5 + $0x780] sm:$0xff] }
 0x45d   :  { %v1646_v36 = vunpack.c.l.s8.bf16 %v1406_v34  ;;  %v1650_v39 = vunpack.c.h.s8.bf16 %v1406_v34  ;;  %v2073_v34 = vld [vmem:[#allocation10 + $0x140] sm:$0xff] }
 0x45f   :  { %1781 = vmatpush1.bf16.msra.mxu1 %v1590_v37  ;;  %v1651_v37 = vunpack.c.h.s8.bf16 %v1407_v27 }
 0x460   :  { %1782 = vmatprep.subr.bf16.mxu1 %v1595_v38  ;;  %v1411_v38 = vld [vmem:[#allocation5 + $0x7a8] sm:$0xff] }
 0x463   :  { %1783 = vmatpush1.bf16.msra.mxu1 %v1594_v40  ;;  %v1655_v40 = vunpack.c.l.s8.bf16 %v1411_v38 }
 0x464   :  { %1784 = vmatprep.subr.bf16.mxu1 %v1599_v42  ;;  %v1410_v42 = vld [vmem:[#allocation5 + $0x7a0] sm:$0xff] }
 0x465   :  { %v1654_v26 = vunpack.c.l.s8.bf16 %v1410_v42  ;;  %v1658_v46 = vunpack.c.h.s8.bf16 %v1410_v42  ;;  %v2075_v42 = vld [vmem:[#allocation10 + $0x150] sm:$0xff] }
 0x467   :  { %1785 = vmatpush1.bf16.msra.mxu1 %v1598_v43  ;;  %v1659_v43 = vunpack.c.h.s8.bf16 %v1411_v38  ;;  %v2076_v38 = vld [vmem:[#allocation10 + $0x158] sm:$0xff] }
 0x468   :  { %1786 = vmatprep.subr.bf16.mxu1 %v1603_v45  ;;  %v1415_v45 = vld [vmem:[#allocation5 + $0x7c8] sm:$0xff] }
 0x46b   :  { %1787 = vmatpush1.bf16.msra.mxu1 %v1602_v47  ;;  %v1663_v47 = vunpack.c.l.s8.bf16 %v1415_v45 }
 0x46c   :  { %1788 = vmatprep.subr.bf16.mxu1 %v1607_v48  ;;  %v1414_v48 = vld [vmem:[#allocation5 + $0x7c0] sm:$0xff] }
 0x46d   :  { %v1662_v50 = vunpack.c.l.s8.bf16 %v1414_v48  ;;  %v1666_v55 = vunpack.c.h.s8.bf16 %v1414_v48  ;;  %v2077_v48 = vld [vmem:[#allocation10 + $0x160] sm:$0xff] }
 0x46f   :  { %1789 = vmatpush1.bf16.msra.mxu1 %v1606_v53  ;;  %v1667_v53 = vunpack.c.h.s8.bf16 %v1415_v45  ;;  %v2078_v45 = vld [vmem:[#allocation10 + $0x168] sm:$0xff] }
 0x470   :  { %1790 = vmatprep.subr.bf16.mxu1 %v1611_v54  ;;  %v1419_v54 = vld [vmem:[#allocation5 + $0x7e8] sm:$0xff] }
 0x473   :  { %1791 = vmatpush1.bf16.msra.mxu1 %v1610_v63  ;;  %v1671_v63 = vunpack.c.l.s8.bf16 %v1419_v54 }
 0x474   :  { %1801 = vmatprep.subr.bf16.mxu1 %v1615_v56  ;;  %v1418_v56 = vld [vmem:[#allocation5 + $0x7e0] sm:$0xff] }
 0x475   :  { %v1670_v57 = vunpack.c.l.s8.bf16 %v1418_v56 }
 0x476   :  { %1793 = vmatmul.mubr.bf16.vlgmr.msra.gmra.mrb[12].mxu1 %v4146_v15 }
 0x477   :  { %1802 = vmatpush1.bf16.msra.mxu1 %v1614_v58  ;;  %1833 = vmatprep.mubr.bf16.mxu1 %v4167_v44 }
 0x478   :  { %1803 = vmatprep.subr.bf16.mxu1 %v1619_v41  ;;  %v1675_v41 = vunpack.c.h.s8.bf16 %v1419_v54  ;;  %v2123_v54 = vunpack.c.h.s8.bf16 %v2077_v48 }
 0x47b   :  { %1804 = vmatpush1.bf16.msra.mxu1 %v1618_v60 }
 0x47c   :  { %1805 = vmatprep.subr.bf16.mxu1 %v1623_v0  ;;  %v2066_v0 = vld [vmem:[#allocation10 + $0x108] sm:$0xff] }
 0x47f   :  { %1806 = vmatpush1.bf16.msra.mxu1 %v1622_v3  ;;  %v1674_v3 = vunpack.c.h.s8.bf16 %v1418_v56  ;;  %v2079_v56 = vld [vmem:[#allocation10 + $0x170] sm:$0xff] }
 0x480   :  { %1807 = vmatprep.subr.bf16.mxu1 %v1627_v4  ;;  %v2098_v4 = vunpack.c.l.s8.bf16 %v2066_v0 }
 0x483   :  { %1808 = vmatpush1.bf16.msra.mxu1 %v1626_v6  ;;  %v2097_v6 = vunpack.c.l.s8.bf16 %v2065_v5 }
 0x484   :  { %1809 = vmatprep.subr.bf16.mxu1 %v1631_v7  ;;  %v2100_v7 = vunpack.c.h.s8.bf16 %v2066_v0  ;;  %v2082_v0 = vld [vmem:[#allocation10 + $0x188] sm:$0xff] }
 0x487   :  { %1810 = vmatpush1.bf16.msra.mxu1 %v1630_v8  ;;  %v2099_v8 = vunpack.c.h.s8.bf16 %v2065_v5  ;;  %v4269_v5 = vld [vmem:[#allocation8 + $0x4] sm:$0xf] }
 0x488   :  { %1811 = vmatprep.subr.bf16.mxu1 %v1635_v9  ;;  %v2102_v9 = vunpack.c.l.s8.bf16 %v2068_v35 }
 0x489   :  { %v3483_v18 = vpop.f32.mrb[8].mxu1 }
 0x48a   :  { %v3484_v19 = vpop.f32.mrb[9].mxu1 }
 0x48b   :  { %v3485_v21 = vadd.f32 %v3484_v19, %v3483_v18  ;;  %1812 = vmatpush1.bf16.msra.mxu1 %v1634_v11  ;;  %v3486_v22 = vpop.f32.mrb[10].mxu1  ;;  %v2101_v11 = vunpack.c.l.s8.bf16 %v2067_v10  ;;  %v2103_v18 = vunpack.c.h.s8.bf16 %v2067_v10  ;;  %v2106_v19 = vunpack.c.l.s8.bf16 %v2070_v17 }
 0x48c   :  { %v3487_v24 = vpop.f32.mrb[11].mxu1  ;;  %1813 = vmatprep.subr.bf16.mxu1 %v1639_v13  ;;  %v2104_v13 = vunpack.c.h.s8.bf16 %v2068_v35  ;;  %v2108_v22 = vunpack.c.h.s8.bf16 %v2070_v17  ;;  %v2051_v35 = vrot.slane %v4269_v5, %v4226_v32 }
 0x48d   :  { %v1283_v14 = vmul.f32 %v3485_v21, %v3461_v20  ;;  %v2069_v20 = vld [vmem:[#allocation10 + $0x120] sm:$0xff] }
 0x48e   :  { %v2105_v21 = vunpack.c.l.s8.bf16 %v2069_v20 }
 0x48f   :  { %v1291_v29 = vadd.f32 %v3462_v23, %v1283_v14  ;;  %1814 = vmatpush1.bf16.msra.mxu1 %v1638_v12  ;;  %v2072_v12 = vld [vmem:[#allocation10 + $0x138] sm:$0xff]  ;;  %v2107_v23 = vunpack.c.h.s8.bf16 %v2069_v20 }
 0x490   :  { %1815 = vmatprep.subr.bf16.mxu1 %v1643_v25  ;;  %v2110_v24 = vunpack.c.l.s8.bf16 %v2072_v12  ;;  %v2071_v25 = vld [vmem:[#allocation10 + $0x130] sm:$0xff]  ;;  %v2112_v27 = vunpack.c.h.s8.bf16 %v2072_v12 }
 0x491   :  { %1292 = vst [vmem:[#allocation19] sm:$0x3] %v1291_v29  ;;  %v2109_v14 = vunpack.c.l.s8.bf16 %v2071_v25  ;;  %v2074_v29 = vld [vmem:[#allocation10 + $0x148] sm:$0xff] }
 0x493   :  { %1816 = vmatpush1.bf16.msra.mxu1 %v1642_v30  ;;  %v2111_v30 = vunpack.c.h.s8.bf16 %v2071_v25 }
 0x494   :  { %1817 = vmatprep.subr.bf16.mxu1 %v1647_v33  ;;  %v2114_v33 = vunpack.c.l.s8.bf16 %v2074_v29 }
 0x497   :  { %1818 = vmatpush1.bf16.msra.mxu1 %v1646_v36  ;;  %v2113_v36 = vunpack.c.l.s8.bf16 %v2073_v34 }
 0x498   :  { %1819 = vmatprep.subr.bf16.mxu1 %v1651_v37  ;;  %v2116_v37 = vunpack.c.h.s8.bf16 %v2074_v29 }
 0x49b   :  { %1820 = vmatpush1.bf16.msra.mxu1 %v1650_v39  ;;  %v2115_v39 = vunpack.c.h.s8.bf16 %v2073_v34  ;;  %v2084_v34 = vld [vmem:[#allocation10 + $0x198] sm:$0xff] }
 0x49c   :  { %1821 = vmatprep.subr.bf16.mxu1 %v1655_v40  ;;  %v2118_v40 = vunpack.c.l.s8.bf16 %v2076_v38 }
 0x49f   :  { %1822 = vmatpush1.bf16.msra.mxu1 %v1654_v26  ;;  %v2117_v26 = vunpack.c.l.s8.bf16 %v2075_v42 }
 0x4a0   :  { %1823 = vmatprep.subr.bf16.mxu1 %v1659_v43  ;;  %v2120_v43 = vunpack.c.h.s8.bf16 %v2076_v38  ;;  %v2083_v38 = vld [vmem:[#allocation10 + $0x190] sm:$0xff] }
 0x4a3   :  { %1824 = vmatpush1.bf16.msra.mxu1 %v1658_v46  ;;  %v2119_v46 = vunpack.c.h.s8.bf16 %v2075_v42  ;;  %v2086_v42 = vld [vmem:[#allocation10 + $0x1a8] sm:$0xff] }
 0x4a4   :  { %1825 = vmatprep.subr.bf16.mxu1 %v1663_v47  ;;  %v2122_v47 = vunpack.c.l.s8.bf16 %v2078_v45 }
 0x4a7   :  { %1826 = vmatpush1.bf16.msra.mxu1 %v1662_v50  ;;  %v2121_v50 = vunpack.c.l.s8.bf16 %v2077_v48  ;;  %v2088_v48 = vld [vmem:[#allocation10 + $0x1b8] sm:$0xff] }
 0x4a8   :  { %1827 = vmatprep.subr.bf16.mxu1 %v1667_v53  ;;  %v2124_v53 = vunpack.c.h.s8.bf16 %v2078_v45  ;;  %v2085_v45 = vld [vmem:[#allocation10 + $0x1a0] sm:$0xff] }
 0x4ab   :  { %1828 = vmatpush1.bf16.msra.mxu1 %v1666_v55  ;;  %v4260_v58 = vpop.f32.mrb[8].mxu0  ;;  %v2080_v55 = vld [vmem:[#allocation10 + $0x178] sm:$0xff] }
 0x4ac   :  { %1829 = vmatprep.subr.bf16.mxu1 %v1671_v63  ;;  %v4262_v28 = vpop.f32.mrb[9].mxu0  ;;  %v2126_v63 = vunpack.c.l.s8.bf16 %v2080_v55 }
 0x4ad   :  { %v2003_v60 = vpop.f32.mrb[10].mxu0 }
 0x4ae   :  { %v2004_v2 = vpop.f32.mrb[11].mxu0  ;;  %v2127_v60 = vunpack.c.h.s8.bf16 %v2079_v56 }
 0x4af   :  { %1830 = vmatpush1.bf16.msra.mxu1 %v1670_v57  ;;  %v2125_v57 = vunpack.c.l.s8.bf16 %v2079_v56  ;;  %v2130_v2 = vunpack.c.l.s8.bf16 %v2082_v0  ;;  %v2090_v56 = vld [vmem:[#allocation10 + $0x1c8] sm:$0xff] }
 0x4b0   :  { %1831 = vmatprep.subr.bf16.mxu1 %v1675_v41  ;;  %v2128_v41 = vunpack.c.h.s8.bf16 %v2080_v55 }
 0x4b3   :  { %1832 = vmatpush1.bf16.msra.mxu1 %v1674_v3  ;;  %v4265_v3 = vld [vmem:[#allocation7 + $0x4] sm:$0xf] }
 0x4b4   :  { %2165 = vmatprep.subr.bf16.mxu1 %v2098_v4  ;;  %v2024_v4 = vrot.slane %v4265_v3, %v4226_v32 }
 0x4b6   :  { %1834 = vmatmul.mubr.bf16.vlgmr.msra.gmra.mrb[12].mxu1 %v4175_v16 }
 0x4b7   :  { %2166 = vmatpush1.bf16.msra.mxu1 %v2097_v6  ;;  %v2012_v6 = vrot.slane %v4265_v3, %v4199_v61 }
 0x4b8   :  { %2167 = vmatprep.subr.bf16.mxu1 %v2100_v7  ;;  %v2032_v7 = vmul.f32 %v2024_v4, %v4262_v28  ;;  %v2092_v4 = vld [vmem:[#allocation10 + $0x1d8] sm:$0xff] }
 0x4bb   :  { %2168 = vmatpush1.bf16.msra.mxu1 %v2099_v8  ;;  %v2016_v8 = vrot.slane %v4265_v3, %v4202_v62 }
 0x4bc   :  { %2169 = vmatprep.subr.bf16.mxu1 %v2102_v9  ;;  %v2039_v9 = vrot.slane %v4269_v5, %v4199_v61 }
 0x4bf   :  { %2170 = vmatpush1.bf16.msra.mxu1 %v2101_v11  ;;  %v2043_v11 = vrot.slane %v4269_v5, %v4202_v62 }
 0x4c0   :  { %2171 = vmatprep.subr.bf16.mxu1 %v2104_v13 }
 0x4c3   :  { %2172 = vmatpush1.bf16.msra.mxu1 %v2103_v18  ;;  %v2059_v18 = vadd.f32 %v2051_v35, %v2032_v7  ;;  %v2284_v7 = vld [vmem:[#allocation14 + $0x60] sm:$0xff] }
 0x4c4   :  { %2173 = vmatprep.subr.bf16.mxu1 %v2106_v19  ;;  %v2280_v35 = vld [vmem:[#allocation14 + $0x40] sm:$0xff] }
 0x4c7   :  { %2174 = vmatpush1.bf16.msra.mxu1 %v2105_v21 }
 0x4c8   :  { %2175 = vmatprep.subr.bf16.mxu1 %v2108_v22 }
 0x4cb   :  { %2176 = vmatpush1.bf16.msra.mxu1 %v2107_v23  ;;  %v2081_v23 = vld [vmem:[#allocation10 + $0x180] sm:$0xff] }
 0x4cc   :  { %2177 = vmatprep.subr.bf16.mxu1 %v2110_v24  ;;  %v2063_v24 = vmax.f32 %v2059_v18, 0.0  ;;  %v2289_v18 = vunpack.c.h.s8.bf16 %v2280_v35 }
 0x4cf   :  { %2178 = vmatpush1.bf16.msra.mxu1 %v2109_v14 }
 0x4d0   :  { %2179 = vmatprep.subr.bf16.mxu1 %v2112_v27  ;;  %v2129_v27 = vunpack.c.l.s8.bf16 %v2081_v23 }
 0x4d3   :  { %2180 = vmatpush1.bf16.msra.mxu1 %v2111_v30  ;;  %v2132_v30 = vunpack.c.h.s8.bf16 %v2082_v0 }
 0x4d4   :  { %2181 = vmatprep.subr.bf16.mxu1 %v2114_v33  ;;  %v2164_v33 = vpack.c.bf16 %v2063_v24, %v2063_v24 }
 0x4d7   :  { %2182 = vmatpush1.bf16.msra.mxu1 %v2113_v36  ;;  %v2131_v36 = vunpack.c.h.s8.bf16 %v2081_v23  ;;  %v2093_v23 = vld [vmem:[#allocation10 + $0x1e0] sm:$0xff] }
 0x4d8   :  { %2183 = vmatprep.subr.bf16.mxu1 %v2116_v37  ;;  %v2134_v37 = vunpack.c.l.s8.bf16 %v2084_v34 }
 0x4db   :  { %2184 = vmatpush1.bf16.msra.mxu1 %v2115_v39  ;;  %v2133_v39 = vunpack.c.l.s8.bf16 %v2083_v38 }
 0x4dc   :  { %2185 = vmatprep.subr.bf16.mxu1 %v2118_v40  ;;  %v2136_v40 = vunpack.c.h.s8.bf16 %v2084_v34  ;;  %v2096_v34 = vld [vmem:[#allocation10 + $0x1f8] sm:$0xff] }
 0x4df   :  { %2186 = vmatpush1.bf16.msra.mxu1 %v2117_v26  ;;  %v2135_v26 = vunpack.c.h.s8.bf16 %v2083_v38  ;;  %v2286_v38 = vld [vmem:[#allocation14 + $0x70] sm:$0xff] }
 0x4e0   :  { %2187 = vmatprep.subr.bf16.mxu1 %v2120_v43  ;;  %v2138_v43 = vunpack.c.l.s8.bf16 %v2086_v42 }
 0x4e3   :  { %2188 = vmatpush1.bf16.msra.mxu1 %v2119_v46  ;;  %v2137_v46 = vunpack.c.l.s8.bf16 %v2085_v45 }
 0x4e4   :  { %2189 = vmatprep.subr.bf16.mxu1 %v2122_v47  ;;  %v2140_v47 = vunpack.c.h.s8.bf16 %v2086_v42  ;;  %v2158_v42 = vunpack.c.l.s8.bf16 %v2096_v34 }
 0x4e7   :  { %2190 = vmatpush1.bf16.msra.mxu1 %v2121_v50  ;;  %v2139_v50 = vunpack.c.h.s8.bf16 %v2085_v45 }
 0x4e8   :  { %2191 = vmatprep.subr.bf16.mxu1 %v2124_v53  ;;  %v2142_v53 = vunpack.c.l.s8.bf16 %v2088_v48 }
 0x4eb   :  { %2192 = vmatpush1.bf16.msra.mxu1 %v2123_v54  ;;  %v2087_v54 = vld [vmem:[#allocation10 + $0x1b0] sm:$0xff] }
 0x4ec   :  { %2193 = vmatprep.subr.bf16.mxu1 %v2126_v63  ;;  %v2141_v55 = vunpack.c.l.s8.bf16 %v2087_v54  ;;  %v2144_v63 = vunpack.c.h.s8.bf16 %v2088_v48 }
 0x4ef   :  { %2194 = vmatpush1.bf16.msra.mxu1 %v2125_v57  ;;  %v2143_v57 = vunpack.c.h.s8.bf16 %v2087_v54 }
 0x4f0   :  { %2195 = vmatprep.subr.bf16.mxu1 %v2128_v41  ;;  %v2146_v41 = vunpack.c.l.s8.bf16 %v2090_v56 }
 0x4f3   :  { %2196 = vmatpush1.bf16.msra.mxu1 %v2127_v60  ;;  %v2089_v60 = vld [vmem:[#allocation10 + $0x1c0] sm:$0xff] }
 0x4f4   :  { %2206 = vmatprep.subr.bf16.mxu1 %v2130_v2  ;;  %v2145_v0 = vunpack.c.l.s8.bf16 %v2089_v60  ;;  %v2148_v2 = vunpack.c.h.s8.bf16 %v2090_v56 }
 0x589   :  { %v1835_v10 = vpop.f32.mrb[12].mxu1 }
 0x58a   :  { %v2029_v13 = vmul.f32 %v2012_v6, %v1835_v10  ;;  %v1837_v17 = vpop.f32.mrb[13].mxu1  ;;  %v2147_v6 = vunpack.c.h.s8.bf16 %v2089_v60  ;;  %v2296_v10 = vunpack.c.l.s8.bf16 %v2284_v7 }
 0x58b   :  { %v2030_v19 = vmul.f32 %v2016_v8, %v1837_v17  ;;  %v1839_v20 = vpop.f32.mrb[14].mxu1  ;;  %v2150_v8 = vunpack.c.l.s8.bf16 %v2092_v4  ;;  %v2297_v17 = vunpack.c.h.s8.bf16 %v2284_v7  ;;  %v2378_v7 = vld [vmem:[#allocation5 + $0x858] sm:$0xff] }
 0x58c   :  { %v2056_v21 = vadd.f32 %v2039_v9, %v2029_v13  ;;  %v1840_v28 = vpop.f32.mrb[15].mxu1  ;;  %v2091_v9 = vld [vmem:[#allocation10 + $0x1d0] sm:$0xff]  ;;  %3489 = vmatprep.subr.bf16.mxu0 %v2296_v10  ;;  %v2094_v20 = vld [vmem:[#allocation10 + $0x1e8] sm:$0xff] }
 0x58d   :  { %v2057_v22 = vadd.f32 %v2043_v11, %v2030_v19  ;;  %v2288_v11 = vunpack.c.l.s8.bf16 %v2280_v35  ;;  %v2149_v13 = vunpack.c.l.s8.bf16 %v2091_v9  ;;  %v2152_v19 = vunpack.c.h.s8.bf16 %v2092_v4  ;;  %v2285_v28 = vld [vmem:[#allocation14 + $0x68] sm:$0xff] }
 0x58e   :  { %v2060_v12 = vmax.f32 %v2056_v21, 0.0  ;;  %v2151_v21 = vunpack.c.h.s8.bf16 %v2091_v9  ;;  %v2298_v24 = vunpack.c.l.s8.bf16 %v2285_v28  ;;  %v2377_v9 = vld [vmem:[#allocation5 + $0x850] sm:$0xff] }
 0x58f   :  { %v2061_v25 = vmax.f32 %v2057_v22, 0.0  ;;  %3490 = vmatpush3.bf16.msra.mxu0 %v2288_v11  ;;  %v2281_v22 = vld [vmem:[#allocation14 + $0x48] sm:$0xff]  ;;  %v2513_v10 = vunpack.c.l.s8.bf16 %v2377_v9  ;;  %v2518_v11 = vunpack.c.h.s8.bf16 %v2378_v7 }
 0x590   :  { %v2161_v29 = vpack.c.bf16 %v2060_v12, %v2060_v12  ;;  %3491 = vmatprep.subr.bf16.mxu0 %v2297_v17  ;;  %v2154_v12 = vunpack.c.l.s8.bf16 %v2094_v20  ;;  %v2517_v17 = vunpack.c.h.s8.bf16 %v2377_v9 }
 0x591   :  { %v2162_v14 = vpack.c.bf16 %v2061_v25, %v2061_v25  ;;  %v2290_v25 = vunpack.c.l.s8.bf16 %v2281_v22 }
 0x593   :  { %2197 = vmatprep.mubr.bf16.mxu1 %v2162_v14  ;;  %3492 = vmatpush3.bf16.msra.mxu0 %v2289_v18  ;;  %v2153_v14 = vunpack.c.l.s8.bf16 %v2093_v23 }
 0x594   :  { %2198 = vmatmul.mubr.bf16.vlgmr.msra.gmra.mrb[16].mxu1 %v2161_v29  ;;  %3493 = vmatprep.subr.bf16.mxu0 %v2298_v24  ;;  %v2291_v29 = vunpack.c.h.s8.bf16 %v2281_v22 }
 0x595   :  { %2207 = vmatpush1.bf16.msra.mxu1 %v2129_v27  ;;  %2238 = vmatprep.mubr.bf16.mxu1 %v2164_v33  ;;  %v2299_v27 = vunpack.c.h.s8.bf16 %v2285_v28  ;;  %v2156_v33 = vunpack.c.h.s8.bf16 %v2094_v20  ;;  %v2386_v28 = vld [vmem:[#allocation5 + $0x898] sm:$0xff] }
 0x596   :  { %2208 = vmatprep.subr.bf16.mxu1 %v2132_v30  ;;  %v2020_v30 = vrot.slane %v4265_v3, %v4223_v31 }
 0x597   :  { %3494 = vmatpush3.bf16.msra.mxu0 %v2290_v25  ;;  %v2534_v25 = vunpack.c.h.s8.bf16 %v2386_v28 }
 0x598   :  { %3495 = vmatprep.subr.bf16.mxu0 %v2299_v27 }
 0x599   :  { %2209 = vmatpush1.bf16.msra.mxu1 %v2131_v36  ;;  %v2047_v36 = vrot.slane %v4269_v5, %v4223_v31  ;;  %v2160_v5 = vunpack.c.h.s8.bf16 %v2096_v34 }
 0x59a   :  { %2210 = vmatprep.subr.bf16.mxu1 %v2134_v37  ;;  %v2155_v37 = vunpack.c.h.s8.bf16 %v2093_v23  ;;  %v2385_v23 = vld [vmem:[#allocation5 + $0x890] sm:$0xff] }
 0x59b   :  { %3496 = vmatpush3.bf16.msra.mxu0 %v2291_v29  ;;  %v2529_v24 = vunpack.c.l.s8.bf16 %v2385_v23  ;;  %v2533_v27 = vunpack.c.h.s8.bf16 %v2385_v23 }
 0x59d   :  { %2211 = vmatpush1.bf16.msra.mxu1 %v2133_v39  ;;  %v2282_v39 = vld [vmem:[#allocation14 + $0x50] sm:$0xff] }
 0x59e   :  { %2212 = vmatprep.subr.bf16.mxu1 %v2136_v40  ;;  %v2031_v40 = vmul.f32 %v2020_v30, %v4260_v58  ;;  %v2292_v45 = vunpack.c.l.s8.bf16 %v2282_v39  ;;  %v2389_v30 = vld [vmem:[#allocation5 + $0x8b0] sm:$0xff] }
 0x5a0   :  { %v2058_v48 = vadd.f32 %v2047_v36, %v2031_v40  ;;  %v2394_v36 = vld [vmem:[#allocation5 + $0x8d8] sm:$0xff] }
 0x5a1   :  { %2213 = vmatpush1.bf16.msra.mxu1 %v2135_v26  ;;  %v2095_v26 = vld [vmem:[#allocation10 + $0x1f0] sm:$0xff] }
 0x5a2   :  { %2214 = vmatprep.subr.bf16.mxu1 %v2138_v43  ;;  %v2300_v43 = vunpack.c.l.s8.bf16 %v2286_v38  ;;  %v2157_v3 = vunpack.c.l.s8.bf16 %v2095_v26  ;;  %v2062_v58 = vmax.f32 %v2058_v48, 0.0  ;;  %v2402_v48 = vld [vmem:[#allocation5 + $0x918] sm:$0xff] }
 0x5a4   :  { %3497 = vmatprep.subr.bf16.mxu0 %v2300_v43  ;;  %v2163_v56 = vpack.c.bf16 %v2062_v58, %v2062_v58 }
 0x5a5   :  { %2215 = vmatpush1.bf16.msra.mxu1 %v2137_v46  ;;  %3498 = vmatpush3.bf16.msra.mxu0 %v2292_v45  ;;  %v2301_v46 = vunpack.c.h.s8.bf16 %v2286_v38  ;;  %v2546_v38 = vunpack.c.l.s8.bf16 %v2394_v36 }
 0x5a6   :  { %2216 = vmatprep.subr.bf16.mxu1 %v2140_v47  ;;  %v2293_v47 = vunpack.c.h.s8.bf16 %v2282_v39  ;;  %v2393_v39 = vld [vmem:[#allocation5 + $0x8d0] sm:$0xff] }
 0x5a7   :  { %3499 = vmatprep.subr.bf16.mxu0 %v2301_v46  ;;  %v2545_v40 = vunpack.c.l.s8.bf16 %v2393_v39  ;;  %v2549_v43 = vunpack.c.h.s8.bf16 %v2393_v39 }
 0x5a9   :  { %2217 = vmatpush1.bf16.msra.mxu1 %v2139_v50  ;;  %v2370_v50 = vld [vmem:[#allocation5 + $0x818] sm:$0xff]  ;;  %3500 = vmatpush3.bf16.msra.mxu0 %v2293_v47 }
 0x5aa   :  { %2218 = vmatprep.subr.bf16.mxu1 %v2142_v53  ;;  %v2159_v53 = vunpack.c.h.s8.bf16 %v2095_v26  ;;  %v2498_v54 = vunpack.c.l.s8.bf16 %v2370_v50  ;;  %v2398_v26 = vld [vmem:[#allocation5 + $0x8f8] sm:$0xff] }
 0x5ab   :  { %v2554_v45 = vunpack.c.l.s8.bf16 %v2398_v26  ;;  %v2558_v47 = vunpack.c.h.s8.bf16 %v2398_v26 }
 0x5ad   :  { %2219 = vmatpush1.bf16.msra.mxu1 %v2141_v55  ;;  %v2369_v55 = vld [vmem:[#allocation5 + $0x810] sm:$0xff] }
 0x5ae   :  { %2220 = vmatprep.subr.bf16.mxu1 %v2144_v63  ;;  %v2497_v63 = vunpack.c.l.s8.bf16 %v2369_v55  ;;  %v2501_v60 = vunpack.c.h.s8.bf16 %v2369_v55  ;;  %v2406_v55 = vld [vmem:[#allocation5 + $0x938] sm:$0xff] }
 0x5b1   :  { %2221 = vmatpush1.bf16.msra.mxu1 %v2143_v57  ;;  %v2502_v57 = vunpack.c.h.s8.bf16 %v2370_v50  ;;  %v2562_v50 = vunpack.c.l.s8.bf16 %v2402_v48 }
 0x5b2   :  { %2222 = vmatprep.subr.bf16.mxu1 %v2146_v41  ;;  %v2374_v41 = vld [vmem:[#allocation5 + $0x838] sm:$0xff] }
 0x5b5   :  { %2223 = vmatpush1.bf16.msra.mxu1 %v2145_v0  ;;  %v2506_v0 = vunpack.c.l.s8.bf16 %v2374_v41 }
 0x5b6   :  { %2224 = vmatprep.subr.bf16.mxu1 %v2148_v2  ;;  %v2373_v2 = vld [vmem:[#allocation5 + $0x830] sm:$0xff] }
 0x5b7   :  { %v2505_v4 = vunpack.c.l.s8.bf16 %v2373_v2  ;;  %v2509_v35 = vunpack.c.h.s8.bf16 %v2373_v2 }
 0x5b9   :  { %2225 = vmatpush1.bf16.msra.mxu1 %v2147_v6  ;;  %v2510_v6 = vunpack.c.h.s8.bf16 %v2374_v41 }
 0x5ba   :  { %2226 = vmatprep.subr.bf16.mxu1 %v2150_v8  ;;  %v2514_v8 = vunpack.c.l.s8.bf16 %v2378_v7 }
 0x5bd   :  { %2227 = vmatpush1.bf16.msra.mxu1 %v2149_v13  ;;  %v2382_v13 = vld [vmem:[#allocation5 + $0x878] sm:$0xff] }
 0x5be   :  { %2228 = vmatprep.subr.bf16.mxu1 %v2152_v19  ;;  %v2522_v18 = vunpack.c.l.s8.bf16 %v2382_v13  ;;  %v2381_v19 = vld [vmem:[#allocation5 + $0x870] sm:$0xff] }
 0x5bf   :  { %v2521_v20 = vunpack.c.l.s8.bf16 %v2381_v19  ;;  %v2525_v22 = vunpack.c.h.s8.bf16 %v2381_v19 }
 0x5c1   :  { %2229 = vmatpush1.bf16.msra.mxu1 %v2151_v21  ;;  %v2526_v21 = vunpack.c.h.s8.bf16 %v2382_v13  ;;  %v2287_v13 = vld [vmem:[#allocation14 + $0x78] sm:$0xff] }
 0x5c2   :  { %2230 = vmatprep.subr.bf16.mxu1 %v2154_v12  ;;  %v2530_v12 = vunpack.c.l.s8.bf16 %v2386_v28  ;;  %v2418_v28 = vld [vmem:[#allocation5 + $0x998] sm:$0xff] }
 0x5c5   :  { %2231 = vmatpush1.bf16.msra.mxu1 %v2153_v14  ;;  %v2390_v14 = vld [vmem:[#allocation5 + $0x8b8] sm:$0xff] }
 0x5c6   :  { %2232 = vmatprep.subr.bf16.mxu1 %v2156_v33  ;;  %v2538_v29 = vunpack.c.l.s8.bf16 %v2390_v14  ;;  %v2537_v33 = vunpack.c.l.s8.bf16 %v2389_v30  ;;  %v2542_v34 = vunpack.c.h.s8.bf16 %v2390_v14  ;;  %v4290_v14 = vld [vmem:[#allocation5 + $0x808] sm:$0xff] }
 0x5c9   :  { %2233 = vmatpush1.bf16.msra.mxu1 %v2155_v37  ;;  %v2541_v37 = vunpack.c.h.s8.bf16 %v2389_v30  ;;  %v2598_v30 = vunpack.c.h.s8.bf16 %v2418_v28 }
 0x5ca   :  { %2234 = vmatprep.subr.bf16.mxu1 %v2158_v42  ;;  %v2550_v42 = vunpack.c.h.s8.bf16 %v2394_v36 }
 0x5cd   :  { %2235 = vmatpush1.bf16.msra.mxu1 %v2157_v3  ;;  %v2397_v3 = vld [vmem:[#allocation5 + $0x8f0] sm:$0xff] }
 0x5ce   :  { %2236 = vmatprep.subr.bf16.mxu1 %v2160_v5  ;;  %v2553_v46 = vunpack.c.l.s8.bf16 %v2397_v3  ;;  %v2557_v5 = vunpack.c.h.s8.bf16 %v2397_v3 }
 0x5d1   :  { %2237 = vmatpush1.bf16.msra.mxu1 %v2159_v53  ;;  %v2401_v53 = vld [vmem:[#allocation5 + $0x910] sm:$0xff] }
 0x5d2   :  { %2915 = vmatprep.subr.bf16.mxu1 %v2498_v54  ;;  %v2561_v58 = vunpack.c.l.s8.bf16 %v2401_v53  ;;  %v2566_v54 = vunpack.c.h.s8.bf16 %v2402_v48 }
 0x5d4   :  { %2239 = vmatmul.mubr.bf16.vlgmr.msra.gmra.mrb[16].mxu1 %v2163_v56  ;;  %v2570_v56 = vunpack.c.l.s8.bf16 %v2406_v55 }
 0x5d5   :  { %2916 = vmatpush1.bf16.msra.mxu1 %v2497_v63  ;;  %2947 = vmatprep.mubr.bf16.mxu1 %v4131_v51  ;;  %v2565_v63 = vunpack.c.h.s8.bf16 %v2401_v53 }
 0x5d6   :  { %2917 = vmatprep.subr.bf16.mxu1 %v2502_v57  ;;  %v2405_v57 = vld [vmem:[#allocation5 + $0x930] sm:$0xff] }
 0x5d7   :  { %v2569_v41 = vunpack.c.l.s8.bf16 %v2405_v57  ;;  %v2573_v2 = vunpack.c.h.s8.bf16 %v2405_v57 }
 0x5d9   :  { %2918 = vmatpush1.bf16.msra.mxu1 %v2501_v60  ;;  %v2574_v60 = vunpack.c.h.s8.bf16 %v2406_v55 }
 0x5da   :  { %2919 = vmatprep.subr.bf16.mxu1 %v2506_v0  ;;  %v2410_v0 = vld [vmem:[#allocation5 + $0x958] sm:$0xff] }
 0x5dd   :  { %2920 = vmatpush1.bf16.msra.mxu1 %v2505_v4  ;;  %v2578_v4 = vunpack.c.l.s8.bf16 %v2410_v0 }
 0x5de   :  { %2921 = vmatprep.subr.bf16.mxu1 %v2510_v6  ;;  %v2409_v6 = vld [vmem:[#allocation5 + $0x950] sm:$0xff] }
 0x5df   :  { %v2577_v7 = vunpack.c.l.s8.bf16 %v2409_v6  ;;  %v2581_v9 = vunpack.c.h.s8.bf16 %v2409_v6 }
 0x5e1   :  { %2922 = vmatpush1.bf16.msra.mxu1 %v2509_v35  ;;  %v2582_v35 = vunpack.c.h.s8.bf16 %v2410_v0 }
 0x5e2   :  { %2923 = vmatprep.subr.bf16.mxu1 %v2514_v8  ;;  %v2414_v8 = vld [vmem:[#allocation5 + $0x978] sm:$0xff] }
 0x5e5   :  { %2924 = vmatpush1.bf16.msra.mxu1 %v2513_v10  ;;  %v2586_v10 = vunpack.c.l.s8.bf16 %v2414_v8 }
 0x5e6   :  { %2925 = vmatprep.subr.bf16.mxu1 %v2518_v11  ;;  %v2413_v11 = vld [vmem:[#allocation5 + $0x970] sm:$0xff] }
 0x5e7   :  { %v2589_v23 = vunpack.c.h.s8.bf16 %v2413_v11 }
 0x5e9   :  { %2926 = vmatpush1.bf16.msra.mxu1 %v2517_v17  ;;  %v2302_v17 = vunpack.c.l.s8.bf16 %v2287_v13 }
 0x5ea   :  { %2927 = vmatprep.subr.bf16.mxu1 %v2522_v18  ;;  %v2283_v18 = vld [vmem:[#allocation14 + $0x58] sm:$0xff] }
 0x5eb   :  { %v2294_v19 = vunpack.c.l.s8.bf16 %v2283_v18  ;;  %3501 = vmatprep.subr.bf16.mxu0 %v2302_v17 }
 0x5ed   :  { %2928 = vmatpush1.bf16.msra.mxu1 %v2521_v20  ;;  %v2585_v20 = vunpack.c.l.s8.bf16 %v2413_v11  ;;  %3502 = vmatpush3.bf16.msra.mxu0 %v2294_v19  ;;  %v2445_v19 = vld [vmem:[#allocation5 + $0xa70] sm:$0xff] }
 0x5ee   :  { %2929 = vmatprep.subr.bf16.mxu1 %v2526_v21  ;;  %v2590_v21 = vunpack.c.h.s8.bf16 %v2414_v8 }
 0x5f1   :  { %2930 = vmatpush1.bf16.msra.mxu1 %v2525_v22  ;;  %v2303_v22 = vunpack.c.h.s8.bf16 %v2287_v13  ;;  %v2446_v13 = vld [vmem:[#allocation5 + $0xa78] sm:$0xff] }
 0x5f2   :  { %2931 = vmatprep.subr.bf16.mxu1 %v2530_v12  ;;  %v2295_v12 = vunpack.c.h.s8.bf16 %v2283_v18  ;;  %v2650_v18 = vunpack.c.l.s8.bf16 %v2446_v13 }
 0x5f3   :  { %3503 = vmatprep.subr.bf16.mxu0 %v2303_v22  ;;  %v2653_v22 = vunpack.c.h.s8.bf16 %v2445_v19 }
 0x5f4   :  { %3504 = vmatpush3.bf16.msra.mxu0 %v2295_v12 }
 0x5f5   :  { %2932 = vmatpush1.bf16.msra.mxu1 %v2529_v24  ;;  %v2594_v24 = vunpack.c.l.s8.bf16 %v2418_v28  ;;  %v2450_v28 = vld [vmem:[#allocation5 + $0xa98] sm:$0xff] }
 0x5f6   :  { %2933 = vmatprep.subr.bf16.mxu1 %v2534_v25  ;;  %v2417_v25 = vld [vmem:[#allocation5 + $0x990] sm:$0xff]  ;;  %v2658_v12 = vunpack.c.l.s8.bf16 %v2450_v28 }
 0x5f9   :  { %2934 = vmatpush1.bf16.msra.mxu1 %v2533_v27  ;;  %v2496_v27 = vunpack.c.l.s8.bf16 %v4290_v14 }
 0x5fa   :  { %2935 = vmatprep.subr.bf16.mxu1 %v2538_v29  ;;  %v2593_v29 = vunpack.c.l.s8.bf16 %v2417_v25 }
 0x5fb   :  { %2751 = vmatprep.subr.bf16.mxu0 %v2496_v27  ;;  %v2454_v27 = vld [vmem:[#allocation5 + $0xab8] sm:$0xff] }
 0x5fd   :  { %2936 = vmatpush1.bf16.msra.mxu1 %v2537_v33  ;;  %v2422_v33 = vld [vmem:[#allocation5 + $0x9b8] sm:$0xff] }
 0x5fe   :  { %2937 = vmatprep.subr.bf16.mxu1 %v2542_v34  ;;  %v2597_v34 = vunpack.c.h.s8.bf16 %v2417_v25  ;;  %v2602_v36 = vunpack.c.l.s8.bf16 %v2422_v33  ;;  %v2606_v39 = vunpack.c.h.s8.bf16 %v2422_v33  ;;  %v2662_v25 = vunpack.c.h.s8.bf16 %v2450_v28  ;;  %v2453_v33 = vld [vmem:[#allocation5 + $0xab0] sm:$0xff] }
 0x601   :  { %2938 = vmatpush1.bf16.msra.mxu1 %v2541_v37  ;;  %v2421_v37 = vld [vmem:[#allocation5 + $0x9b0] sm:$0xff] }
 0x602   :  { %2939 = vmatprep.subr.bf16.mxu1 %v2546_v38  ;;  %v2601_v38 = vunpack.c.l.s8.bf16 %v2421_v37 }
 0x605   :  { %2940 = vmatpush1.bf16.msra.mxu1 %v2545_v40  ;;  %v2426_v40 = vld [vmem:[#allocation5 + $0x9d8] sm:$0xff] }
 0x606   :  { %2941 = vmatprep.subr.bf16.mxu1 %v2550_v42  ;;  %v2605_v42 = vunpack.c.h.s8.bf16 %v2421_v37  ;;  %v2610_v26 = vunpack.c.l.s8.bf16 %v2426_v40  ;;  %v2614_v3 = vunpack.c.h.s8.bf16 %v2426_v40  ;;  %v2458_v37 = vld [vmem:[#allocation5 + $0xad8] sm:$0xff]  ;;  %v2457_v40 = vld [vmem:[#allocation5 + $0xad0] sm:$0xff] }
 0x609   :  { %2942 = vmatpush1.bf16.msra.mxu1 %v2549_v43  ;;  %v2425_v43 = vld [vmem:[#allocation5 + $0x9d0] sm:$0xff] }
 0x60a   :  { %2943 = vmatprep.subr.bf16.mxu1 %v2554_v45  ;;  %v2609_v45 = vunpack.c.l.s8.bf16 %v2425_v43 }
 0x60d   :  { %2944 = vmatpush1.bf16.msra.mxu1 %v2553_v46  ;;  %v2430_v46 = vld [vmem:[#allocation5 + $0x9f8] sm:$0xff] }
 0x60e   :  { %2945 = vmatprep.subr.bf16.mxu1 %v2558_v47  ;;  %v2613_v47 = vunpack.c.h.s8.bf16 %v2425_v43  ;;  %v2618_v48 = vunpack.c.l.s8.bf16 %v2430_v46  ;;  %v2622_v53 = vunpack.c.h.s8.bf16 %v2430_v46  ;;  %v2462_v43 = vld [vmem:[#allocation5 + $0xaf8] sm:$0xff]  ;;  %v2461_v46 = vld [vmem:[#allocation5 + $0xaf0] sm:$0xff] }
 0x611   :  { %2946 = vmatpush1.bf16.msra.mxu1 %v2557_v5  ;;  %v2429_v5 = vld [vmem:[#allocation5 + $0x9f0] sm:$0xff] }
 0x612   :  { %2956 = vmatprep.subr.bf16.mxu1 %v2562_v50  ;;  %v2617_v50 = vunpack.c.l.s8.bf16 %v2429_v5 }
 0x614   :  { %2948 = vmatmul.mubr.bf16.vlgmr.msra.gmra.mrb[20].mxu1 %v4150_v49 }
 0x615   :  { %2957 = vmatpush1.bf16.msra.mxu1 %v2561_v58  ;;  %2988 = vmatprep.mubr.bf16.mxu1 %v4136_v52  ;;  %v2434_v58 = vld [vmem:[#allocation5 + $0xa18] sm:$0xff] }
 0x616   :  { %2958 = vmatprep.subr.bf16.mxu1 %v2566_v54  ;;  %v2621_v54 = vunpack.c.h.s8.bf16 %v2429_v5  ;;  %v2626_v55 = vunpack.c.l.s8.bf16 %v2434_v58  ;;  %v2630_v57 = vunpack.c.h.s8.bf16 %v2434_v58  ;;  %v2466_v5 = vld [vmem:[#allocation5 + $0xb18] sm:$0xff]  ;;  %v2465_v58 = vld [vmem:[#allocation5 + $0xb10] sm:$0xff] }
 0x619   :  { %2959 = vmatpush1.bf16.msra.mxu1 %v2565_v63  ;;  %v2433_v63 = vld [vmem:[#allocation5 + $0xa10] sm:$0xff] }
 0x61a   :  { %2960 = vmatprep.subr.bf16.mxu1 %v2570_v56  ;;  %v2625_v56 = vunpack.c.l.s8.bf16 %v2433_v63 }
 0x61d   :  { %2961 = vmatpush1.bf16.msra.mxu1 %v2569_v41  ;;  %v2438_v41 = vld [vmem:[#allocation5 + $0xa38] sm:$0xff] }
 0x61e   :  { %2962 = vmatprep.subr.bf16.mxu1 %v2574_v60  ;;  %v2629_v60 = vunpack.c.h.s8.bf16 %v2433_v63  ;;  %v2634_v0 = vunpack.c.l.s8.bf16 %v2438_v41  ;;  %v2638_v6 = vunpack.c.h.s8.bf16 %v2438_v41  ;;  %v2470_v63 = vld [vmem:[#allocation5 + $0xb38] sm:$0xff]  ;;  %v2469_v41 = vld [vmem:[#allocation5 + $0xb30] sm:$0xff] }
 0x621   :  { %2963 = vmatpush1.bf16.msra.mxu1 %v2573_v2  ;;  %v2437_v2 = vld [vmem:[#allocation5 + $0xa30] sm:$0xff] }
 0x622   :  { %2964 = vmatprep.subr.bf16.mxu1 %v2578_v4  ;;  %v2633_v4 = vunpack.c.l.s8.bf16 %v2437_v2 }
 0x625   :  { %2965 = vmatpush1.bf16.msra.mxu1 %v2577_v7  ;;  %v2442_v7 = vld [vmem:[#allocation5 + $0xa58] sm:$0xff] }
 0x626   :  { %2966 = vmatprep.subr.bf16.mxu1 %v2582_v35  ;;  %v2637_v35 = vunpack.c.h.s8.bf16 %v2437_v2  ;;  %v2642_v8 = vunpack.c.l.s8.bf16 %v2442_v7  ;;  %v2646_v11 = vunpack.c.h.s8.bf16 %v2442_v7  ;;  %v2474_v2 = vld [vmem:[#allocation5 + $0xb58] sm:$0xff]  ;;  %v2473_v7 = vld [vmem:[#allocation5 + $0xb50] sm:$0xff] }
 0x629   :  { %2967 = vmatpush1.bf16.msra.mxu1 %v2581_v9  ;;  %v2441_v9 = vld [vmem:[#allocation5 + $0xa50] sm:$0xff] }
 0x62a   :  { %2968 = vmatprep.subr.bf16.mxu1 %v2586_v10  ;;  %v2641_v10 = vunpack.c.l.s8.bf16 %v2441_v9  ;;  %v2645_v17 = vunpack.c.h.s8.bf16 %v2441_v9  ;;  %v2710_v9 = vunpack.c.h.s8.bf16 %v2474_v2 }
 0x62d   :  { %2969 = vmatpush1.bf16.msra.mxu1 %v2585_v20  ;;  %v2649_v20 = vunpack.c.l.s8.bf16 %v2445_v19 }
 0x62e   :  { %2970 = vmatprep.subr.bf16.mxu1 %v2590_v21  ;;  %v2654_v21 = vunpack.c.h.s8.bf16 %v2446_v13 }
 0x631   :  { %2971 = vmatpush1.bf16.msra.mxu1 %v2589_v23  ;;  %v2449_v23 = vld [vmem:[#allocation5 + $0xa90] sm:$0xff] }
 0x632   :  { %2972 = vmatprep.subr.bf16.mxu1 %v2594_v24  ;;  %v2657_v24 = vunpack.c.l.s8.bf16 %v2449_v23 }
 0x635   :  { %2973 = vmatpush1.bf16.msra.mxu1 %v2593_v29  ;;  %v2661_v29 = vunpack.c.h.s8.bf16 %v2449_v23 }
 0x636   :  { %2974 = vmatprep.subr.bf16.mxu1 %v2598_v30  ;;  %v2666_v30 = vunpack.c.l.s8.bf16 %v2454_v27 }
 0x639   :  { %2975 = vmatpush1.bf16.msra.mxu1 %v2597_v34  ;;  %v2665_v34 = vunpack.c.l.s8.bf16 %v2453_v33 }
 0x63a   :  { %2976 = vmatprep.subr.bf16.mxu1 %v2602_v36  ;;  %v2670_v36 = vunpack.c.h.s8.bf16 %v2454_v27 }
 0x63d   :  { %2977 = vmatpush1.bf16.msra.mxu1 %v2601_v38  ;;  %v2669_v38 = vunpack.c.h.s8.bf16 %v2453_v33 }
 0x63e   :  { %2978 = vmatprep.subr.bf16.mxu1 %v2606_v39  ;;  %v2674_v39 = vunpack.c.l.s8.bf16 %v2458_v37 }
 0x641   :  { %2979 = vmatpush1.bf16.msra.mxu1 %v2605_v42  ;;  %v2673_v42 = vunpack.c.l.s8.bf16 %v2457_v40 }
 0x642   :  { %2980 = vmatprep.subr.bf16.mxu1 %v2610_v26  ;;  %v2678_v26 = vunpack.c.h.s8.bf16 %v2458_v37 }
 0x645   :  { %2981 = vmatpush1.bf16.msra.mxu1 %v2609_v45  ;;  %v2677_v45 = vunpack.c.h.s8.bf16 %v2457_v40 }
 0x646   :  { %2982 = vmatprep.subr.bf16.mxu1 %v2614_v3  ;;  %v2682_v3 = vunpack.c.l.s8.bf16 %v2462_v43 }
 0x649   :  { %2983 = vmatpush1.bf16.msra.mxu1 %v2613_v47  ;;  %v2681_v47 = vunpack.c.l.s8.bf16 %v2461_v46 }
 0x64a   :  { %2984 = vmatprep.subr.bf16.mxu1 %v2618_v48  ;;  %v2686_v48 = vunpack.c.h.s8.bf16 %v2462_v43 }
 0x64d   :  { %2985 = vmatpush1.bf16.msra.mxu1 %v2617_v50  ;;  %v2685_v50 = vunpack.c.h.s8.bf16 %v2461_v46  ;;  %v2500_v46 = vunpack.c.h.s8.bf16 %v4290_v14  ;;  %v2485_v14 = vld [vmem:[#allocation5 + $0xbb0] sm:$0xff] }
 0x64e   :  { %2986 = vmatprep.subr.bf16.mxu1 %v2622_v53  ;;  %v2690_v53 = vunpack.c.l.s8.bf16 %v2466_v5 }
 0x651   :  { %2987 = vmatpush1.bf16.msra.mxu1 %v2621_v54  ;;  %v2689_v54 = vunpack.c.l.s8.bf16 %v2465_v58 }
 0x652   :  { %2997 = vmatprep.subr.bf16.mxu1 %v2626_v55  ;;  %v2694_v55 = vunpack.c.h.s8.bf16 %v2466_v5 }
 0x654   :  { %2989 = vmatmul.mubr.bf16.vlgmr.msra.gmra.mrb[20].mxu1 %v4156_v59 }
 0x655   :  { %2998 = vmatpush1.bf16.msra.mxu1 %v2625_v56  ;;  %3029 = vmatprep.mubr.bf16.mxu1 %v4159_v1  ;;  %v2693_v56 = vunpack.c.h.s8.bf16 %v2465_v58 }
 0x656   :  { %2999 = vmatprep.subr.bf16.mxu1 %v2630_v57  ;;  %v2698_v57 = vunpack.c.l.s8.bf16 %v2470_v63 }
 0x659   :  { %3000 = vmatpush1.bf16.msra.mxu1 %v2629_v60  ;;  %v2697_v60 = vunpack.c.l.s8.bf16 %v2469_v41 }
 0x65a   :  { %3001 = vmatprep.subr.bf16.mxu1 %v2634_v0  ;;  %v2702_v0 = vunpack.c.h.s8.bf16 %v2470_v63 }
 0x65d   :  { %3002 = vmatpush1.bf16.msra.mxu1 %v2633_v4  ;;  %v2701_v4 = vunpack.c.h.s8.bf16 %v2469_v41  ;;  %v2376_v41 = vld [vmem:[#allocation5 + $0x848] sm:$0xff] }
 0x65e   :  { %3003 = vmatprep.subr.bf16.mxu1 %v2638_v6  ;;  %v2706_v6 = vunpack.c.l.s8.bf16 %v2474_v2  ;;  %v2490_v2 = vld [vmem:[#allocation5 + $0xbd8] sm:$0xff] }
 0x661   :  { %3004 = vmatpush1.bf16.msra.mxu1 %v2637_v35  ;;  %v2248_v35 = vld [vmem:[#allocation11 + $0x2] sm:$0x3] }
 0x662   :  { %3005 = vmatprep.subr.bf16.mxu1 %v2642_v8  ;;  %v2705_v8 = vunpack.c.l.s8.bf16 %v2473_v7  ;;  %v2253_v13 = vrot.slane %v2248_v35, %v4199_v61 }
 0x665   :  { %3006 = vmatpush1.bf16.msra.mxu1 %v2641_v10  ;;  %v2263_v10 = vld [vmem:[#allocation13 + $0x2] sm:$0x3] }
 0x666   :  { %3007 = vmatprep.subr.bf16.mxu1 %v2646_v11  ;;  %v2478_v11 = vld [vmem:[#allocation5 + $0xb78] sm:$0xff]  ;;  %v2268_v19 = vrot.slane %v2263_v10, %v4199_v61 }
 0x667   :  { %v2718_v33 = vunpack.c.h.s8.bf16 %v2478_v11 }
 0x669   :  { %3008 = vmatpush1.bf16.msra.mxu1 %v2645_v17  ;;  %v2257_v17 = vrot.slane %v2248_v35, %v4202_v62  ;;  %v2738_v35 = vunpack.c.l.s8.bf16 %v2490_v2 }
 0x66a   :  { %3009 = vmatprep.subr.bf16.mxu1 %v2650_v18  ;;  %v2709_v18 = vunpack.c.h.s8.bf16 %v2473_v7  ;;  %v2733_v7 = vunpack.c.h.s8.bf16 %v2485_v14 }
 0x66d   :  { %3010 = vmatpush1.bf16.msra.mxu1 %v2649_v20  ;;  %v2714_v20 = vunpack.c.l.s8.bf16 %v2478_v11  ;;  %v2380_v11 = vld [vmem:[#allocation5 + $0x868] sm:$0xff] }
 0x66e   :  { %3011 = vmatprep.subr.bf16.mxu1 %v2654_v21  ;;  %v2477_v21 = vld [vmem:[#allocation5 + $0xb70] sm:$0xff] }
 0x66f   :  { %v2713_v27 = vunpack.c.l.s8.bf16 %v2477_v21  ;;  %v2717_v40 = vunpack.c.h.s8.bf16 %v2477_v21  ;;  %v2379_v21 = vld [vmem:[#allocation5 + $0x860] sm:$0xff] }
 0x671   :  { %3012 = vmatpush1.bf16.msra.mxu1 %v2653_v22  ;;  %v2272_v22 = vrot.slane %v2263_v10, %v4202_v62  ;;  %v2516_v10 = vunpack.c.h.s8.bf16 %v2376_v41 }
 0x672   :  { %3013 = vmatprep.subr.bf16.mxu1 %v2658_v12 }
 0x675   :  { %3014 = vmatpush1.bf16.msra.mxu1 %v2657_v24 }
 0x676   :  { %3015 = vmatprep.subr.bf16.mxu1 %v2662_v25 }
 0x679   :  { %3016 = vmatpush1.bf16.msra.mxu1 %v2661_v29 }
 0x67a   :  { %3017 = vmatprep.subr.bf16.mxu1 %v2666_v30 }
 0x67d   :  { %3018 = vmatpush1.bf16.msra.mxu1 %v2665_v34 }
 0x67e   :  { %3019 = vmatprep.subr.bf16.mxu1 %v2670_v36  ;;  %v2482_v36 = vld [vmem:[#allocation5 + $0xb98] sm:$0xff] }
 0x67f   :  { %v2726_v5 = vunpack.c.h.s8.bf16 %v2482_v36 }
 0x681   :  { %3020 = vmatpush1.bf16.msra.mxu1 %v2669_v38  ;;  %v2367_v38 = vld [vmem:[#allocation5 + $0x800] sm:$0xff] }
 0x682   :  { %3021 = vmatprep.subr.bf16.mxu1 %v2674_v39 }
 0x685   :  { %3022 = vmatpush1.bf16.msra.mxu1 %v2673_v42  ;;  %v2722_v42 = vunpack.c.l.s8.bf16 %v2482_v36 }
 0x686   :  { %3023 = vmatprep.subr.bf16.mxu1 %v2678_v26  ;;  %v2481_v26 = vld [vmem:[#allocation5 + $0xb90] sm:$0xff] }
 0x689   :  { %3024 = vmatpush1.bf16.msra.mxu1 %v2677_v45  ;;  %v2495_v45 = vunpack.c.l.s8.bf16 %v2367_v38 }
 0x68a   :  { %3025 = vmatprep.subr.bf16.mxu1 %v2682_v3 }
 0x68d   :  { %3026 = vmatpush1.bf16.msra.mxu1 %v2681_v47  ;;  %v2372_v47 = vld [vmem:[#allocation5 + $0x828] sm:$0xff] }
 0x68e   :  { %3027 = vmatprep.subr.bf16.mxu1 %v2686_v48  ;;  %v2721_v48 = vunpack.c.l.s8.bf16 %v2481_v26  ;;  %v2504_v58 = vunpack.c.l.s8.bf16 %v2372_v47 }
 0x691   :  { %3028 = vmatpush1.bf16.msra.mxu1 %v2685_v50  ;;  %v2499_v50 = vunpack.c.h.s8.bf16 %v2367_v38 }
 0x692   :  { %3038 = vmatprep.subr.bf16.mxu1 %v2690_v53  ;;  %v2486_v53 = vld [vmem:[#allocation5 + $0xbb8] sm:$0xff] }
 0x693   :  { %v2730_v63 = vunpack.c.l.s8.bf16 %v2486_v53 }
 0x694   :  { %3030 = vmatmul.mubr.bf16.vlgmr.msra.gmra.mrb[20].mxu1 %v4146_v15 }
 0x695   :  { %3039 = vmatpush1.bf16.msra.mxu1 %v2689_v54  ;;  %3070 = vmatprep.mubr.bf16.mxu1 %v4167_v44  ;;  %v2371_v54 = vld [vmem:[#allocation5 + $0x820] sm:$0xff] }
 0x696   :  { %3040 = vmatprep.subr.bf16.mxu1 %v2694_v55  ;;  %v2725_v55 = vunpack.c.h.s8.bf16 %v2481_v26  ;;  %v2387_v26 = vld [vmem:[#allocation5 + $0x8a0] sm:$0xff] }
 0x699   :  { %3041 = vmatpush1.bf16.msra.mxu1 %v2693_v56  ;;  %v2503_v56 = vunpack.c.l.s8.bf16 %v2371_v54 }
 0x69a   :  { %3042 = vmatprep.subr.bf16.mxu1 %v2698_v57  ;;  %v2508_v57 = vunpack.c.h.s8.bf16 %v2372_v47 }
 0x69d   :  { %3043 = vmatpush1.bf16.msra.mxu1 %v2697_v60  ;;  %v2729_v60 = vunpack.c.l.s8.bf16 %v2485_v14 }
 0x69e   :  { %3044 = vmatprep.subr.bf16.mxu1 %v2702_v0  ;;  %v2734_v0 = vunpack.c.h.s8.bf16 %v2486_v53  ;;  %v2396_v53 = vld [vmem:[#allocation5 + $0x8e8] sm:$0xff] }
 0x69f   :  { %v2556_v14 = vunpack.c.h.s8.bf16 %v2396_v53 }
 0x6a1   :  { %3045 = vmatpush1.bf16.msra.mxu1 %v2701_v4  ;;  %v2512_v4 = vunpack.c.l.s8.bf16 %v2376_v41 }
 0x6a2   :  { %3046 = vmatprep.subr.bf16.mxu1 %v2706_v6  ;;  %v2375_v6 = vld [vmem:[#allocation5 + $0x840] sm:$0xff] }
 0x6a5   :  { %3047 = vmatpush1.bf16.msra.mxu1 %v2705_v8  ;;  %v2489_v8 = vld [vmem:[#allocation5 + $0xbd0] sm:$0xff] }
 0x6a6   :  { %3048 = vmatprep.subr.bf16.mxu1 %v2710_v9  ;;  %v2511_v9 = vunpack.c.l.s8.bf16 %v2375_v6 }
 0x6a7   :  { %v2240_v28 = vpop.f32.mrb[16].mxu1 }
 0x6a8   :  { %v2260_v12 = vmul.f32 %v2253_v13, %v2240_v28  ;;  %v2242_v23 = vpop.f32.mrb[17].mxu1  ;;  %v2737_v13 = vunpack.c.l.s8.bf16 %v2489_v8  ;;  %v2741_v28 = vunpack.c.h.s8.bf16 %v2489_v8 }
 0x6a9   :  { %v2261_v24 = vmul.f32 %v2257_v17, %v2242_v23  ;;  %v2244_v25 = vpop.f32.mrb[18].mxu1  ;;  %3049 = vmatpush1.bf16.msra.mxu1 %v2709_v18  ;;  %v2742_v17 = vunpack.c.h.s8.bf16 %v2490_v2  ;;  %v2515_v18 = vunpack.c.h.s8.bf16 %v2375_v6  ;;  %v2519_v23 = vunpack.c.l.s8.bf16 %v2379_v21  ;;  %v2404_v2 = vld [vmem:[#allocation5 + $0x928] sm:$0xff] }
 0x6aa   :  { %v2275_v29 = vadd.f32 %v2268_v19, %v2260_v12  ;;  %v2245_v30 = vpop.f32.mrb[19].mxu1  ;;  %3050 = vmatprep.subr.bf16.mxu1 %v2714_v20  ;;  %v2494_v19 = vld [vmem:[#allocation5 + $0xbf8] sm:$0xff]  ;;  %v2520_v20 = vunpack.c.l.s8.bf16 %v2380_v11  ;;  %v2493_v12 = vld [vmem:[#allocation5 + $0xbf0] sm:$0xff]  ;;  %v2384_v25 = vld [vmem:[#allocation5 + $0x888] sm:$0xff]  ;;  %v2568_v6 = vunpack.c.l.s8.bf16 %v2404_v2  ;;  %v2572_v8 = vunpack.c.h.s8.bf16 %v2404_v2 }
 0x6ab   :  { %v2276_v34 = vadd.f32 %v2272_v22, %v2261_v24  ;;  %v2746_v22 = vunpack.c.l.s8.bf16 %v2494_v19  ;;  %v2524_v24 = vunpack.c.h.s8.bf16 %v2380_v11  ;;  %v2523_v30 = vunpack.c.h.s8.bf16 %v2379_v21 }
 0x6ac   :  { %v2277_v37 = vmax.f32 %v2275_v29, 0.0  ;;  %v2750_v29 = vunpack.c.h.s8.bf16 %v2494_v19  ;;  %v2749_v36 = vunpack.c.h.s8.bf16 %v2493_v12  ;;  %v2532_v38 = vunpack.c.h.s8.bf16 %v2384_v25 }
 0x6ad   :  { %v2278_v39 = vmax.f32 %v2276_v34, 0.0  ;;  %3051 = vmatpush1.bf16.msra.mxu1 %v2713_v27  ;;  %v2745_v27 = vunpack.c.l.s8.bf16 %v2493_v12  ;;  %v2383_v34 = vld [vmem:[#allocation5 + $0x880] sm:$0xff] }
 0x6ae   :  { %3052 = vmatprep.subr.bf16.mxu1 %v2718_v33  ;;  %v2304_v3 = vpack.c.bf16 %v2277_v37, %v2277_v37  ;;  %v2528_v33 = vunpack.c.l.s8.bf16 %v2384_v25  ;;  %v2527_v37 = vunpack.c.l.s8.bf16 %v2383_v34 }
 0x6af   :  { %v2305_v43 = vpack.c.bf16 %v2278_v39, %v2278_v39  ;;  %v2388_v39 = vld [vmem:[#allocation5 + $0x8a8] sm:$0xff] }
 0x6b1   :  { %2338 = vmatprep.mubr.bf16.mxu0 %v2305_v43  ;;  %3053 = vmatpush1.bf16.msra.mxu1 %v2717_v40  ;;  %v2531_v40 = vunpack.c.h.s8.bf16 %v2383_v34  ;;  %v2535_v43 = vunpack.c.l.s8.bf16 %v2387_v26  ;;  %v2419_v34 = vld [vmem:[#allocation5 + $0x9a0] sm:$0xff] }
 0x6b2   :  { %2339 = vmatmul.mubr.bf16.vlgmr.msra.gmra.mrb[12].mxu0 %v2304_v3  ;;  %3054 = vmatprep.subr.bf16.mxu1 %v2722_v42  ;;  %v2536_v42 = vunpack.c.l.s8.bf16 %v2388_v39  ;;  %v2392_v3 = vld [vmem:[#allocation5 + $0x8c8] sm:$0xff] }
 0x6b3   :  { %2752 = vmatpush1.bf16.msra.mxu0 %v2495_v45  ;;  %2783 = vmatprep.mubr.bf16.mxu0 %v4131_v51  ;;  %v2507_v51 = vunpack.c.h.s8.bf16 %v2371_v54  ;;  %v2540_v45 = vunpack.c.h.s8.bf16 %v2388_v39  ;;  %v2544_v47 = vunpack.c.l.s8.bf16 %v2392_v3  ;;  %v2552_v54 = vunpack.c.l.s8.bf16 %v2396_v53 }
 0x6b4   :  { %2753 = vmatprep.subr.bf16.mxu0 %v2500_v46  ;;  %v2539_v46 = vunpack.c.h.s8.bf16 %v2387_v26  ;;  %v2603_v39 = vunpack.c.h.s8.bf16 %v2419_v34 }
 0x6b5   :  { %3055 = vmatpush1.bf16.msra.mxu1 %v2721_v48  ;;  %v2391_v48 = vld [vmem:[#allocation5 + $0x8c0] sm:$0xff] }
 0x6b6   :  { %3056 = vmatprep.subr.bf16.mxu1 %v2726_v5  ;;  %v2543_v5 = vunpack.c.l.s8.bf16 %v2391_v48 }
 0x6b7   :  { %2754 = vmatpush1.bf16.msra.mxu0 %v2499_v50  ;;  %v2548_v50 = vunpack.c.h.s8.bf16 %v2392_v3 }
 0x6b8   :  { %2755 = vmatprep.subr.bf16.mxu0 %v2504_v58  ;;  %v2547_v58 = vunpack.c.h.s8.bf16 %v2391_v48 }
 0x6b9   :  { %3057 = vmatpush1.bf16.msra.mxu1 %v2725_v55  ;;  %v2395_v55 = vld [vmem:[#allocation5 + $0x8e0] sm:$0xff] }
 0x6ba   :  { %3058 = vmatprep.subr.bf16.mxu1 %v2730_v63  ;;  %v2551_v63 = vunpack.c.l.s8.bf16 %v2395_v55 }
 0x6bb   :  { %2756 = vmatpush1.bf16.msra.mxu0 %v2503_v56  ;;  %v2400_v56 = vld [vmem:[#allocation5 + $0x908] sm:$0xff] }
 0x6bc   :  { %2757 = vmatprep.subr.bf16.mxu0 %v2508_v57  ;;  %v2555_v57 = vunpack.c.h.s8.bf16 %v2395_v55  ;;  %v2560_v41 = vunpack.c.l.s8.bf16 %v2400_v56 }
 0x6bd   :  { %3059 = vmatpush1.bf16.msra.mxu1 %v2729_v60  ;;  %v2399_v60 = vld [vmem:[#allocation5 + $0x900] sm:$0xff] }
 0x6be   :  { %3060 = vmatprep.subr.bf16.mxu1 %v2734_v0  ;;  %v2559_v0 = vunpack.c.l.s8.bf16 %v2399_v60 }
 0x6bf   :  { %2758 = vmatpush1.bf16.msra.mxu0 %v2507_v51  ;;  %v2564_v51 = vunpack.c.h.s8.bf16 %v2400_v56 }
 0x6c0   :  { %2759 = vmatprep.subr.bf16.mxu0 %v2512_v4  ;;  %v2563_v4 = vunpack.c.h.s8.bf16 %v2399_v60 }
 0x6c1   :  { %3061 = vmatpush1.bf16.msra.mxu1 %v2733_v7  ;;  %v2403_v7 = vld [vmem:[#allocation5 + $0x920] sm:$0xff] }
 0x6c2   :  { %3062 = vmatprep.subr.bf16.mxu1 %v2738_v35  ;;  %v2567_v35 = vunpack.c.l.s8.bf16 %v2403_v7 }
 0x6c3   :  { %2760 = vmatpush1.bf16.msra.mxu0 %v2511_v9  ;;  %v2408_v9 = vld [vmem:[#allocation5 + $0x948] sm:$0xff] }
 0x6c4   :  { %2761 = vmatprep.subr.bf16.mxu0 %v2516_v10  ;;  %v2571_v10 = vunpack.c.h.s8.bf16 %v2403_v7  ;;  %v2576_v11 = vunpack.c.l.s8.bf16 %v2408_v9 }
 0x6c5   :  { %3063 = vmatpush1.bf16.msra.mxu1 %v2737_v13  ;;  %v2407_v13 = vld [vmem:[#allocation5 + $0x940] sm:$0xff] }
 0x6c6   :  { %3064 = vmatprep.subr.bf16.mxu1 %v2742_v17  ;;  %v2575_v17 = vunpack.c.l.s8.bf16 %v2407_v13 }
 0x6c7   :  { %2762 = vmatpush1.bf16.msra.mxu0 %v2515_v18  ;;  %v2412_v18 = vld [vmem:[#allocation5 + $0x968] sm:$0xff] }
 0x6c8   :  { %2763 = vmatprep.subr.bf16.mxu0 %v2520_v20  ;;  %v2584_v19 = vunpack.c.l.s8.bf16 %v2412_v18  ;;  %v2411_v20 = vld [vmem:[#allocation5 + $0x960] sm:$0xff] }
 0x6c9   :  { %3065 = vmatpush1.bf16.msra.mxu1 %v2741_v28  ;;  %v2583_v21 = vunpack.c.l.s8.bf16 %v2411_v20  ;;  %v2588_v28 = vunpack.c.h.s8.bf16 %v2412_v18  ;;  %v2587_v12 = vunpack.c.h.s8.bf16 %v2411_v20  ;;  %v2447_v18 = vld [vmem:[#allocation5 + $0xa80] sm:$0xff]  ;;  %v2452_v20 = vld [vmem:[#allocation5 + $0xaa8] sm:$0xff] }
 0x6ca   :  { %3066 = vmatprep.subr.bf16.mxu1 %v2746_v22  ;;  %v2416_v22 = vld [vmem:[#allocation5 + $0x988] sm:$0xff] }
 0x6cb   :  { %2764 = vmatpush1.bf16.msra.mxu0 %v2519_v23  ;;  %v2592_v23 = vunpack.c.l.s8.bf16 %v2416_v22 }
 0x6cc   :  { %2765 = vmatprep.subr.bf16.mxu0 %v2524_v24  ;;  %v2415_v24 = vld [vmem:[#allocation5 + $0x980] sm:$0xff] }
 0x6cd   :  { %3067 = vmatpush1.bf16.msra.mxu1 %v2745_v27  ;;  %v2591_v25 = vunpack.c.l.s8.bf16 %v2415_v24  ;;  %v2596_v27 = vunpack.c.h.s8.bf16 %v2416_v22  ;;  %v2451_v22 = vld [vmem:[#allocation5 + $0xaa0] sm:$0xff] }
 0x6ce   :  { %3068 = vmatprep.subr.bf16.mxu1 %v2750_v29  ;;  %v2420_v29 = vld [vmem:[#allocation5 + $0x9a8] sm:$0xff] }
 0x6cf   :  { %2766 = vmatpush1.bf16.msra.mxu0 %v2523_v30  ;;  %v2595_v30 = vunpack.c.h.s8.bf16 %v2415_v24  ;;  %v2456_v24 = vld [vmem:[#allocation5 + $0xac8] sm:$0xff] }
 0x6d0   :  { %2767 = vmatprep.subr.bf16.mxu0 %v2528_v33  ;;  %v2600_v33 = vunpack.c.l.s8.bf16 %v2420_v29 }
 0x6d1   :  { %3069 = vmatpush1.bf16.msra.mxu1 %v2749_v36  ;;  %v2599_v36 = vunpack.c.l.s8.bf16 %v2419_v34  ;;  %v2460_v34 = vld [vmem:[#allocation5 + $0xae8] sm:$0xff] }
 0x6d3   :  { %2768 = vmatpush1.bf16.msra.mxu0 %v2527_v37  ;;  %v2604_v37 = vunpack.c.h.s8.bf16 %v2420_v29  ;;  %v2455_v29 = vld [vmem:[#allocation5 + $0xac0] sm:$0xff] }
 0x6d4   :  { %2769 = vmatprep.subr.bf16.mxu0 %v2532_v38  ;;  %3071 = vmatmul.mubr.bf16.vlgmr.msra.gmra.mrb[20].mxu1 %v4175_v16  ;;  %v2424_v38 = vld [vmem:[#allocation5 + $0x9c8] sm:$0xff] }
 0x6d7   :  { %2770 = vmatpush1.bf16.msra.mxu0 %v2531_v40  ;;  %v2608_v40 = vunpack.c.l.s8.bf16 %v2424_v38 }
 0x6d8   :  { %2771 = vmatprep.subr.bf16.mxu0 %v2536_v42  ;;  %v2423_v42 = vld [vmem:[#allocation5 + $0x9c0] sm:$0xff] }
 0x6d9   :  { %v2607_v26 = vunpack.c.l.s8.bf16 %v2423_v42  ;;  %v2611_v3 = vunpack.c.h.s8.bf16 %v2423_v42  ;;  %v2464_v42 = vld [vmem:[#allocation5 + $0xb08] sm:$0xff] }
 0x6db   :  { %2772 = vmatpush1.bf16.msra.mxu0 %v2535_v43  ;;  %v2612_v43 = vunpack.c.h.s8.bf16 %v2424_v38  ;;  %v2459_v38 = vld [vmem:[#allocation5 + $0xae0] sm:$0xff] }
 0x6dc   :  { %2773 = vmatprep.subr.bf16.mxu0 %v2540_v45  ;;  %v2428_v45 = vld [vmem:[#allocation5 + $0x9e8] sm:$0xff] }
 0x6df   :  { %2774 = vmatpush1.bf16.msra.mxu0 %v2539_v46  ;;  %v2616_v46 = vunpack.c.l.s8.bf16 %v2428_v45 }
 0x6e0   :  { %2775 = vmatprep.subr.bf16.mxu0 %v2544_v47  ;;  %v2427_v47 = vld [vmem:[#allocation5 + $0x9e0] sm:$0xff] }
 0x6e1   :  { %v2615_v48 = vunpack.c.l.s8.bf16 %v2427_v47  ;;  %v2619_v53 = vunpack.c.h.s8.bf16 %v2427_v47  ;;  %v2468_v47 = vld [vmem:[#allocation5 + $0xb28] sm:$0xff] }
 0x6e3   :  { %2776 = vmatpush1.bf16.msra.mxu0 %v2543_v5  ;;  %v2620_v5 = vunpack.c.h.s8.bf16 %v2428_v45  ;;  %v2463_v45 = vld [vmem:[#allocation5 + $0xb00] sm:$0xff] }
 0x6e4   :  { %2777 = vmatprep.subr.bf16.mxu0 %v2548_v50  ;;  %v2432_v50 = vld [vmem:[#allocation5 + $0xa08] sm:$0xff] }
 0x6e7   :  { %2778 = vmatpush1.bf16.msra.mxu0 %v2547_v58  ;;  %v2624_v58 = vunpack.c.l.s8.bf16 %v2432_v50 }
 0x6e8   :  { %2779 = vmatprep.subr.bf16.mxu0 %v2552_v54  ;;  %v2431_v54 = vld [vmem:[#allocation5 + $0xa00] sm:$0xff] }
 0x6e9   :  { %v2623_v55 = vunpack.c.l.s8.bf16 %v2431_v54  ;;  %v2627_v56 = vunpack.c.h.s8.bf16 %v2431_v54  ;;  %v2472_v54 = vld [vmem:[#allocation5 + $0xb48] sm:$0xff] }
 0x6eb   :  { %2780 = vmatpush1.bf16.msra.mxu0 %v2551_v63  ;;  %v2628_v63 = vunpack.c.h.s8.bf16 %v2432_v50  ;;  %v2467_v50 = vld [vmem:[#allocation5 + $0xb20] sm:$0xff] }
 0x6ec   :  { %2781 = vmatprep.subr.bf16.mxu0 %v2556_v14  ;;  %v2436_v14 = vld [vmem:[#allocation5 + $0xa28] sm:$0xff] }
 0x6ef   :  { %2782 = vmatpush1.bf16.msra.mxu0 %v2555_v57  ;;  %v2632_v57 = vunpack.c.l.s8.bf16 %v2436_v14 }
 0x6f0   :  { %2792 = vmatprep.subr.bf16.mxu0 %v2560_v41  ;;  %v2435_v41 = vld [vmem:[#allocation5 + $0xa20] sm:$0xff] }
 0x6f1   :  { %v2631_v60 = vunpack.c.l.s8.bf16 %v2435_v41  ;;  %v2635_v2 = vunpack.c.h.s8.bf16 %v2435_v41 }
 0x6f2   :  { %2784 = vmatmul.mubr.bf16.vlgmr.msra.gmra.mrb[16].mxu0 %v4150_v49  ;;  %v2580_v49 = vunpack.c.h.s8.bf16 %v2408_v9  ;;  %v2443_v9 = vld [vmem:[#allocation5 + $0xa60] sm:$0xff] }
 0x6f3   :  { %2793 = vmatpush1.bf16.msra.mxu0 %v2559_v0  ;;  %2824 = vmatprep.mubr.bf16.mxu0 %v4136_v52  ;;  %v2579_v52 = vunpack.c.h.s8.bf16 %v2407_v13  ;;  %v2636_v0 = vunpack.c.h.s8.bf16 %v2436_v14  ;;  %v2448_v13 = vld [vmem:[#allocation5 + $0xa88] sm:$0xff]  ;;  %v2471_v14 = vld [vmem:[#allocation5 + $0xb40] sm:$0xff] }
 0x6f4   :  { %2794 = vmatprep.subr.bf16.mxu0 %v2564_v51  ;;  %v2440_v51 = vld [vmem:[#allocation5 + $0xa48] sm:$0xff] }
 0x6f7   :  { %2795 = vmatpush1.bf16.msra.mxu0 %v2563_v4  ;;  %v2640_v4 = vunpack.c.l.s8.bf16 %v2440_v51 }
 0x6f8   :  { %2796 = vmatprep.subr.bf16.mxu0 %v2568_v6  ;;  %v2439_v6 = vld [vmem:[#allocation5 + $0xa40] sm:$0xff] }
 0x6f9   :  { %v2639_v7 = vunpack.c.l.s8.bf16 %v2439_v6 }
 0x6fb   :  { %2797 = vmatpush1.bf16.msra.mxu0 %v2567_v35  ;;  %v2444_v35 = vld [vmem:[#allocation5 + $0xa68] sm:$0xff] }
 0x6fc   :  { %2798 = vmatprep.subr.bf16.mxu0 %v2572_v8  ;;  %v2648_v8 = vunpack.c.l.s8.bf16 %v2444_v35 }
 0x6ff   :  { %2799 = vmatpush1.bf16.msra.mxu0 %v2571_v10  ;;  %v2647_v10 = vunpack.c.l.s8.bf16 %v2443_v9 }
 0x700   :  { %2800 = vmatprep.subr.bf16.mxu0 %v2576_v11  ;;  %v2652_v11 = vunpack.c.h.s8.bf16 %v2444_v35 }
 0x703   :  { %2801 = vmatpush1.bf16.msra.mxu0 %v2575_v17  ;;  %v2651_v17 = vunpack.c.h.s8.bf16 %v2443_v9  ;;  %v2480_v9 = vld [vmem:[#allocation5 + $0xb88] sm:$0xff] }
 0x704   :  { %2802 = vmatprep.subr.bf16.mxu0 %v2580_v49  ;;  %v2656_v49 = vunpack.c.l.s8.bf16 %v2448_v13 }
 0x707   :  { %2803 = vmatpush1.bf16.msra.mxu0 %v2579_v52  ;;  %v2655_v52 = vunpack.c.l.s8.bf16 %v2447_v18 }
 0x708   :  { %2804 = vmatprep.subr.bf16.mxu0 %v2584_v19  ;;  %v2660_v19 = vunpack.c.h.s8.bf16 %v2448_v13  ;;  %v2720_v13 = vunpack.c.l.s8.bf16 %v2480_v9 }
 0x70b   :  { %2805 = vmatpush1.bf16.msra.mxu0 %v2583_v21  ;;  %v2659_v21 = vunpack.c.h.s8.bf16 %v2447_v18  ;;  %v2724_v18 = vunpack.c.h.s8.bf16 %v2480_v9 }
 0x70c   :  { %2806 = vmatprep.subr.bf16.mxu0 %v2588_v28  ;;  %v2664_v28 = vunpack.c.l.s8.bf16 %v2452_v20 }
 0x70f   :  { %2807 = vmatpush1.bf16.msra.mxu0 %v2587_v12  ;;  %v2663_v12 = vunpack.c.l.s8.bf16 %v2451_v22 }
 0x710   :  { %2808 = vmatprep.subr.bf16.mxu0 %v2592_v23  ;;  %v2668_v23 = vunpack.c.h.s8.bf16 %v2452_v20 }
 0x713   :  { %2809 = vmatpush1.bf16.msra.mxu0 %v2591_v25  ;;  %v2667_v25 = vunpack.c.h.s8.bf16 %v2451_v22 }
 0x714   :  { %2810 = vmatprep.subr.bf16.mxu0 %v2596_v27  ;;  %v2672_v27 = vunpack.c.l.s8.bf16 %v2456_v24 }
 0x717   :  { %2811 = vmatpush1.bf16.msra.mxu0 %v2595_v30  ;;  %v2671_v30 = vunpack.c.l.s8.bf16 %v2455_v29 }
 0x718   :  { %2812 = vmatprep.subr.bf16.mxu0 %v2600_v33  ;;  %v2676_v33 = vunpack.c.h.s8.bf16 %v2456_v24 }
 0x71b   :  { %2813 = vmatpush1.bf16.msra.mxu0 %v2599_v36  ;;  %v2675_v36 = vunpack.c.h.s8.bf16 %v2455_v29 }
 0x71c   :  { %2814 = vmatprep.subr.bf16.mxu0 %v2604_v37  ;;  %v2680_v37 = vunpack.c.l.s8.bf16 %v2460_v34 }
 0x71f   :  { %2815 = vmatpush1.bf16.msra.mxu0 %v2603_v39  ;;  %v2679_v39 = vunpack.c.l.s8.bf16 %v2459_v38 }
 0x720   :  { %2816 = vmatprep.subr.bf16.mxu0 %v2608_v40  ;;  %v2684_v40 = vunpack.c.h.s8.bf16 %v2460_v34 }
 0x723   :  { %2817 = vmatpush1.bf16.msra.mxu0 %v2607_v26  ;;  %v2683_v26 = vunpack.c.h.s8.bf16 %v2459_v38 }
 0x724   :  { %2818 = vmatprep.subr.bf16.mxu0 %v2612_v43  ;;  %v2688_v43 = vunpack.c.l.s8.bf16 %v2464_v42 }
 0x727   :  { %2819 = vmatpush1.bf16.msra.mxu0 %v2611_v3  ;;  %v2687_v3 = vunpack.c.l.s8.bf16 %v2463_v45 }
 0x728   :  { %2820 = vmatprep.subr.bf16.mxu0 %v2616_v46  ;;  %v2692_v46 = vunpack.c.h.s8.bf16 %v2464_v42 }
 0x72b   :  { %2821 = vmatpush1.bf16.msra.mxu0 %v2615_v48  ;;  %v2691_v48 = vunpack.c.h.s8.bf16 %v2463_v45 }
 0x72c   :  { %2822 = vmatprep.subr.bf16.mxu0 %v2620_v5  ;;  %v2696_v5 = vunpack.c.l.s8.bf16 %v2468_v47 }
 0x72f   :  { %2823 = vmatpush1.bf16.msra.mxu0 %v2619_v53  ;;  %v2695_v53 = vunpack.c.l.s8.bf16 %v2467_v50 }
 0x730   :  { %2833 = vmatprep.subr.bf16.mxu0 %v2624_v58  ;;  %v2700_v58 = vunpack.c.h.s8.bf16 %v2468_v47 }
 0x732   :  { %2825 = vmatmul.mubr.bf16.vlgmr.msra.gmra.mrb[16].mxu0 %v4156_v59  ;;  %v2644_v59 = vunpack.c.h.s8.bf16 %v2440_v51 }
 0x733   :  { %2834 = vmatpush1.bf16.msra.mxu0 %v2623_v55  ;;  %2865 = vmatprep.mubr.bf16.mxu0 %v4159_v1  ;;  %v2643_v1 = vunpack.c.h.s8.bf16 %v2439_v6  ;;  %v2699_v55 = vunpack.c.h.s8.bf16 %v2467_v50 }
 0x734   :  { %2835 = vmatprep.subr.bf16.mxu0 %v2628_v63  ;;  %v2704_v63 = vunpack.c.l.s8.bf16 %v2472_v54 }
 0x737   :  { %2836 = vmatpush1.bf16.msra.mxu0 %v2627_v56  ;;  %v2703_v56 = vunpack.c.l.s8.bf16 %v2471_v14 }
 0x738   :  { %2837 = vmatprep.subr.bf16.mxu0 %v2632_v57  ;;  %v2476_v57 = vld [vmem:[#allocation5 + $0xb68] sm:$0xff] }
 0x739   :  { %v2712_v41 = vunpack.c.l.s8.bf16 %v2476_v57 }
 0x73b   :  { %2838 = vmatpush1.bf16.msra.mxu0 %v2631_v60  ;;  %v2475_v60 = vld [vmem:[#allocation5 + $0xb60] sm:$0xff] }
 0x73c   :  { %2839 = vmatprep.subr.bf16.mxu0 %v2636_v0 }
 0x73f   :  { %2840 = vmatpush1.bf16.msra.mxu0 %v2635_v2  ;;  %v3463_v2 = vld [vmem:[#allocation16 + $0x1] ss:$0 sm:$0xff] }
 0x740   :  { %2841 = vmatprep.subr.bf16.mxu0 %v2640_v4 }
 0x743   :  { %2842 = vmatpush1.bf16.msra.mxu0 %v2639_v7  ;;  %v2711_v7 = vunpack.c.l.s8.bf16 %v2475_v60 }
 0x744   :  { %2843 = vmatprep.subr.bf16.mxu0 %v2644_v59  ;;  %v3464_v59 = vld [vmem:[#allocation17 + $0x1] ss:$0 sm:$0xff] }
 0x747   :  { %2844 = vmatpush1.bf16.msra.mxu0 %v2643_v1  ;;  %v2716_v1 = vunpack.c.h.s8.bf16 %v2476_v57 }
 0x748   :  { %2845 = vmatprep.subr.bf16.mxu0 %v2648_v8 }
 0x74b   :  { %2846 = vmatpush1.bf16.msra.mxu0 %v2647_v10 }
 0x74c   :  { %2847 = vmatprep.subr.bf16.mxu0 %v2652_v11  ;;  %v2715_v11 = vunpack.c.h.s8.bf16 %v2475_v60 }
 0x74f   :  { %2848 = vmatpush1.bf16.msra.mxu0 %v2651_v17  ;;  %v2479_v17 = vld [vmem:[#allocation5 + $0xb80] sm:$0xff] }
 0x750   :  { %2849 = vmatprep.subr.bf16.mxu0 %v2656_v49  ;;  %v2719_v49 = vunpack.c.l.s8.bf16 %v2479_v17 }
 0x753   :  { %2850 = vmatpush1.bf16.msra.mxu0 %v2655_v52  ;;  %v2484_v52 = vld [vmem:[#allocation5 + $0xba8] sm:$0xff] }
 0x754   :  { %2851 = vmatprep.subr.bf16.mxu0 %v2660_v19  ;;  %v2723_v19 = vunpack.c.h.s8.bf16 %v2479_v17  ;;  %v2728_v20 = vunpack.c.l.s8.bf16 %v2484_v52  ;;  %v2732_v22 = vunpack.c.h.s8.bf16 %v2484_v52 }
 0x757   :  { %2852 = vmatpush1.bf16.msra.mxu0 %v2659_v21  ;;  %v2483_v21 = vld [vmem:[#allocation5 + $0xba0] sm:$0xff] }
 0x758   :  { %2853 = vmatprep.subr.bf16.mxu0 %v2664_v28  ;;  %v2727_v28 = vunpack.c.l.s8.bf16 %v2483_v21 }
 0x75b   :  { %2854 = vmatpush1.bf16.msra.mxu0 %v2663_v12  ;;  %v2488_v12 = vld [vmem:[#allocation5 + $0xbc8] sm:$0xff] }
 0x75c   :  { %2855 = vmatprep.subr.bf16.mxu0 %v2668_v23  ;;  %v2731_v23 = vunpack.c.h.s8.bf16 %v2483_v21  ;;  %v2736_v24 = vunpack.c.l.s8.bf16 %v2488_v12  ;;  %v2740_v29 = vunpack.c.h.s8.bf16 %v2488_v12 }
 0x75f   :  { %2856 = vmatpush1.bf16.msra.mxu0 %v2667_v25  ;;  %v2487_v25 = vld [vmem:[#allocation5 + $0xbc0] sm:$0xff] }
 0x760   :  { %2857 = vmatprep.subr.bf16.mxu0 %v2672_v27  ;;  %v2735_v27 = vunpack.c.l.s8.bf16 %v2487_v25 }
 0x763   :  { %2858 = vmatpush1.bf16.msra.mxu0 %v2671_v30  ;;  %v2492_v30 = vld [vmem:[#allocation5 + $0xbe8] sm:$0xff] }
 0x764   :  { %2859 = vmatprep.subr.bf16.mxu0 %v2676_v33  ;;  %v2739_v33 = vunpack.c.h.s8.bf16 %v2487_v25  ;;  %v2744_v34 = vunpack.c.l.s8.bf16 %v2492_v30 }
 0x767   :  { %2860 = vmatpush1.bf16.msra.mxu0 %v2675_v36  ;;  %v2491_v36 = vld [vmem:[#allocation5 + $0xbe0] sm:$0xff] }
 0x768   :  { %2861 = vmatprep.subr.bf16.mxu0 %v2680_v37  ;;  %v2743_v37 = vunpack.c.l.s8.bf16 %v2491_v36  ;;  %v2747_v45 = vunpack.c.h.s8.bf16 %v2491_v36 }
 0x76b   :  { %2862 = vmatpush1.bf16.msra.mxu0 %v2679_v39  ;;  %v2748_v39 = vunpack.c.h.s8.bf16 %v2492_v30 }
 0x76c   :  { %2863 = vmatprep.subr.bf16.mxu0 %v2684_v40 }
 0x76f   :  { %2864 = vmatpush1.bf16.msra.mxu0 %v2683_v26  ;;  %v3139_v26 = vld [vmem:[#allocation10 + $0x208] sm:$0xff] }
 0x770   :  { %2874 = vmatprep.subr.bf16.mxu0 %v2688_v43 }
 0x772   :  { %2866 = vmatmul.mubr.bf16.vlgmr.msra.gmra.mrb[16].mxu0 %v4146_v15  ;;  %v2708_v15 = vunpack.c.h.s8.bf16 %v2472_v54 }
 0x773   :  { %2875 = vmatpush1.bf16.msra.mxu0 %v2687_v3  ;;  %2906 = vmatprep.mubr.bf16.mxu0 %v4167_v44  ;;  %v2707_v44 = vunpack.c.h.s8.bf16 %v2471_v14  ;;  %v3171_v3 = vunpack.c.l.s8.bf16 %v3139_v26 }
 0x774   :  { %2876 = vmatprep.subr.bf16.mxu0 %v2692_v46  ;;  %v3138_v46 = vld [vmem:[#allocation10 + $0x200] sm:$0xff] }
 0x775   :  { %v3170_v47 = vunpack.c.l.s8.bf16 %v3138_v46  ;;  %v3172_v50 = vunpack.c.h.s8.bf16 %v3138_v46 }
 0x777   :  { %2877 = vmatpush1.bf16.msra.mxu0 %v2691_v48  ;;  %v3173_v48 = vunpack.c.h.s8.bf16 %v3139_v26 }
 0x778   :  { %2878 = vmatprep.subr.bf16.mxu0 %v2696_v5  ;;  %v3141_v5 = vld [vmem:[#allocation10 + $0x218] sm:$0xff] }
 0x77b   :  { %2879 = vmatpush1.bf16.msra.mxu0 %v2695_v53  ;;  %v3175_v53 = vunpack.c.l.s8.bf16 %v3141_v5 }
 0x77c   :  { %2880 = vmatprep.subr.bf16.mxu0 %v2700_v58  ;;  %v3140_v58 = vld [vmem:[#allocation10 + $0x210] sm:$0xff] }
 0x77d   :  { %v3174_v54 = vunpack.c.l.s8.bf16 %v3140_v58  ;;  %v3176_v14 = vunpack.c.h.s8.bf16 %v3140_v58 }
 0x77f   :  { %2881 = vmatpush1.bf16.msra.mxu0 %v2699_v55  ;;  %v3177_v55 = vunpack.c.h.s8.bf16 %v3141_v5 }
 0x780   :  { %2882 = vmatprep.subr.bf16.mxu0 %v2704_v63  ;;  %v3143_v63 = vld [vmem:[#allocation10 + $0x228] sm:$0xff] }
 0x783   :  { %2883 = vmatpush1.bf16.msra.mxu0 %v2703_v56  ;;  %v3179_v56 = vunpack.c.l.s8.bf16 %v3143_v63 }
 0x784   :  { %2884 = vmatprep.subr.bf16.mxu0 %v2708_v15  ;;  %v3142_v15 = vld [vmem:[#allocation10 + $0x220] sm:$0xff] }
 0x785   :  { %v3505_v0 = vpop.f32.mrb[12].mxu0  ;;  %v3178_v57 = vunpack.c.l.s8.bf16 %v3142_v15 }
 0x786   :  { %v3506_v51 = vpop.f32.mrb[13].mxu0 }
 0x787   :  { %v3507_v4 = vadd.f32 %v3506_v51, %v3505_v0  ;;  %2885 = vmatpush1.bf16.msra.mxu0 %v2707_v44  ;;  %v3508_v6 = vpop.f32.mrb[14].mxu0  ;;  %v3181_v44 = vunpack.c.h.s8.bf16 %v3143_v63  ;;  %v3144_v0 = vld [vmem:[#allocation10 + $0x230] sm:$0xff]  ;;  %v4325_v63 = vld [vmem:[#allocation8 + $0x8] sm:$0xf] }
 0x788   :  { %v3509_v35 = vpop.f32.mrb[15].mxu0  ;;  %2886 = vmatprep.subr.bf16.mxu0 %v2712_v41  ;;  %v3180_v41 = vunpack.c.h.s8.bf16 %v3142_v15  ;;  %v3182_v51 = vunpack.c.l.s8.bf16 %v3144_v0  ;;  %v3184_v6 = vunpack.c.h.s8.bf16 %v3144_v0  ;;  %v3124_v15 = vrot.slane %v4325_v63, %v4226_v32 }
 0x789   :  { %v2354_v8 = vmul.f32 %v3507_v4, %v3463_v2  ;;  %v3147_v4 = vld [vmem:[#allocation10 + $0x248] sm:$0xff] }
 0x78b   :  { %v2363_v10 = vadd.f32 %v3464_v59, %v2354_v8  ;;  %2887 = vmatpush1.bf16.msra.mxu0 %v2711_v7  ;;  %v3187_v7 = vunpack.c.l.s8.bf16 %v3147_v4  ;;  %v3146_v59 = vld [vmem:[#allocation10 + $0x240] sm:$0xff]  ;;  %v3149_v8 = vld [vmem:[#allocation10 + $0x258] sm:$0xff] }
 0x78c   :  { %2888 = vmatprep.subr.bf16.mxu0 %v2716_v1  ;;  %v3186_v35 = vunpack.c.l.s8.bf16 %v3146_v59  ;;  %v3189_v1 = vunpack.c.h.s8.bf16 %v3147_v4  ;;  %v3188_v9 = vunpack.c.h.s8.bf16 %v3146_v59  ;;  %v3193_v17 = vunpack.c.h.s8.bf16 %v3149_v8 }
 0x78d   :  { %2365 = vst [vmem:[#allocation19 + $0x2] sm:$0x3] %v2363_v10  ;;  %v3191_v10 = vunpack.c.l.s8.bf16 %v3149_v8 }
 0x78f   :  { %2889 = vmatpush1.bf16.msra.mxu0 %v2715_v11  ;;  %v3148_v11 = vld [vmem:[#allocation10 + $0x250] sm:$0xff] }
 0x790   :  { %2890 = vmatprep.subr.bf16.mxu0 %v2720_v13  ;;  %v3190_v13 = vunpack.c.l.s8.bf16 %v3148_v11 }
 0x793   :  { %2891 = vmatpush1.bf16.msra.mxu0 %v2719_v49  ;;  %v3151_v49 = vld [vmem:[#allocation10 + $0x268] sm:$0xff] }
 0x794   :  { %2892 = vmatprep.subr.bf16.mxu0 %v2724_v18  ;;  %v3192_v18 = vunpack.c.h.s8.bf16 %v3148_v11  ;;  %v3195_v52 = vunpack.c.l.s8.bf16 %v3151_v49  ;;  %v3197_v21 = vunpack.c.h.s8.bf16 %v3151_v49 }
 0x797   :  { %2893 = vmatpush1.bf16.msra.mxu0 %v2723_v19  ;;  %v3150_v19 = vld [vmem:[#allocation10 + $0x260] sm:$0xff] }
 0x798   :  { %2894 = vmatprep.subr.bf16.mxu0 %v2728_v20  ;;  %v3194_v20 = vunpack.c.l.s8.bf16 %v3150_v19 }
 0x79b   :  { %2895 = vmatpush1.bf16.msra.mxu0 %v2727_v28  ;;  %v3196_v28 = vunpack.c.h.s8.bf16 %v3150_v19 }
 0x79c   :  { %2896 = vmatprep.subr.bf16.mxu0 %v2732_v22  ;;  %v3153_v22 = vld [vmem:[#allocation10 + $0x278] sm:$0xff] }
 0x79d   :  { %v3199_v12 = vunpack.c.l.s8.bf16 %v3153_v22  ;;  %v3201_v25 = vunpack.c.h.s8.bf16 %v3153_v22 }
 0x79f   :  { %2897 = vmatpush1.bf16.msra.mxu0 %v2731_v23  ;;  %v3152_v23 = vld [vmem:[#allocation10 + $0x270] sm:$0xff] }
 0x7a0   :  { %2898 = vmatprep.subr.bf16.mxu0 %v2736_v24  ;;  %v3198_v24 = vunpack.c.l.s8.bf16 %v3152_v23 }
 0x7a3   :  { %2899 = vmatpush1.bf16.msra.mxu0 %v2735_v27  ;;  %v3200_v27 = vunpack.c.h.s8.bf16 %v3152_v23 }
 0x7a4   :  { %2900 = vmatprep.subr.bf16.mxu0 %v2740_v29  ;;  %v4315_v29 = vld [vmem:[#allocation10 + $0x288] sm:$0xff] }
 0x7a5   :  { %v3203_v30 = vunpack.c.l.s8.bf16 %v4315_v29  ;;  %v3205_v11 = vunpack.c.h.s8.bf16 %v4315_v29 }
 0x7a7   :  { %2901 = vmatpush1.bf16.msra.mxu0 %v2739_v33  ;;  %v4310_v38 = vpop.f32.mrb[20].mxu1  ;;  %v3357_v33 = vld [vmem:[#allocation14 + $0xa0] sm:$0xff] }
 0x7a8   :  { %2902 = vmatprep.subr.bf16.mxu0 %v2744_v34  ;;  %v4312_v40 = vpop.f32.mrb[21].mxu1  ;;  %v3353_v34 = vld [vmem:[#allocation14 + $0x80] sm:$0xff]  ;;  %v3369_v36 = vunpack.c.l.s8.bf16 %v3357_v33 }
 0x7a9   :  { %v3076_v42 = vpop.f32.mrb[22].mxu1  ;;  %v3362_v26 = vunpack.c.h.s8.bf16 %v3353_v34 }
 0x7aa   :  { %v3077_v43 = vpop.f32.mrb[23].mxu1  ;;  %v3358_v42 = vld [vmem:[#allocation14 + $0xa8] sm:$0xff]  ;;  %3511 = vmatprep.subr.bf16.mxu1 %v3369_v36  ;;  %v3163_v36 = vld [vmem:[#allocation10 + $0x2c8] sm:$0xff] }
 0x7ab   :  { %2903 = vmatpush1.bf16.msra.mxu0 %v2743_v37  ;;  %v3361_v37 = vunpack.c.l.s8.bf16 %v3353_v34  ;;  %v3371_v43 = vunpack.c.l.s8.bf16 %v3358_v42  ;;  %v3372_v46 = vunpack.c.h.s8.bf16 %v3358_v42  ;;  %v3162_v42 = vld [vmem:[#allocation10 + $0x2c0] sm:$0xff] }
 0x7ac   :  { %2904 = vmatprep.subr.bf16.mxu0 %v2748_v39  ;;  %v3370_v39 = vunpack.c.h.s8.bf16 %v3357_v33 }
 0x7ad   :  { %3512 = vmatpush3.bf16.msra.mxu1 %v3361_v37 }
 0x7ae   :  { %3513 = vmatprep.subr.bf16.mxu1 %v3370_v39  ;;  %v3219_v39 = vunpack.c.l.s8.bf16 %v3163_v36 }
 0x7af   :  { %2905 = vmatpush1.bf16.msra.mxu0 %v2747_v45  ;;  %v3354_v45 = vld [vmem:[#allocation14 + $0x88] sm:$0xff] }
 0x7b0   :  { %3238 = vmatprep.subr.bf16.mxu0 %v3171_v3  ;;  %v3363_v3 = vunpack.c.l.s8.bf16 %v3354_v45 }
 0x7b1   :  { %3514 = vmatpush3.bf16.msra.mxu1 %v3362_v26  ;;  %v3218_v26 = vunpack.c.l.s8.bf16 %v3162_v42 }
 0x7b2   :  { %2907 = vmatmul.mubr.bf16.vlgmr.msra.gmra.mrb[16].mxu0 %v4175_v16  ;;  %v3145_v16 = vld [vmem:[#allocation10 + $0x238] sm:$0xff]  ;;  %3515 = vmatprep.subr.bf16.mxu1 %v3371_v43  ;;  %v3221_v43 = vunpack.c.h.s8.bf16 %v3163_v36 }
 0x7b3   :  { %3239 = vmatpush1.bf16.msra.mxu0 %v3170_v47  ;;  %v3183_v60 = vunpack.c.l.s8.bf16 %v3145_v16  ;;  %v3185_v2 = vunpack.c.h.s8.bf16 %v3145_v16  ;;  %v3359_v47 = vld [vmem:[#allocation14 + $0xb0] sm:$0xff] }
 0x7b4   :  { %3240 = vmatprep.subr.bf16.mxu0 %v3173_v48  ;;  %v3364_v48 = vunpack.c.h.s8.bf16 %v3354_v45  ;;  %v3373_v5 = vunpack.c.l.s8.bf16 %v3359_v47  ;;  %v3374_v58 = vunpack.c.h.s8.bf16 %v3359_v47  ;;  %v3165_v45 = vld [vmem:[#allocation10 + $0x2d8] sm:$0xff]  ;;  %v3164_v47 = vld [vmem:[#allocation10 + $0x2d0] sm:$0xff] }
 0x7b5   :  { %3516 = vmatpush3.bf16.msra.mxu1 %v3363_v3  ;;  %v3220_v3 = vunpack.c.h.s8.bf16 %v3162_v42 }
 0x7b6   :  { %3517 = vmatprep.subr.bf16.mxu1 %v3372_v46  ;;  %v3223_v46 = vunpack.c.l.s8.bf16 %v3165_v45 }
 0x7b7   :  { %3241 = vmatpush1.bf16.msra.mxu0 %v3172_v50  ;;  %v4318_v50 = vld [vmem:[#allocation14 + $0x90] sm:$0xff] }
 0x7b8   :  { %3242 = vmatprep.subr.bf16.mxu0 %v3175_v53  ;;  %v3365_v53 = vunpack.c.l.s8.bf16 %v4318_v50 }
 0x7b9   :  { %3518 = vmatpush3.bf16.msra.mxu1 %v3364_v48  ;;  %v3222_v48 = vunpack.c.l.s8.bf16 %v3164_v47 }
 0x7ba   :  { %3519 = vmatprep.subr.bf16.mxu1 %v3373_v5  ;;  %v3225_v5 = vunpack.c.h.s8.bf16 %v3165_v45 }
 0x7bb   :  { %3243 = vmatpush1.bf16.msra.mxu0 %v3174_v54  ;;  %v4321_v54 = vld [vmem:[#allocation7 + $0x8] sm:$0xf] }
 0x7bc   :  { %3244 = vmatprep.subr.bf16.mxu0 %v3177_v55  ;;  %v3097_v55 = vrot.slane %v4321_v54, %v4226_v32  ;;  %v3154_v32 = vld [vmem:[#allocation10 + $0x280] sm:$0xff] }
 0x7bd   :  { %3520 = vmatpush3.bf16.msra.mxu1 %v3365_v53  ;;  %v3204_v49 = vunpack.c.h.s8.bf16 %v3154_v32  ;;  %v3167_v53 = vld [vmem:[#allocation10 + $0x2e8] sm:$0xff] }
 0x7be   :  { %3521 = vmatprep.subr.bf16.mxu1 %v3374_v58  ;;  %v3224_v58 = vunpack.c.h.s8.bf16 %v3164_v47 }
 0x7bf   :  { %3245 = vmatpush1.bf16.msra.mxu0 %v3176_v14  ;;  %v3085_v14 = vrot.slane %v4321_v54, %v4199_v61 }
 0x7c0   :  { %3246 = vmatprep.subr.bf16.mxu0 %v3179_v56  ;;  %v3105_v56 = vmul.f32 %v3097_v55, %v4312_v40  ;;  %v3227_v55 = vunpack.c.l.s8.bf16 %v3167_v53 }
 0x7c3   :  { %3247 = vmatpush1.bf16.msra.mxu0 %v3178_v57  ;;  %v3089_v57 = vrot.slane %v4321_v54, %v4202_v62 }
 0x7c4   :  { %3248 = vmatprep.subr.bf16.mxu0 %v3181_v44  ;;  %v3112_v44 = vrot.slane %v4325_v63, %v4199_v61 }
 0x7c7   :  { %3249 = vmatpush1.bf16.msra.mxu0 %v3180_v41  ;;  %v3116_v41 = vrot.slane %v4325_v63, %v4202_v62 }
 0x7c8   :  { %3250 = vmatprep.subr.bf16.mxu0 %v3183_v60 }
 0x7cb   :  { %3251 = vmatpush1.bf16.msra.mxu0 %v3182_v51  ;;  %v3132_v51 = vadd.f32 %v3124_v15, %v3105_v56  ;;  %v3093_v15 = vrot.slane %v4321_v54, %v4223_v31 }
 0x7cc   :  { %3252 = vmatprep.subr.bf16.mxu0 %v3185_v2 }
 0x7cf   :  { %3253 = vmatpush1.bf16.msra.mxu0 %v3184_v6 }
 0x7d0   :  { %3254 = vmatprep.subr.bf16.mxu0 %v3187_v7 }
 0x7d3   :  { %3255 = vmatpush1.bf16.msra.mxu0 %v3186_v35  ;;  %v3136_v35 = vmax.f32 %v3132_v51, 0.0  ;;  %v3168_v51 = vld [vmem:[#allocation10 + $0x2f0] sm:$0xff] }
 0x7d4   :  { %3256 = vmatprep.subr.bf16.mxu0 %v3189_v1  ;;  %v3232_v54 = vunpack.c.h.s8.bf16 %v3168_v51 }
 0x7d7   :  { %3257 = vmatpush1.bf16.msra.mxu0 %v3188_v9  ;;  %v3202_v9 = vunpack.c.l.s8.bf16 %v3154_v32 }
 0x7d8   :  { %3258 = vmatprep.subr.bf16.mxu0 %v3191_v10 }
 0x7db   :  { %3259 = vmatpush1.bf16.msra.mxu0 %v3190_v13  ;;  %v3237_v13 = vpack.c.bf16 %v3136_v35, %v3136_v35 }
 0x7dc   :  { %3260 = vmatprep.subr.bf16.mxu0 %v3193_v17  ;;  %v3157_v17 = vld [vmem:[#allocation10 + $0x298] sm:$0xff] }
 0x7df   :  { %3261 = vmatpush1.bf16.msra.mxu0 %v3192_v18  ;;  %v3207_v18 = vunpack.c.l.s8.bf16 %v3157_v17 }
 0x7e0   :  { %3262 = vmatprep.subr.bf16.mxu0 %v3195_v52  ;;  %v3156_v52 = vld [vmem:[#allocation10 + $0x290] sm:$0xff] }
 0x7e1   :  { %v3206_v19 = vunpack.c.l.s8.bf16 %v3156_v52 }
 0x7e3   :  { %3263 = vmatpush1.bf16.msra.mxu0 %v3194_v20  ;;  %v3209_v20 = vunpack.c.h.s8.bf16 %v3157_v17 }
 0x7e4   :  { %3264 = vmatprep.subr.bf16.mxu0 %v3197_v21  ;;  %v3159_v21 = vld [vmem:[#allocation10 + $0x2a8] sm:$0xff] }
 0x7e5   :  { %v3211_v22 = vunpack.c.l.s8.bf16 %v3159_v21 }
 0x7e7   :  { %3265 = vmatpush1.bf16.msra.mxu0 %v3196_v28  ;;  %v3208_v28 = vunpack.c.h.s8.bf16 %v3156_v52 }
 0x7e8   :  { %3266 = vmatprep.subr.bf16.mxu0 %v3199_v12  ;;  %v3158_v12 = vld [vmem:[#allocation10 + $0x2a0] sm:$0xff] }
 0x7e9   :  { %v3210_v23 = vunpack.c.l.s8.bf16 %v3158_v12 }
 0x7eb   :  { %3267 = vmatpush1.bf16.msra.mxu0 %v3198_v24  ;;  %v3213_v24 = vunpack.c.h.s8.bf16 %v3159_v21 }
 0x7ec   :  { %3268 = vmatprep.subr.bf16.mxu0 %v3201_v25  ;;  %v3161_v25 = vld [vmem:[#allocation10 + $0x2b8] sm:$0xff] }
 0x7ed   :  { %v3215_v29 = vunpack.c.l.s8.bf16 %v3161_v25  ;;  %v3217_v34 = vunpack.c.h.s8.bf16 %v3161_v25 }
 0x7ef   :  { %3269 = vmatpush1.bf16.msra.mxu0 %v3200_v27  ;;  %v3212_v27 = vunpack.c.h.s8.bf16 %v3158_v12 }
 0x7f0   :  { %3279 = vmatprep.subr.bf16.mxu0 %v3203_v30  ;;  %v3160_v30 = vld [vmem:[#allocation10 + $0x2b0] sm:$0xff] }
 0x7f1   :  { %v3214_v33 = vunpack.c.l.s8.bf16 %v3160_v30  ;;  %v3216_v37 = vunpack.c.h.s8.bf16 %v3160_v30 }
 0x885   :  { %v2908_v16 = vpop.f32.mrb[16].mxu0 }
 0x886   :  { %v3102_v60 = vmul.f32 %v3085_v14, %v2908_v16  ;;  %v2910_v0 = vpop.f32.mrb[17].mxu0  ;;  %v3166_v14 = vld [vmem:[#allocation10 + $0x2e0] sm:$0xff] }
 0x887   :  { %v3103_v2 = vmul.f32 %v3089_v57, %v2910_v0  ;;  %v2912_v4 = vpop.f32.mrb[18].mxu0  ;;  %v3226_v56 = vunpack.c.l.s8.bf16 %v3166_v14  ;;  %v3229_v57 = vunpack.c.h.s8.bf16 %v3167_v53  ;;  %v3228_v16 = vunpack.c.h.s8.bf16 %v3166_v14 }
 0x888   :  { %v3129_v6 = vadd.f32 %v3112_v44, %v3102_v60  ;;  %v2913_v40 = vpop.f32.mrb[19].mxu0  ;;  %v3169_v44 = vld [vmem:[#allocation10 + $0x2f8] sm:$0xff]  ;;  %v3120_v60 = vrot.slane %v4325_v63, %v4223_v31  ;;  %v3356_v63 = vld [vmem:[#allocation14 + $0x98] sm:$0xff] }
 0x889   :  { %v3130_v7 = vadd.f32 %v3116_v41, %v3103_v2  ;;  %v3104_v41 = vmul.f32 %v3093_v15, %v4310_v38  ;;  %v3231_v0 = vunpack.c.l.s8.bf16 %v3169_v44  ;;  %v3230_v2 = vunpack.c.l.s8.bf16 %v3168_v51 }
 0x88a   :  { %v3133_v59 = vmax.f32 %v3129_v6, 0.0  ;;  %v3233_v6 = vunpack.c.h.s8.bf16 %v3169_v44  ;;  %v3366_v38 = vunpack.c.h.s8.bf16 %v4318_v50  ;;  %v3367_v32 = vunpack.c.l.s8.bf16 %v3356_v63 }
 0x88b   :  { %v3134_v1 = vmax.f32 %v3130_v7, 0.0  ;;  %v3131_v4 = vadd.f32 %v3120_v60, %v3104_v41 }
 0x88c   :  { %v3234_v10 = vpack.c.bf16 %v3133_v59, %v3133_v59  ;;  %3522 = vmatpush3.bf16.msra.mxu1 %v3366_v38  ;;  %v3360_v59 = vld [vmem:[#allocation14 + $0xb8] sm:$0xff] }
 0x88d   :  { %v3235_v8 = vpack.c.bf16 %v3134_v1, %v3134_v1  ;;  %v3135_v40 = vmax.f32 %v3131_v4, 0.0  ;;  %v3375_v31 = vunpack.c.l.s8.bf16 %v3360_v59  ;;  %v3376_v35 = vunpack.c.h.s8.bf16 %v3360_v59 }
 0x88e   :  { %v3368_v1 = vunpack.c.h.s8.bf16 %v3356_v63 }
 0x88f   :  { %3270 = vmatprep.mubr.bf16.mxu0 %v3235_v8  ;;  %v3236_v7 = vpack.c.bf16 %v3135_v40, %v3135_v40  ;;  %3523 = vmatprep.subr.bf16.mxu1 %v3375_v31  ;;  %v3321_v8 = vld [vmem:[#allocation11 + $0x4] sm:$0x3] }
 0x890   :  { %3271 = vmatmul.mubr.bf16.vlgmr.msra.gmra.mrb[20].mxu0 %v3234_v10  ;;  %3524 = vmatpush3.bf16.msra.mxu1 %v3367_v32  ;;  %v3326_v10 = vrot.slane %v3321_v8, %v4199_v61 }
 0x891   :  { %3280 = vmatpush1.bf16.msra.mxu0 %v3202_v9  ;;  %3311 = vmatprep.mubr.bf16.mxu0 %v3237_v13  ;;  %v3336_v9 = vld [vmem:[#allocation13 + $0x4] sm:$0x3] }
 0x892   :  { %3281 = vmatprep.subr.bf16.mxu0 %v3205_v11  ;;  %3525 = vmatprep.subr.bf16.mxu1 %v3376_v35  ;;  %v3330_v11 = vrot.slane %v3321_v8, %v4202_v62  ;;  %v3341_v13 = vrot.slane %v3336_v9, %v4199_v61  ;;  %v3345_v17 = vrot.slane %v3336_v9, %v4202_v62 }
 0x894   :  { %3526 = vmatpush3.bf16.msra.mxu1 %v3368_v1 }
 0x895   :  { %3282 = vmatpush1.bf16.msra.mxu0 %v3204_v49 }
 0x896   :  { %3283 = vmatprep.subr.bf16.mxu0 %v3207_v18 }
 0x899   :  { %3284 = vmatpush1.bf16.msra.mxu0 %v3206_v19 }
 0x89a   :  { %3285 = vmatprep.subr.bf16.mxu0 %v3209_v20 }
 0x89d   :  { %3286 = vmatpush1.bf16.msra.mxu0 %v3208_v28 }
 0x89e   :  { %3287 = vmatprep.subr.bf16.mxu0 %v3211_v22 }
 0x8a1   :  { %3288 = vmatpush1.bf16.msra.mxu0 %v3210_v23 }
 0x8a2   :  { %3289 = vmatprep.subr.bf16.mxu0 %v3213_v24 }
 0x8a5   :  { %3290 = vmatpush1.bf16.msra.mxu0 %v3212_v27 }
 0x8a6   :  { %3291 = vmatprep.subr.bf16.mxu0 %v3215_v29  ;;  %v3465_v29 = vld [vmem:[#allocation16 + $0x2] ss:$0 sm:$0xff] }
 0x8a9   :  { %3292 = vmatpush1.bf16.msra.mxu0 %v3214_v33  ;;  %v3466_v33 = vld [vmem:[#allocation17 + $0x2] ss:$0 sm:$0xff] }
 0x8aa   :  { %3293 = vmatprep.subr.bf16.mxu0 %v3217_v34 }
 0x8ad   :  { %3294 = vmatpush1.bf16.msra.mxu0 %v3216_v37 }
 0x8ae   :  { %3295 = vmatprep.subr.bf16.mxu0 %v3219_v39 }
 0x8b1   :  { %3296 = vmatpush1.bf16.msra.mxu0 %v3218_v26 }
 0x8b2   :  { %3297 = vmatprep.subr.bf16.mxu0 %v3221_v43 }
 0x8b5   :  { %3298 = vmatpush1.bf16.msra.mxu0 %v3220_v3 }
 0x8b6   :  { %3299 = vmatprep.subr.bf16.mxu0 %v3223_v46 }
 0x8b9   :  { %3300 = vmatpush1.bf16.msra.mxu0 %v3222_v48 }
 0x8ba   :  { %3301 = vmatprep.subr.bf16.mxu0 %v3225_v5 }
 0x8bd   :  { %3302 = vmatpush1.bf16.msra.mxu0 %v3224_v58 }
 0x8be   :  { %3303 = vmatprep.subr.bf16.mxu0 %v3227_v55 }
 0x8c1   :  { %3304 = vmatpush1.bf16.msra.mxu0 %v3226_v56 }
 0x8c2   :  { %3305 = vmatprep.subr.bf16.mxu0 %v3229_v57 }
 0x8c5   :  { %3306 = vmatpush1.bf16.msra.mxu0 %v3228_v16 }
 0x8c6   :  { %3307 = vmatprep.subr.bf16.mxu0 %v3231_v0 }
 0x8c9   :  { %3308 = vmatpush1.bf16.msra.mxu0 %v3230_v2 }
 0x8ca   :  { %3309 = vmatprep.subr.bf16.mxu0 %v3233_v6 }
 0x8cd   :  { %3310 = vmatpush1.bf16.msra.mxu0 %v3232_v54 }
 0x8d0   :  { %3312 = vmatmul.mubr.bf16.vlgmr.msra.gmra.mrb[20].mxu0 %v3236_v7 }
 0x9a3   :  { %v3313_v50 = vpop.f32.mrb[20].mxu0 }
 0x9a4   :  { %v3333_v49 = vmul.f32 %v3326_v10, %v3313_v50  ;;  %v3315_v18 = vpop.f32.mrb[21].mxu0 }
 0x9a5   :  { %v3334_v52 = vmul.f32 %v3330_v11, %v3315_v18  ;;  %v3317_v19 = vpop.f32.mrb[22].mxu0 }
 0x9a6   :  { %v3348_v20 = vadd.f32 %v3341_v13, %v3333_v49  ;;  %v3318_v21 = vpop.f32.mrb[23].mxu0 }
 0x9a7   :  { %v3349_v28 = vadd.f32 %v3345_v17, %v3334_v52 }
 0x9a8   :  { %v3350_v22 = vmax.f32 %v3348_v20, 0.0 }
 0x9a9   :  { %v3351_v12 = vmax.f32 %v3349_v28, 0.0 }
 0x9aa   :  { %v3377_v24 = vpack.c.bf16 %v3350_v22, %v3350_v22 }
 0x9ab   :  { %v3378_v23 = vpack.c.bf16 %v3351_v12, %v3351_v12 }
 0x9ad   :  { %3411 = vmatprep.mubr.bf16.mxu1 %v3378_v23 }
 0x9ae   :  { %3412 = vmatmul.mubr.bf16.vlgmr.msra.gmra.mrb[24].mxu1 %v3377_v24 }
 0xa81   :  { %v3527_v25 = vpop.f32.mrb[24].mxu1 }
 0xa82   :  { %v3528_v27 = vpop.f32.mrb[25].mxu1 }
 0xa83   :  { %v3529_v61 = vadd.f32 %v3528_v27, %v3527_v25  ;;  %v3530_v30 = vpop.f32.mrb[26].mxu1 }
 0xa84   :  { %v3531_v62 = vpop.f32.mrb[27].mxu1 }
 0xa85   :  { %v3427_v34 = vmul.f32 %v3529_v61, %v3465_v29 }
 0xa87   :  { %v3436_v36 = vadd.f32 %v3466_v33, %v3427_v34 }
 0xa89   :  { %3438 = vst [vmem:[#allocation19 + $0x4] sm:$0x3] %v3436_v36 }
 0xa8a   :  { %3869 = shalt.err (!%p3866_p0)
}
 0xa8b   :  { %s3870_s20 = scalar_lea.hbm %s4374_s10, 96 }
 0xa8c   :  { %p3871_p1 = scmp.ne.s32.totalorder %s4374_s10, %s3870_s20  ;;  %p3874_p2 = scmp.lt.u32.totalorder %s3870_s20, %s4374_s10 }
 0xa8e   :  { %p3876_p3 = pnand %p3874_p2, %p3871_p1 }
 0xa90   :  { %3879 = shalt.err (!%p3876_p3)
}
 0xa91   :  { %3450 = dma.vmem_to_hbm [thread:$0]  %s3445_s14, 96, %s4374_s10, [#allocation4], %s3896_s24, %s3896_s24, %s3901_s3  }
 0xa92   :  { %3892 = dma.done.wait [#allocation4], 96  }
 0xa93   :  { %3893 = vsyncadd [#allocation4], 4294967200 }
 0xa94   :  { %3454 = vsyncpa [#allocation3], 1 }
 0xa95   :  { %3455 = vsyncpa [#allocation6], 1 }
 0xa96   :  { %3456 = vsyncpa [#allocation9], 1 }
 0xa97   :  { %3457 = vsyncpa [#allocation12], 1 }
 0xa98   :  { %3458 = vsyncpa [#allocation15], 1 }
 0xa99   :  { %3459 = vsyncpa [#allocation18], 1 }
 0xa9a   :  { %3460 = vsyncpa [#allocation4], 1 }

</bundles_post_ra>
